<compile_context>
chip_gen: v7x
topology: tpu7x:2x2x1
jax: 0.10.0
libtpu: 0.0.40
codegen_flags: <defaults>
</compile_context>

<pallas_src>
import functools

import jax
import jax.numpy as jnp
from jax import lax
from jax.experimental import pallas as pl
from jax.experimental.pallas import tpu as pltpu

# ----------------------------- config (small, synthetic) --------------------
HIDDEN = 64          # config.hidden_size
INTER = 128          # config.intermediate_size
HEADS = 4            # config.num_attention_heads
HEAD_DIM = HIDDEN // HEADS
LAYERS = 2           # config.num_hidden_layers
CHANNELS = 3         # config.num_channels
PATCH = 4            # config.patch_size
PATCH_DIM = CHANNELS * PATCH * PATCH   # 48
NUM_PATCHES = 64     # config.num_patches
POS_SIZE = 8         # int(sqrt(num_patches))
EPS = 1e-6           # config.layer_norm_eps
BATCH = 2
SEQ = NUM_PATCHES    # max_num_patches (sequence length)
MASK_NEG = -1e9      # large finite additive mask (identical post-softmax, no -inf risk)


# ----------------------------- fused Pallas kernel ---------------------------
def _siglip2_kernel(pix_ref, pos_ref, mask_ref,
                    patch_w, patch_b,
                    ln1_s, ln1_b, qkv_w, qkv_b, o_w, o_b,
                    ln2_s, ln2_b, fc1_w, fc1_b, fc2_w, fc2_b,
                    post_w, post_b,
                    out_ref,
                    *, num_heads, head_dim, hidden, eps):
    layer = pl.program_id(1)
    n_layers = pl.num_programs(1)

    # ---- layer 0: patch embedding (Linear) + resized positional embeddings ----
    # The output block doubles as the layer-to-layer hidden-state carry: its
    # block index is constant along the layer axis, so it stays in VMEM.
    @pl.when(layer == 0)
    def _init():
        pe = jnp.dot(pix_ref[0].astype(jnp.bfloat16), patch_w[...],
                     preferred_element_type=jnp.float32) + patch_b[...]
        out_ref[0] = pe + pos_ref[0]

    def ln(z, scale, bias):
        mu = jnp.mean(z, axis=-1, keepdims=True)
        var = jnp.mean(jnp.square(z - mu), axis=-1, keepdims=True)
        return (z - mu) * lax.rsqrt(var + eps) * scale + bias

    x = out_ref[0]              # (S, D) f32 carry, VMEM-resident across layers
    seq = x.shape[0]
    # additive key mask, broadcast hoisted out of the per-head loop
    mask2d = jnp.broadcast_to(mask_ref[0], (seq, seq))      # (S, S) f32

    # ---------------------------- self attention ----------------------------
    h = ln(x, ln1_s[0], ln1_b[0])
    # fused QKV projection (one (S,D)x(D,3D) MXU op); softmax scale is folded
    # into the q columns of qkv_w / qkv_b at packing time.
    qkv = jnp.dot(h.astype(jnp.bfloat16), qkv_w[0],
                  preferred_element_type=jnp.float32) + qkv_b[0]   # (S, 3D) f32
    ow = o_w[0]                                                    # (D, D) bf16

    attn = None
    for hh in range(num_heads):
        lo = hh * head_dim
        qh = qkv[:, lo:lo + head_dim]
        kh = qkv[:, hidden + lo:hidden + lo + head_dim]
        vh = qkv[:, 2 * hidden + lo:2 * hidden + lo + head_dim]
        sc = jnp.dot(qh.astype(jnp.bfloat16), kh.astype(jnp.bfloat16).T,
                     preferred_element_type=jnp.float32)           # (S, S), scale pre-folded
        sc = sc + mask2d
        sc = sc - jnp.max(sc, axis=-1, keepdims=True)
        p = jnp.exp(sc)
        p = p * pl.reciprocal(jnp.sum(p, axis=-1, keepdims=True), approx=True)
        ctx = jnp.dot(p.astype(jnp.bfloat16), vh.astype(jnp.bfloat16),
                      preferred_element_type=jnp.float32)          # (S, hd)
        # fold the head's contribution straight through the output projection:
        # lane-dense (S, D) accumulation, no narrow stores, no ctx scratch.
        contrib = jnp.dot(ctx.astype(jnp.bfloat16), ow[lo:lo + head_dim, :],
                          preferred_element_type=jnp.float32)      # (S, D)
        attn = contrib if attn is None else attn + contrib
    x = x + attn + o_b[0]

    # --------------------------- MLP (gelu_pytorch_tanh) ---------------------
    h2 = ln(x, ln2_s[0], ln2_b[0])
    m = jnp.dot(h2.astype(jnp.bfloat16), fc1_w[0],
                preferred_element_type=jnp.float32) + fc1_b[0]
    m = 0.5 * m * (1.0 + jnp.tanh(0.7978845608028654 * (m + 0.044715 * m * m * m)))
    m = jnp.dot(m.astype(jnp.bfloat16), fc2_w[0],
                preferred_element_type=jnp.float32) + fc2_b[0]
    x = x + m

    # ---- carry / finalize: non-final layers store the raw hidden state,  ----
    # ---- the last layer stores post_layernorm(x) (single lane-dense write) --
    @pl.when(layer < n_layers - 1)
    def _carry():
        out_ref[0] = x

    @pl.when(layer == n_layers - 1)
    def _final():
        out_ref[0] = ln(x, post_w[...], post_b[...])


# ----------------------------- glue (plain JAX) -------------------------------
def resize_positional_embeddings(pos_emb, spatial_shapes, max_length):
    # Siglip2VisionEmbeddings.resize_positional_embeddings: bilinear (antialias)
    # resize per image; tail is padded with the FIRST resized row
    # (resized_embeddings[0]), exactly as in the reference implementation.
    # TODO(synk): jax.image.resize's antialias triangle filter is numerically very
    # close to, but not bit-identical with, torch F.interpolate(antialias=True).
    D = pos_emb.shape[-1]
    outs = []
    for (h, w) in spatial_shapes:
        resized = jax.image.resize(pos_emb, (h, w, D), method="linear", antialias=True)
        flat = resized.reshape(h * w, D)
        if max_length > h * w:
            pad = jnp.broadcast_to(flat[0], (max_length - h * w, D))
            flat = jnp.concatenate([flat, pad], axis=0)
        outs.append(flat)
    return jnp.stack(outs, axis=0)


def siglip2_vision_transformer(pixel_values, attention_mask, spatial_shapes, params):
    B, S, P = pixel_values.shape
    D = HIDDEN

    pos = params["pos_emb"].reshape(POS_SIZE, POS_SIZE, D)
    pos_resized = resize_positional_embeddings(pos, spatial_shapes, S)   # (B, S, D) f32

    # _prepare_4d_attention_mask equivalent: additive key mask, broadcast over queries.
    add_mask = ((1.0 - attention_mask.astype(jnp.float32)) * MASK_NEG).reshape(B, 1, S)

    kern = functools.partial(_siglip2_kernel, num_heads=HEADS, head_dim=HEAD_DIM,
                             hidden=HIDDEN, eps=EPS)

    def bspec(shape):   # per-batch blocks
        return pl.BlockSpec((1,) + shape, lambda b, l: (b, 0, 0))

    def lspec(shape):   # per-layer stacked parameter blocks
        return pl.BlockSpec((1,) + shape, lambda b, l: (l, 0, 0))

    def cspec(shape):   # constant (layer/batch independent) blocks
        return pl.BlockSpec(shape, lambda b, l: (0,) * len(shape))

    last_hidden_state = pl.pallas_call(
        kern,
        out_shape=jax.ShapeDtypeStruct((B, S, D), jnp.float32),
        grid=(B, LAYERS),
        in_specs=[
            bspec((S, P)),          # pixel_values
            bspec((S, D)),          # resized positional embeddings
            bspec((1, S)),          # additive attention mask
            cspec((P, D)),          # patch_w (bf16)
            cspec((1, D)),          # patch_b
            lspec((1, D)),          # ln1 weight
            lspec((1, D)),          # ln1 bias
            lspec((D, 3 * D)),      # fused qkv weight (bf16, q pre-scaled)
            lspec((1, 3 * D)),      # fused qkv bias (q pre-scaled)
            lspec((D, D)),          # out_proj weight (bf16)
            lspec((1, D)),          # out_proj bias
            lspec((1, D)),          # ln2 weight
            lspec((1, D)),          # ln2 bias
            lspec((D, INTER)),      # fc1 weight (bf16)
            lspec((1, INTER)),      # fc1 bias
            lspec((INTER, D)),      # fc2 weight (bf16)
            lspec((1, D)),          # fc2 bias
            cspec((1, D)),          # post_layernorm weight
            cspec((1, D)),          # post_layernorm bias
        ],
        # Block index constant along the layer axis -> VMEM-resident carry;
        # HBM writeback happens once per batch, after the final layer.
        out_specs=bspec((S, D)),
        compiler_params=pltpu.CompilerParams(
            dimension_semantics=("parallel", "arbitrary")),
    )(pixel_values.astype(jnp.float32), pos_resized, add_mask,
      params["patch_w"], params["patch_b"],
      params["ln1_s"], params["ln1_b"], params["qkv_w"], params["qkv_b"],
      params["o_w"], params["o_b"], params["ln2_s"], params["ln2_b"],
      params["fc1_w"], params["fc1_b"], params["fc2_w"], params["fc2_b"],
      params["post_ln_w"], params["post_ln_b"])

    pooler_output = None  # config.vision_use_head = False (head class not provided)
    return last_hidden_state, pooler_output


# ----------------------------- deterministic parameter init -------------------
def init_params(key):
    scale = HEAD_DIM ** -0.5
    keys = jax.random.split(key, 2 + LAYERS)

    def w(k, fi, fo, std=0.02):
        return jax.random.normal(k, (fi, fo), jnp.float32) * std

    def b(k, fo, std=0.01):
        return jax.random.normal(k, (1, fo), jnp.float32) * std

    p = {}
    kp = jax.random.split(keys[0], 2)
    p["patch_w"] = w(kp[0], PATCH_DIM, HIDDEN).astype(jnp.bfloat16)
    p["patch_b"] = b(kp[1], HIDDEN)
    p["pos_emb"] = jax.random.normal(keys[1], (NUM_PATCHES, HIDDEN), jnp.float32) * 0.02
    p["post_ln_w"] = jnp.ones((1, HIDDEN), jnp.float32)
    p["post_ln_b"] = jnp.zeros((1, HIDDEN), jnp.float32)

    names = ("ln1_s", "ln1_b", "qkv_w", "qkv_b", "o_w", "o_b",
             "ln2_s", "ln2_b", "fc1_w", "fc1_b", "fc2_w", "fc2_b")
    stacks = {n: [] for n in names}
    for l in range(LAYERS):
        lk = jax.random.split(keys[2 + l], 12)
        qw, kw_, vw = w(lk[0], HIDDEN, HIDDEN), w(lk[1], HIDDEN, HIDDEN), w(lk[2], HIDDEN, HIDDEN)
        qb, kb, vb = b(lk[3], HIDDEN), b(lk[4], HIDDEN), b(lk[5], HIDDEN)
        # fused QKV with the softmax scale folded into the q columns.
        stacks["qkv_w"].append(jnp.concatenate([qw * scale, kw_, vw], axis=1))
        stacks["qkv_b"].append(jnp.concatenate([qb * scale, kb, vb], axis=1))
        stacks["o_w"].append(w(lk[6], HIDDEN, HIDDEN))
        stacks["o_b"].append(b(lk[7], HIDDEN))
        stacks["fc1_w"].append(w(lk[8], HIDDEN, INTER))
        stacks["fc1_b"].append(b(lk[9], INTER))
        stacks["fc2_w"].append(w(lk[10], INTER, HIDDEN))
        stacks["fc2_b"].append(b(lk[11], HIDDEN))
        stacks["ln1_s"].append(jnp.ones((1, HIDDEN), jnp.float32))
        stacks["ln1_b"].append(jnp.zeros((1, HIDDEN), jnp.float32))
        stacks["ln2_s"].append(jnp.ones((1, HIDDEN), jnp.float32))
        stacks["ln2_b"].append(jnp.zeros((1, HIDDEN), jnp.float32))

    for name, lst in stacks.items():
        arr = jnp.stack(lst, axis=0)                       # (LAYERS, rows, cols)
        if name.endswith("_w"):                            # MXU weights in bf16
            arr = arr.astype(jnp.bfloat16)
        p[name] = arr
    return p


# ----------------------------- main -------------------------------------------
if __name__ == "__main__":
    key = jax.random.PRNGKey(0)
    k_pix, k_par = jax.random.split(key)

    pixel_values = jax.random.normal(k_pix, (BATCH, SEQ, PATCH_DIM), jnp.float32)
    spatial_shapes = [(8, 8), (6, 5)]              # (h, w) per image, static
    attention_mask = jnp.stack(
        [(jnp.arange(SEQ) < h * w).astype(jnp.int32) for (h, w) in spatial_shapes])

    params = init_params(k_par)

    last_hidden_state, pooler_output = siglip2_vision_transformer(
        pixel_values, attention_mask, spatial_shapes, params)
    jax.block_until_ready(last_hidden_state)

    assert last_hidden_state.shape == (BATCH, SEQ, HIDDEN)
    assert bool(jnp.all(jnp.isfinite(last_hidden_state)))
    assert pooler_output is None
    print("KERNEL_OK")
</pallas_src>

<mosaic_0001>
module attributes {stable_mosaic.version = 11 : i64} {
  func.func @_siglip2_kernel(%arg0: i32, %arg1: i32, %arg2: memref<1x64x48xf32, #tpu.memory_space<vmem>>, %arg3: memref<1x64x64xf32, #tpu.memory_space<vmem>>, %arg4: memref<1x1x64xf32, #tpu.memory_space<vmem>>, %arg5: memref<48x64xbf16, #tpu.memory_space<vmem>>, %arg6: memref<1x64xf32, #tpu.memory_space<vmem>>, %arg7: memref<1x1x64xf32, #tpu.memory_space<vmem>>, %arg8: memref<1x1x64xf32, #tpu.memory_space<vmem>>, %arg9: memref<1x64x192xbf16, #tpu.memory_space<vmem>>, %arg10: memref<1x1x192xf32, #tpu.memory_space<vmem>>, %arg11: memref<1x64x64xbf16, #tpu.memory_space<vmem>>, %arg12: memref<1x1x64xf32, #tpu.memory_space<vmem>>, %arg13: memref<1x1x64xf32, #tpu.memory_space<vmem>>, %arg14: memref<1x1x64xf32, #tpu.memory_space<vmem>>, %arg15: memref<1x64x128xbf16, #tpu.memory_space<vmem>>, %arg16: memref<1x1x128xf32, #tpu.memory_space<vmem>>, %arg17: memref<1x128x64xbf16, #tpu.memory_space<vmem>>, %arg18: memref<1x1x64xf32, #tpu.memory_space<vmem>>, %arg19: memref<1x64xf32, #tpu.memory_space<vmem>>, %arg20: memref<1x64xf32, #tpu.memory_space<vmem>>, %arg21: memref<1x64x64xf32, #tpu.memory_space<vmem>>) attributes {dimension_semantics = [#tpu.dimension_semantics<parallel>, #tpu.dimension_semantics<arbitrary>], iteration_bounds = array<i64: 2, 2>, scalar_prefetch = 0 : i64, scratch_operands = 0 : i64, tpu.core_type = #tpu.core_type<tc>, window_params = [{transform_indices = @transform_0, window_bounds = array<i64: 1, 64, 48>}, {transform_indices = @transform_1, window_bounds = array<i64: 1, 64, 64>}, {transform_indices = @transform_2, window_bounds = array<i64: 1, 1, 64>}, {pipeline_mode = #tpu.pipeline_mode<synchronous>, transform_indices = @transform_3, window_bounds = array<i64: 48, 64>}, {pipeline_mode = #tpu.pipeline_mode<synchronous>, transform_indices = @transform_4, window_bounds = array<i64: 1, 64>}, {transform_indices = @transform_5, window_bounds = array<i64: 1, 1, 64>}, {transform_indices = @transform_6, window_bounds = array<i64: 1, 1, 64>}, {transform_indices = @transform_7, window_bounds = array<i64: 1, 64, 192>}, {transform_indices = @transform_8, window_bounds = array<i64: 1, 1, 192>}, {transform_indices = @transform_9, window_bounds = array<i64: 1, 64, 64>}, {transform_indices = @transform_10, window_bounds = array<i64: 1, 1, 64>}, {transform_indices = @transform_11, window_bounds = array<i64: 1, 1, 64>}, {transform_indices = @transform_12, window_bounds = array<i64: 1, 1, 64>}, {transform_indices = @transform_13, window_bounds = array<i64: 1, 64, 128>}, {transform_indices = @transform_14, window_bounds = array<i64: 1, 1, 128>}, {transform_indices = @transform_15, window_bounds = array<i64: 1, 128, 64>}, {transform_indices = @transform_16, window_bounds = array<i64: 1, 1, 64>}, {pipeline_mode = #tpu.pipeline_mode<synchronous>, transform_indices = @transform_17, window_bounds = array<i64: 1, 64>}, {pipeline_mode = #tpu.pipeline_mode<synchronous>, transform_indices = @transform_18, window_bounds = array<i64: 1, 64>}, {transform_indices = @transform_19, window_bounds = array<i64: 1, 64, 64>}]} {
    %c0_i32 = arith.constant 0 : i32
    %0 = arith.cmpi eq, %arg1, %c0_i32 : i32
    %1 = arith.extui %0 : i1 to i32
    %c0_i32_0 = arith.constant 0 : i32
    %2 = arith.cmpi ne, %1, %c0_i32_0 : i32
    scf.if %2 {
      %c0_81 = arith.constant 0 : index
      %c0_82 = arith.constant 0 : index
      %c0_83 = arith.constant 0 : index
      %211 = vector.load %arg2[%c0_81, %c0_82, %c0_83] : memref<1x64x48xf32, #tpu.memory_space<vmem>>, vector<1x64x48xf32>
      %212 = vector.shape_cast %211 : vector<1x64x48xf32> to vector<64x48xf32>
      %213 = arith.truncf %212 : vector<64x48xf32> to vector<64x48xbf16>
      %c0_84 = arith.constant 0 : index
      %c0_85 = arith.constant 0 : index
      %214 = vector.load %arg5[%c0_84, %c0_85] : memref<48x64xbf16, #tpu.memory_space<vmem>>, vector<48x64xbf16>
      %cst_86 = arith.constant dense<0.000000e+00> : vector<64x64xf32>
      %215 = tpu.matmul %213, %214, %cst_86 {dimension_numbers = #tpu.dot_dimension_numbers<[1], [0], [0], [1], [0, 0, 1, 1], [], []>} : vector<64x48xbf16>, vector<48x64xbf16>, vector<64x64xf32> -> vector<64x64xf32>
      %c0_87 = arith.constant 0 : index
      %c0_88 = arith.constant 0 : index
      %216 = vector.load %arg6[%c0_87, %c0_88] : memref<1x64xf32, #tpu.memory_space<vmem>>, vector<1x64xf32>
      %217 = vector.broadcast %216 : vector<1x64xf32> to vector<64x64xf32>
      %218 = arith.addf %215, %217 : vector<64x64xf32>
      %c0_89 = arith.constant 0 : index
      %c0_90 = arith.constant 0 : index
      %c0_91 = arith.constant 0 : index
      %219 = vector.load %arg3[%c0_89, %c0_90, %c0_91] : memref<1x64x64xf32, #tpu.memory_space<vmem>>, vector<1x64x64xf32>
      %220 = vector.shape_cast %219 : vector<1x64x64xf32> to vector<64x64xf32>
      %221 = arith.addf %218, %220 : vector<64x64xf32>
      %c0_92 = arith.constant 0 : index
      %c0_93 = arith.constant 0 : index
      %c0_94 = arith.constant 0 : index
      %222 = vector.load %arg21[%c0_92, %c0_93, %c0_94] : memref<1x64x64xf32, #tpu.memory_space<vmem>>, vector<1x64x64xf32>
      %223 = vector.shape_cast %222 : vector<1x64x64xf32> to vector<64x64xf32>
      %224 = vector.shape_cast %221 : vector<64x64xf32> to vector<1x64x64xf32>
      tpu.vector_store %arg21[%c0_92, %c0_93, %c0_94], %224 {strides = array<i32>} : memref<1x64x64xf32, #tpu.memory_space<vmem>>, vector<1x64x64xf32>,
    } else {
    }
    %c0 = arith.constant 0 : index
    %c0_1 = arith.constant 0 : index
    %c0_2 = arith.constant 0 : index
    %3 = vector.load %arg21[%c0, %c0_1, %c0_2] : memref<1x64x64xf32, #tpu.memory_space<vmem>>, vector<1x64x64xf32>
    %4 = vector.shape_cast %3 : vector<1x64x64xf32> to vector<64x64xf32>
    %c0_3 = arith.constant 0 : index
    %c0_4 = arith.constant 0 : index
    %c0_5 = arith.constant 0 : index
    %5 = vector.load %arg4[%c0_3, %c0_4, %c0_5] : memref<1x1x64xf32, #tpu.memory_space<vmem>>, vector<1x1x64xf32>
    %6 = vector.shape_cast %5 : vector<1x1x64xf32> to vector<1x64xf32>
    %7 = vector.shape_cast %6 : vector<1x64xf32> to vector<1x64xf32>
    %8 = vector.broadcast %7 : vector<1x64xf32> to vector<64x64xf32>
    %c0_6 = arith.constant 0 : index
    %c0_7 = arith.constant 0 : index
    %c0_8 = arith.constant 0 : index
    %9 = vector.load %arg7[%c0_6, %c0_7, %c0_8] : memref<1x1x64xf32, #tpu.memory_space<vmem>>, vector<1x1x64xf32>
    %10 = vector.shape_cast %9 : vector<1x1x64xf32> to vector<1x64xf32>
    %c0_9 = arith.constant 0 : index
    %c0_10 = arith.constant 0 : index
    %c0_11 = arith.constant 0 : index
    %11 = vector.load %arg8[%c0_9, %c0_10, %c0_11] : memref<1x1x64xf32, #tpu.memory_space<vmem>>, vector<1x1x64xf32>
    %12 = vector.shape_cast %11 : vector<1x1x64xf32> to vector<1x64xf32>
    %cst = arith.constant dense<0.000000e+00> : vector<64xf32>
    %13 = vector.multi_reduction <add>, %4, %cst [1] : vector<64x64xf32> to vector<64xf32>
    %14 = vector.shape_cast %13 : vector<64xf32> to vector<64x1xf32>
    %cst_12 = arith.constant 6.400000e+01 : f32
    %15 = vector.broadcast %cst_12 : f32 to vector<64x1xf32>
    %16 = arith.divf %14, %15 : vector<64x1xf32>
    %17 = vector.broadcast %16 : vector<64x1xf32> to vector<64x64xf32>
    %18 = arith.subf %4, %17 : vector<64x64xf32>
    %19 = arith.mulf %18, %18 : vector<64x64xf32>
    %cst_13 = arith.constant dense<0.000000e+00> : vector<64xf32>
    %20 = vector.multi_reduction <add>, %19, %cst_13 [1] : vector<64x64xf32> to vector<64xf32>
    %21 = vector.shape_cast %20 : vector<64xf32> to vector<64x1xf32>
    %cst_14 = arith.constant 6.400000e+01 : f32
    %22 = vector.broadcast %cst_14 : f32 to vector<64x1xf32>
    %23 = arith.divf %21, %22 : vector<64x1xf32>
    %24 = vector.broadcast %16 : vector<64x1xf32> to vector<64x64xf32>
    %25 = arith.subf %4, %24 : vector<64x64xf32>
    %cst_15 = arith.constant 9.99999997E-7 : f32
    %26 = vector.broadcast %cst_15 : f32 to vector<64x1xf32>
    %27 = arith.addf %23, %26 : vector<64x1xf32>
    %28 = math.rsqrt %27 : vector<64x1xf32>
    %29 = vector.broadcast %28 : vector<64x1xf32> to vector<64x64xf32>
    %30 = arith.mulf %25, %29 : vector<64x64xf32>
    %31 = vector.broadcast %10 : vector<1x64xf32> to vector<64x64xf32>
    %32 = arith.mulf %30, %31 : vector<64x64xf32>
    %33 = vector.broadcast %12 : vector<1x64xf32> to vector<64x64xf32>
    %34 = arith.addf %32, %33 : vector<64x64xf32>
    %35 = arith.truncf %34 : vector<64x64xf32> to vector<64x64xbf16>
    %c0_16 = arith.constant 0 : index
    %c0_17 = arith.constant 0 : index
    %c0_18 = arith.constant 0 : index
    %36 = vector.load %arg9[%c0_16, %c0_17, %c0_18] : memref<1x64x192xbf16, #tpu.memory_space<vmem>>, vector<1x64x192xbf16>
    %37 = vector.shape_cast %36 : vector<1x64x192xbf16> to vector<64x192xbf16>
    %cst_19 = arith.constant dense<0.000000e+00> : vector<64x192xf32>
    %38 = tpu.matmul %35, %37, %cst_19 {dimension_numbers = #tpu.dot_dimension_numbers<[1], [0], [0], [1], [0, 0, 1, 1], [], []>} : vector<64x64xbf16>, vector<64x192xbf16>, vector<64x192xf32> -> vector<64x192xf32>
    %c0_20 = arith.constant 0 : index
    %c0_21 = arith.constant 0 : index
    %c0_22 = arith.constant 0 : index
    %39 = vector.load %arg10[%c0_20, %c0_21, %c0_22] : memref<1x1x192xf32, #tpu.memory_space<vmem>>, vector<1x1x192xf32>
    %40 = vector.shape_cast %39 : vector<1x1x192xf32> to vector<1x192xf32>
    %41 = vector.broadcast %40 : vector<1x192xf32> to vector<64x192xf32>
    %42 = arith.addf %38, %41 : vector<64x192xf32>
    %c0_23 = arith.constant 0 : index
    %c0_24 = arith.constant 0 : index
    %c0_25 = arith.constant 0 : index
    %43 = vector.load %arg11[%c0_23, %c0_24, %c0_25] : memref<1x64x64xbf16, #tpu.memory_space<vmem>>, vector<1x64x64xbf16>
    %44 = vector.shape_cast %43 : vector<1x64x64xbf16> to vector<64x64xbf16>
    %45 = vector.extract_strided_slice %42 {offsets = [0, 0], sizes = [64, 16], strides = [1, 1]} : vector<64x192xf32> to vector<64x16xf32>
    %46 = vector.extract_strided_slice %42 {offsets = [0, 64], sizes = [64, 16], strides = [1, 1]} : vector<64x192xf32> to vector<64x16xf32>
    %47 = vector.extract_strided_slice %42 {offsets = [0, 128], sizes = [64, 16], strides = [1, 1]} : vector<64x192xf32> to vector<64x16xf32>
    %48 = arith.truncf %45 : vector<64x16xf32> to vector<64x16xbf16>
    %49 = arith.truncf %46 : vector<64x16xf32> to vector<64x16xbf16>
    %50 = tpu.transpose %49, [1, 0] : vector<64x16xbf16> -> vector<16x64xbf16>
    %cst_26 = arith.constant dense<0.000000e+00> : vector<64x64xf32>
    %51 = tpu.matmul %48, %50, %cst_26 {dimension_numbers = #tpu.dot_dimension_numbers<[1], [0], [0], [1], [0, 0, 1, 1], [], []>} : vector<64x16xbf16>, vector<16x64xbf16>, vector<64x64xf32> -> vector<64x64xf32>
    %52 = arith.addf %51, %8 : vector<64x64xf32>
    %cst_27 = arith.constant dense<0xFF800000> : vector<64xf32>
    %53 = vector.multi_reduction <maximumf>, %52, %cst_27 [1] : vector<64x64xf32> to vector<64xf32>
    %54 = vector.shape_cast %53 : vector<64xf32> to vector<64x1xf32>
    %55 = vector.broadcast %54 : vector<64x1xf32> to vector<64x64xf32>
    %56 = arith.subf %52, %55 : vector<64x64xf32>
    %57 = math.exp %56 : vector<64x64xf32>
    %cst_28 = arith.constant dense<0.000000e+00> : vector<64xf32>
    %58 = vector.multi_reduction <add>, %57, %cst_28 [1] : vector<64x64xf32> to vector<64xf32>
    %59 = vector.shape_cast %58 : vector<64xf32> to vector<64x1xf32>
    %60 = tpu.reciprocal %59 {approx = true} : vector<64x1xf32> -> vector<64x1xf32>
    %61 = vector.broadcast %60 : vector<64x1xf32> to vector<64x64xf32>
    %62 = arith.mulf %57, %61 : vector<64x64xf32>
    %63 = arith.truncf %62 : vector<64x64xf32> to vector<64x64xbf16>
    %64 = arith.truncf %47 : vector<64x16xf32> to vector<64x16xbf16>
    %cst_29 = arith.constant dense<0.000000e+00> : vector<64x16xf32>
    %65 = tpu.matmul %63, %64, %cst_29 {dimension_numbers = #tpu.dot_dimension_numbers<[1], [0], [0], [1], [0, 0, 1, 1], [], []>} : vector<64x64xbf16>, vector<64x16xbf16>, vector<64x16xf32> -> vector<64x16xf32>
    %66 = arith.truncf %65 : vector<64x16xf32> to vector<64x16xbf16>
    %67 = vector.extract_strided_slice %44 {offsets = [0, 0], sizes = [16, 64], strides = [1, 1]} : vector<64x64xbf16> to vector<16x64xbf16>
    %cst_30 = arith.constant dense<0.000000e+00> : vector<64x64xf32>
    %68 = tpu.matmul %66, %67, %cst_30 {dimension_numbers = #tpu.dot_dimension_numbers<[1], [0], [0], [1], [0, 0, 1, 1], [], []>} : vector<64x16xbf16>, vector<16x64xbf16>, vector<64x64xf32> -> vector<64x64xf32>
    %69 = vector.extract_strided_slice %42 {offsets = [0, 16], sizes = [64, 16], strides = [1, 1]} : vector<64x192xf32> to vector<64x16xf32>
    %70 = vector.extract_strided_slice %42 {offsets = [0, 80], sizes = [64, 16], strides = [1, 1]} : vector<64x192xf32> to vector<64x16xf32>
    %71 = vector.extract_strided_slice %42 {offsets = [0, 144], sizes = [64, 16], strides = [1, 1]} : vector<64x192xf32> to vector<64x16xf32>
    %72 = arith.truncf %69 : vector<64x16xf32> to vector<64x16xbf16>
    %73 = arith.truncf %70 : vector<64x16xf32> to vector<64x16xbf16>
    %74 = tpu.transpose %73, [1, 0] : vector<64x16xbf16> -> vector<16x64xbf16>
    %cst_31 = arith.constant dense<0.000000e+00> : vector<64x64xf32>
    %75 = tpu.matmul %72, %74, %cst_31 {dimension_numbers = #tpu.dot_dimension_numbers<[1], [0], [0], [1], [0, 0, 1, 1], [], []>} : vector<64x16xbf16>, vector<16x64xbf16>, vector<64x64xf32> -> vector<64x64xf32>
    %76 = arith.addf %75, %8 : vector<64x64xf32>
    %cst_32 = arith.constant dense<0xFF800000> : vector<64xf32>
    %77 = vector.multi_reduction <maximumf>, %76, %cst_32 [1] : vector<64x64xf32> to vector<64xf32>
    %78 = vector.shape_cast %77 : vector<64xf32> to vector<64x1xf32>
    %79 = vector.broadcast %78 : vector<64x1xf32> to vector<64x64xf32>
    %80 = arith.subf %76, %79 : vector<64x64xf32>
    %81 = math.exp %80 : vector<64x64xf32>
    %cst_33 = arith.constant dense<0.000000e+00> : vector<64xf32>
    %82 = vector.multi_reduction <add>, %81, %cst_33 [1] : vector<64x64xf32> to vector<64xf32>
    %83 = vector.shape_cast %82 : vector<64xf32> to vector<64x1xf32>
    %84 = tpu.reciprocal %83 {approx = true} : vector<64x1xf32> -> vector<64x1xf32>
    %85 = vector.broadcast %84 : vector<64x1xf32> to vector<64x64xf32>
    %86 = arith.mulf %81, %85 : vector<64x64xf32>
    %87 = arith.truncf %86 : vector<64x64xf32> to vector<64x64xbf16>
    %88 = arith.truncf %71 : vector<64x16xf32> to vector<64x16xbf16>
    %cst_34 = arith.constant dense<0.000000e+00> : vector<64x16xf32>
    %89 = tpu.matmul %87, %88, %cst_34 {dimension_numbers = #tpu.dot_dimension_numbers<[1], [0], [0], [1], [0, 0, 1, 1], [], []>} : vector<64x64xbf16>, vector<64x16xbf16>, vector<64x16xf32> -> vector<64x16xf32>
    %90 = arith.truncf %89 : vector<64x16xf32> to vector<64x16xbf16>
    %91 = vector.extract_strided_slice %44 {offsets = [16, 0], sizes = [16, 64], strides = [1, 1]} : vector<64x64xbf16> to vector<16x64xbf16>
    %cst_35 = arith.constant dense<0.000000e+00> : vector<64x64xf32>
    %92 = tpu.matmul %90, %91, %cst_35 {dimension_numbers = #tpu.dot_dimension_numbers<[1], [0], [0], [1], [0, 0, 1, 1], [], []>} : vector<64x16xbf16>, vector<16x64xbf16>, vector<64x64xf32> -> vector<64x64xf32>
    %93 = arith.addf %68, %92 : vector<64x64xf32>
    %94 = vector.extract_strided_slice %42 {offsets = [0, 32], sizes = [64, 16], strides = [1, 1]} : vector<64x192xf32> to vector<64x16xf32>
    %95 = vector.extract_strided_slice %42 {offsets = [0, 96], sizes = [64, 16], strides = [1, 1]} : vector<64x192xf32> to vector<64x16xf32>
    %96 = vector.extract_strided_slice %42 {offsets = [0, 160], sizes = [64, 16], strides = [1, 1]} : vector<64x192xf32> to vector<64x16xf32>
    %97 = arith.truncf %94 : vector<64x16xf32> to vector<64x16xbf16>
    %98 = arith.truncf %95 : vector<64x16xf32> to vector<64x16xbf16>
    %99 = tpu.transpose %98, [1, 0] : vector<64x16xbf16> -> vector<16x64xbf16>
    %cst_36 = arith.constant dense<0.000000e+00> : vector<64x64xf32>
    %100 = tpu.matmul %97, %99, %cst_36 {dimension_numbers = #tpu.dot_dimension_numbers<[1], [0], [0], [1], [0, 0, 1, 1], [], []>} : vector<64x16xbf16>, vector<16x64xbf16>, vector<64x64xf32> -> vector<64x64xf32>
    %101 = arith.addf %100, %8 : vector<64x64xf32>
    %cst_37 = arith.constant dense<0xFF800000> : vector<64xf32>
    %102 = vector.multi_reduction <maximumf>, %101, %cst_37 [1] : vector<64x64xf32> to vector<64xf32>
    %103 = vector.shape_cast %102 : vector<64xf32> to vector<64x1xf32>
    %104 = vector.broadcast %103 : vector<64x1xf32> to vector<64x64xf32>
    %105 = arith.subf %101, %104 : vector<64x64xf32>
    %106 = math.exp %105 : vector<64x64xf32>
    %cst_38 = arith.constant dense<0.000000e+00> : vector<64xf32>
    %107 = vector.multi_reduction <add>, %106, %cst_38 [1] : vector<64x64xf32> to vector<64xf32>
    %108 = vector.shape_cast %107 : vector<64xf32> to vector<64x1xf32>
    %109 = tpu.reciprocal %108 {approx = true} : vector<64x1xf32> -> vector<64x1xf32>
    %110 = vector.broadcast %109 : vector<64x1xf32> to vector<64x64xf32>
    %111 = arith.mulf %106, %110 : vector<64x64xf32>
    %112 = arith.truncf %111 : vector<64x64xf32> to vector<64x64xbf16>
    %113 = arith.truncf %96 : vector<64x16xf32> to vector<64x16xbf16>
    %cst_39 = arith.constant dense<0.000000e+00> : vector<64x16xf32>
    %114 = tpu.matmul %112, %113, %cst_39 {dimension_numbers = #tpu.dot_dimension_numbers<[1], [0], [0], [1], [0, 0, 1, 1], [], []>} : vector<64x64xbf16>, vector<64x16xbf16>, vector<64x16xf32> -> vector<64x16xf32>
    %115 = arith.truncf %114 : vector<64x16xf32> to vector<64x16xbf16>
    %116 = vector.extract_strided_slice %44 {offsets = [32, 0], sizes = [16, 64], strides = [1, 1]} : vector<64x64xbf16> to vector<16x64xbf16>
    %cst_40 = arith.constant dense<0.000000e+00> : vector<64x64xf32>
    %117 = tpu.matmul %115, %116, %cst_40 {dimension_numbers = #tpu.dot_dimension_numbers<[1], [0], [0], [1], [0, 0, 1, 1], [], []>} : vector<64x16xbf16>, vector<16x64xbf16>, vector<64x64xf32> -> vector<64x64xf32>
    %118 = arith.addf %93, %117 : vector<64x64xf32>
    %119 = vector.extract_strided_slice %42 {offsets = [0, 48], sizes = [64, 16], strides = [1, 1]} : vector<64x192xf32> to vector<64x16xf32>
    %120 = vector.extract_strided_slice %42 {offsets = [0, 112], sizes = [64, 16], strides = [1, 1]} : vector<64x192xf32> to vector<64x16xf32>
    %121 = vector.extract_strided_slice %42 {offsets = [0, 176], sizes = [64, 16], strides = [1, 1]} : vector<64x192xf32> to vector<64x16xf32>
    %122 = arith.truncf %119 : vector<64x16xf32> to vector<64x16xbf16>
    %123 = arith.truncf %120 : vector<64x16xf32> to vector<64x16xbf16>
    %124 = tpu.transpose %123, [1, 0] : vector<64x16xbf16> -> vector<16x64xbf16>
    %cst_41 = arith.constant dense<0.000000e+00> : vector<64x64xf32>
    %125 = tpu.matmul %122, %124, %cst_41 {dimension_numbers = #tpu.dot_dimension_numbers<[1], [0], [0], [1], [0, 0, 1, 1], [], []>} : vector<64x16xbf16>, vector<16x64xbf16>, vector<64x64xf32> -> vector<64x64xf32>
    %126 = arith.addf %125, %8 : vector<64x64xf32>
    %cst_42 = arith.constant dense<0xFF800000> : vector<64xf32>
    %127 = vector.multi_reduction <maximumf>, %126, %cst_42 [1] : vector<64x64xf32> to vector<64xf32>
    %128 = vector.shape_cast %127 : vector<64xf32> to vector<64x1xf32>
    %129 = vector.broadcast %128 : vector<64x1xf32> to vector<64x64xf32>
    %130 = arith.subf %126, %129 : vector<64x64xf32>
    %131 = math.exp %130 : vector<64x64xf32>
    %cst_43 = arith.constant dense<0.000000e+00> : vector<64xf32>
    %132 = vector.multi_reduction <add>, %131, %cst_43 [1] : vector<64x64xf32> to vector<64xf32>
    %133 = vector.shape_cast %132 : vector<64xf32> to vector<64x1xf32>
    %134 = tpu.reciprocal %133 {approx = true} : vector<64x1xf32> -> vector<64x1xf32>
    %135 = vector.broadcast %134 : vector<64x1xf32> to vector<64x64xf32>
    %136 = arith.mulf %131, %135 : vector<64x64xf32>
    %137 = arith.truncf %136 : vector<64x64xf32> to vector<64x64xbf16>
    %138 = arith.truncf %121 : vector<64x16xf32> to vector<64x16xbf16>
    %cst_44 = arith.constant dense<0.000000e+00> : vector<64x16xf32>
    %139 = tpu.matmul %137, %138, %cst_44 {dimension_numbers = #tpu.dot_dimension_numbers<[1], [0], [0], [1], [0, 0, 1, 1], [], []>} : vector<64x64xbf16>, vector<64x16xbf16>, vector<64x16xf32> -> vector<64x16xf32>
    %140 = arith.truncf %139 : vector<64x16xf32> to vector<64x16xbf16>
    %141 = vector.extract_strided_slice %44 {offsets = [48, 0], sizes = [16, 64], strides = [1, 1]} : vector<64x64xbf16> to vector<16x64xbf16>
    %cst_45 = arith.constant dense<0.000000e+00> : vector<64x64xf32>
    %142 = tpu.matmul %140, %141, %cst_45 {dimension_numbers = #tpu.dot_dimension_numbers<[1], [0], [0], [1], [0, 0, 1, 1], [], []>} : vector<64x16xbf16>, vector<16x64xbf16>, vector<64x64xf32> -> vector<64x64xf32>
    %143 = arith.addf %118, %142 : vector<64x64xf32>
    %144 = arith.addf %4, %143 : vector<64x64xf32>
    %c0_46 = arith.constant 0 : index
    %c0_47 = arith.constant 0 : index
    %c0_48 = arith.constant 0 : index
    %145 = vector.load %arg12[%c0_46, %c0_47, %c0_48] : memref<1x1x64xf32, #tpu.memory_space<vmem>>, vector<1x1x64xf32>
    %146 = vector.shape_cast %145 : vector<1x1x64xf32> to vector<1x64xf32>
    %147 = vector.broadcast %146 : vector<1x64xf32> to vector<64x64xf32>
    %148 = arith.addf %144, %147 : vector<64x64xf32>
    %c0_49 = arith.constant 0 : index
    %c0_50 = arith.constant 0 : index
    %c0_51 = arith.constant 0 : index
    %149 = vector.load %arg13[%c0_49, %c0_50, %c0_51] : memref<1x1x64xf32, #tpu.memory_space<vmem>>, vector<1x1x64xf32>
    %150 = vector.shape_cast %149 : vector<1x1x64xf32> to vector<1x64xf32>
    %c0_52 = arith.constant 0 : index
    %c0_53 = arith.constant 0 : index
    %c0_54 = arith.constant 0 : index
    %151 = vector.load %arg14[%c0_52, %c0_53, %c0_54] : memref<1x1x64xf32, #tpu.memory_space<vmem>>, vector<1x1x64xf32>
    %152 = vector.shape_cast %151 : vector<1x1x64xf32> to vector<1x64xf32>
    %cst_55 = arith.constant dense<0.000000e+00> : vector<64xf32>
    %153 = vector.multi_reduction <add>, %148, %cst_55 [1] : vector<64x64xf32> to vector<64xf32>
    %154 = vector.shape_cast %153 : vector<64xf32> to vector<64x1xf32>
    %cst_56 = arith.constant 6.400000e+01 : f32
    %155 = vector.broadcast %cst_56 : f32 to vector<64x1xf32>
    %156 = arith.divf %154, %155 : vector<64x1xf32>
    %157 = vector.broadcast %156 : vector<64x1xf32> to vector<64x64xf32>
    %158 = arith.subf %148, %157 : vector<64x64xf32>
    %159 = arith.mulf %158, %158 : vector<64x64xf32>
    %cst_57 = arith.constant dense<0.000000e+00> : vector<64xf32>
    %160 = vector.multi_reduction <add>, %159, %cst_57 [1] : vector<64x64xf32> to vector<64xf32>
    %161 = vector.shape_cast %160 : vector<64xf32> to vector<64x1xf32>
    %cst_58 = arith.constant 6.400000e+01 : f32
    %162 = vector.broadcast %cst_58 : f32 to vector<64x1xf32>
    %163 = arith.divf %161, %162 : vector<64x1xf32>
    %164 = vector.broadcast %156 : vector<64x1xf32> to vector<64x64xf32>
    %165 = arith.subf %148, %164 : vector<64x64xf32>
    %cst_59 = arith.constant 9.99999997E-7 : f32
    %166 = vector.broadcast %cst_59 : f32 to vector<64x1xf32>
    %167 = arith.addf %163, %166 : vector<64x1xf32>
    %168 = math.rsqrt %167 : vector<64x1xf32>
    %169 = vector.broadcast %168 : vector<64x1xf32> to vector<64x64xf32>
    %170 = arith.mulf %165, %169 : vector<64x64xf32>
    %171 = vector.broadcast %150 : vector<1x64xf32> to vector<64x64xf32>
    %172 = arith.mulf %170, %171 : vector<64x64xf32>
    %173 = vector.broadcast %152 : vector<1x64xf32> to vector<64x64xf32>
    %174 = arith.addf %172, %173 : vector<64x64xf32>
    %175 = arith.truncf %174 : vector<64x64xf32> to vector<64x64xbf16>
    %c0_60 = arith.constant 0 : index
    %c0_61 = arith.constant 0 : index
    %c0_62 = arith.constant 0 : index
    %176 = vector.load %arg15[%c0_60, %c0_61, %c0_62] : memref<1x64x128xbf16, #tpu.memory_space<vmem>>, vector<1x64x128xbf16>
    %177 = vector.shape_cast %176 : vector<1x64x128xbf16> to vector<64x128xbf16>
    %cst_63 = arith.constant dense<0.000000e+00> : vector<64x128xf32>
    %178 = tpu.matmul %175, %177, %cst_63 {dimension_numbers = #tpu.dot_dimension_numbers<[1], [0], [0], [1], [0, 0, 1, 1], [], []>} : vector<64x64xbf16>, vector<64x128xbf16>, vector<64x128xf32> -> vector<64x128xf32>
    %c0_64 = arith.constant 0 : index
    %c0_65 = arith.constant 0 : index
    %c0_66 = arith.constant 0 : index
    %179 = vector.load %arg16[%c0_64, %c0_65, %c0_66] : memref<1x1x128xf32, #tpu.memory_space<vmem>>, vector<1x1x128xf32>
    %180 = vector.shape_cast %179 : vector<1x1x128xf32> to vector<1x128xf32>
    %181 = vector.broadcast %180 : vector<1x128xf32> to vector<64x128xf32>
    %182 = arith.addf %178, %181 : vector<64x128xf32>
    %cst_67 = arith.constant 5.000000e-01 : f32
    %183 = vector.broadcast %cst_67 : f32 to vector<64x128xf32>
    %184 = arith.mulf %183, %182 : vector<64x128xf32>
    %cst_68 = arith.constant 4.471500e-02 : f32
    %185 = vector.broadcast %cst_68 : f32 to vector<64x128xf32>
    %186 = arith.mulf %185, %182 : vector<64x128xf32>
    %187 = arith.mulf %186, %182 : vector<64x128xf32>
    %188 = arith.mulf %187, %182 : vector<64x128xf32>
    %189 = arith.addf %182, %188 : vector<64x128xf32>
    %cst_69 = arith.constant 0.797884583 : f32
    %190 = vector.broadcast %cst_69 : f32 to vector<64x128xf32>
    %191 = arith.mulf %190, %189 : vector<64x128xf32>
    %192 = math.tanh %191 : vector<64x128xf32>
    %cst_70 = arith.constant 1.000000e+00 : f32
    %193 = vector.broadcast %cst_70 : f32 to vector<64x128xf32>
    %194 = arith.addf %193, %192 : vector<64x128xf32>
    %195 = arith.mulf %184, %194 : vector<64x128xf32>
    %196 = arith.truncf %195 : vector<64x128xf32> to vector<64x128xbf16>
    %c0_71 = arith.constant 0 : index
    %c0_72 = arith.constant 0 : index
    %c0_73 = arith.constant 0 : index
    %197 = vector.load %arg17[%c0_71, %c0_72, %c0_73] : memref<1x128x64xbf16, #tpu.memory_space<vmem>>, vector<1x128x64xbf16>
    %198 = vector.shape_cast %197 : vector<1x128x64xbf16> to vector<128x64xbf16>
    %cst_74 = arith.constant dense<0.000000e+00> : vector<64x64xf32>
    %199 = tpu.matmul %196, %198, %cst_74 {dimension_numbers = #tpu.dot_dimension_numbers<[1], [0], [0], [1], [0, 0, 1, 1], [], []>} : vector<64x128xbf16>, vector<128x64xbf16>, vector<64x64xf32> -> vector<64x64xf32>
    %c0_75 = arith.constant 0 : index
    %c0_76 = arith.constant 0 : index
    %c0_77 = arith.constant 0 : index
    %200 = vector.load %arg18[%c0_75, %c0_76, %c0_77] : memref<1x1x64xf32, #tpu.memory_space<vmem>>, vector<1x1x64xf32>
    %201 = vector.shape_cast %200 : vector<1x1x64xf32> to vector<1x64xf32>
    %202 = vector.broadcast %201 : vector<1x64xf32> to vector<64x64xf32>
    %203 = arith.addf %199, %202 : vector<64x64xf32>
    %204 = arith.addf %148, %203 : vector<64x64xf32>
    %c1_i32 = arith.constant 1 : i32
    %205 = arith.cmpi slt, %arg1, %c1_i32 : i32
    %206 = arith.extui %205 : i1 to i32
    %c0_i32_78 = arith.constant 0 : i32
    %207 = arith.cmpi ne, %206, %c0_i32_78 : i32
    scf.if %207 {
      %c0_81 = arith.constant 0 : index
      %c0_82 = arith.constant 0 : index
      %c0_83 = arith.constant 0 : index
      %211 = vector.load %arg21[%c0_81, %c0_82, %c0_83] : memref<1x64x64xf32, #tpu.memory_space<vmem>>, vector<1x64x64xf32>
      %212 = vector.shape_cast %211 : vector<1x64x64xf32> to vector<64x64xf32>
      %213 = vector.shape_cast %204 : vector<64x64xf32> to vector<1x64x64xf32>
      tpu.vector_store %arg21[%c0_81, %c0_82, %c0_83], %213 {strides = array<i32>} : memref<1x64x64xf32, #tpu.memory_space<vmem>>, vector<1x64x64xf32>,
    } else {
    }
    %c1_i32_79 = arith.constant 1 : i32
    %208 = arith.cmpi eq, %arg1, %c1_i32_79 : i32
    %209 = arith.extui %208 : i1 to i32
    %c0_i32_80 = arith.constant 0 : i32
    %210 = arith.cmpi ne, %209, %c0_i32_80 : i32
    scf.if %210 {
      %c0_81 = arith.constant 0 : index
      %c0_82 = arith.constant 0 : index
      %211 = vector.load %arg19[%c0_81, %c0_82] : memref<1x64xf32, #tpu.memory_space<vmem>>, vector<1x64xf32>
      %c0_83 = arith.constant 0 : index
      %c0_84 = arith.constant 0 : index
      %212 = vector.load %arg20[%c0_83, %c0_84] : memref<1x64xf32, #tpu.memory_space<vmem>>, vector<1x64xf32>
      %cst_85 = arith.constant dense<0.000000e+00> : vector<64xf32>
      %213 = vector.multi_reduction <add>, %204, %cst_85 [1] : vector<64x64xf32> to vector<64xf32>
      %214 = vector.shape_cast %213 : vector<64xf32> to vector<64x1xf32>
      %cst_86 = arith.constant 6.400000e+01 : f32
      %215 = vector.broadcast %cst_86 : f32 to vector<64x1xf32>
      %216 = arith.divf %214, %215 : vector<64x1xf32>
      %217 = vector.broadcast %216 : vector<64x1xf32> to vector<64x64xf32>
      %218 = arith.subf %204, %217 : vector<64x64xf32>
      %219 = arith.mulf %218, %218 : vector<64x64xf32>
      %cst_87 = arith.constant dense<0.000000e+00> : vector<64xf32>
      %220 = vector.multi_reduction <add>, %219, %cst_87 [1] : vector<64x64xf32> to vector<64xf32>
      %221 = vector.shape_cast %220 : vector<64xf32> to vector<64x1xf32>
      %cst_88 = arith.constant 6.400000e+01 : f32
      %222 = vector.broadcast %cst_88 : f32 to vector<64x1xf32>
      %223 = arith.divf %221, %222 : vector<64x1xf32>
      %224 = vector.broadcast %216 : vector<64x1xf32> to vector<64x64xf32>
      %225 = arith.subf %204, %224 : vector<64x64xf32>
      %cst_89 = arith.constant 9.99999997E-7 : f32
      %226 = vector.broadcast %cst_89 : f32 to vector<64x1xf32>
      %227 = arith.addf %223, %226 : vector<64x1xf32>
      %228 = math.rsqrt %227 : vector<64x1xf32>
      %229 = vector.broadcast %228 : vector<64x1xf32> to vector<64x64xf32>
      %230 = arith.mulf %225, %229 : vector<64x64xf32>
      %231 = vector.broadcast %211 : vector<1x64xf32> to vector<64x64xf32>
      %232 = arith.mulf %230, %231 : vector<64x64xf32>
      %233 = vector.broadcast %212 : vector<1x64xf32> to vector<64x64xf32>
      %234 = arith.addf %232, %233 : vector<64x64xf32>
      %c0_90 = arith.constant 0 : index
      %c0_91 = arith.constant 0 : index
      %c0_92 = arith.constant 0 : index
      %235 = vector.load %arg21[%c0_90, %c0_91, %c0_92] : memref<1x64x64xf32, #tpu.memory_space<vmem>>, vector<1x64x64xf32>
      %236 = vector.shape_cast %235 : vector<1x64x64xf32> to vector<64x64xf32>
      %237 = vector.shape_cast %234 : vector<64x64xf32> to vector<1x64x64xf32>
      tpu.vector_store %arg21[%c0_90, %c0_91, %c0_92], %237 {strides = array<i32>} : memref<1x64x64xf32, #tpu.memory_space<vmem>>, vector<1x64x64xf32>,
    } else {
    }
    return
  }
  func.func @transform_0(%arg0: i32, %arg1: i32) -> (i32, i32, i32) {
    %c0_i32 = arith.constant 0 : i32
    %c0_i32_0 = arith.constant 0 : i32
    %c0_i32_1 = arith.constant 0 : i32
    return %arg0, %c0_i32, %c0_i32_0 : i32, i32, i32
  }
  func.func @transform_1(%arg0: i32, %arg1: i32) -> (i32, i32, i32) {
    %c0_i32 = arith.constant 0 : i32
    %c0_i32_0 = arith.constant 0 : i32
    %c0_i32_1 = arith.constant 0 : i32
    return %arg0, %c0_i32, %c0_i32_0 : i32, i32, i32
  }
  func.func @transform_2(%arg0: i32, %arg1: i32) -> (i32, i32, i32) {
    %c0_i32 = arith.constant 0 : i32
    %c0_i32_0 = arith.constant 0 : i32
    %c0_i32_1 = arith.constant 0 : i32
    return %arg0, %c0_i32, %c0_i32_0 : i32, i32, i32
  }
  func.func @transform_3(%arg0: i32, %arg1: i32) -> (i32, i32) {
    %c0_i32 = arith.constant 0 : i32
    %c0_i32_0 = arith.constant 0 : i32
    %c0_i32_1 = arith.constant 0 : i32
    return %c0_i32, %c0_i32_0 : i32, i32
  }
  func.func @transform_4(%arg0: i32, %arg1: i32) -> (i32, i32) {
    %c0_i32 = arith.constant 0 : i32
    %c0_i32_0 = arith.constant 0 : i32
    %c0_i32_1 = arith.constant 0 : i32
    return %c0_i32, %c0_i32_0 : i32, i32
  }
  func.func @transform_5(%arg0: i32, %arg1: i32) -> (i32, i32, i32) {
    %c0_i32 = arith.constant 0 : i32
    %c0_i32_0 = arith.constant 0 : i32
    %c0_i32_1 = arith.constant 0 : i32
    return %arg1, %c0_i32, %c0_i32_0 : i32, i32, i32
  }
  func.func @transform_6(%arg0: i32, %arg1: i32) -> (i32, i32, i32) {
    %c0_i32 = arith.constant 0 : i32
    %c0_i32_0 = arith.constant 0 : i32
    %c0_i32_1 = arith.constant 0 : i32
    return %arg1, %c0_i32, %c0_i32_0 : i32, i32, i32
  }
  func.func @transform_7(%arg0: i32, %arg1: i32) -> (i32, i32, i32) {
    %c0_i32 = arith.constant 0 : i32
    %c0_i32_0 = arith.constant 0 : i32
    %c0_i32_1 = arith.constant 0 : i32
    return %arg1, %c0_i32, %c0_i32_0 : i32, i32, i32
  }
  func.func @transform_8(%arg0: i32, %arg1: i32) -> (i32, i32, i32) {
    %c0_i32 = arith.constant 0 : i32
    %c0_i32_0 = arith.constant 0 : i32
    %c0_i32_1 = arith.constant 0 : i32
    return %arg1, %c0_i32, %c0_i32_0 : i32, i32, i32
  }
  func.func @transform_9(%arg0: i32, %arg1: i32) -> (i32, i32, i32) {
    %c0_i32 = arith.constant 0 : i32
    %c0_i32_0 = arith.constant 0 : i32
    %c0_i32_1 = arith.constant 0 : i32
    return %arg1, %c0_i32, %c0_i32_0 : i32, i32, i32
  }
  func.func @transform_10(%arg0: i32, %arg1: i32) -> (i32, i32, i32) {
    %c0_i32 = arith.constant 0 : i32
    %c0_i32_0 = arith.constant 0 : i32
    %c0_i32_1 = arith.constant 0 : i32
    return %arg1, %c0_i32, %c0_i32_0 : i32, i32, i32
  }
  func.func @transform_11(%arg0: i32, %arg1: i32) -> (i32, i32, i32) {
    %c0_i32 = arith.constant 0 : i32
    %c0_i32_0 = arith.constant 0 : i32
    %c0_i32_1 = arith.constant 0 : i32
    return %arg1, %c0_i32, %c0_i32_0 : i32, i32, i32
  }
  func.func @transform_12(%arg0: i32, %arg1: i32) -> (i32, i32, i32) {
    %c0_i32 = arith.constant 0 : i32
    %c0_i32_0 = arith.constant 0 : i32
    %c0_i32_1 = arith.constant 0 : i32
    return %arg1, %c0_i32, %c0_i32_0 : i32, i32, i32
  }
  func.func @transform_13(%arg0: i32, %arg1: i32) -> (i32, i32, i32) {
    %c0_i32 = arith.constant 0 : i32
    %c0_i32_0 = arith.constant 0 : i32
    %c0_i32_1 = arith.constant 0 : i32
    return %arg1, %c0_i32, %c0_i32_0 : i32, i32, i32
  }
  func.func @transform_14(%arg0: i32, %arg1: i32) -> (i32, i32, i32) {
    %c0_i32 = arith.constant 0 : i32
    %c0_i32_0 = arith.constant 0 : i32
    %c0_i32_1 = arith.constant 0 : i32
    return %arg1, %c0_i32, %c0_i32_0 : i32, i32, i32
  }
  func.func @transform_15(%arg0: i32, %arg1: i32) -> (i32, i32, i32) {
    %c0_i32 = arith.constant 0 : i32
    %c0_i32_0 = arith.constant 0 : i32
    %c0_i32_1 = arith.constant 0 : i32
    return %arg1, %c0_i32, %c0_i32_0 : i32, i32, i32
  }
  func.func @transform_16(%arg0: i32, %arg1: i32) -> (i32, i32, i32) {
    %c0_i32 = arith.constant 0 : i32
    %c0_i32_0 = arith.constant 0 : i32
    %c0_i32_1 = arith.constant 0 : i32
    return %arg1, %c0_i32, %c0_i32_0 : i32, i32, i32
  }
  func.func @transform_17(%arg0: i32, %arg1: i32) -> (i32, i32) {
    %c0_i32 = arith.constant 0 : i32
    %c0_i32_0 = arith.constant 0 : i32
    %c0_i32_1 = arith.constant 0 : i32
    return %c0_i32, %c0_i32_0 : i32, i32
  }
  func.func @transform_18(%arg0: i32, %arg1: i32) -> (i32, i32) {
    %c0_i32 = arith.constant 0 : i32
    %c0_i32_0 = arith.constant 0 : i32
    %c0_i32_1 = arith.constant 0 : i32
    return %c0_i32, %c0_i32_0 : i32, i32
  }
  func.func @transform_19(%arg0: i32, %arg1: i32) -> (i32, i32, i32) {
    %c0_i32 = arith.constant 0 : i32
    %c0_i32_0 = arith.constant 0 : i32
    %c0_i32_1 = arith.constant 0 : i32
    return %arg0, %c0_i32, %c0_i32_0 : i32, i32, i32
  }
}

</mosaic_0001>

<bundles_post_ra>
// kernel: tpu_custom_call.1
= control target key start
LH: loop header
LB: loop body
LE: loop exit
PB: predicated region body
PF: predicated region fallthrough
CT: control target
= control target key end

     0   :  { %s6654_s0 = inlined_call_operand.vmem [shape: f32[2,64,48], index: 0, kind: input, shape index: {}]   ;;  %s6655_s1 = inlined_call_operand.vmem [shape: f32[2,64,64], index: 1, kind: input, shape index: {}]   ;;  %s6656_s2 = inlined_call_operand.hbm [shape: f32[2,1,64], index: 2, kind: input, shape index: {}]   ;;  %s6657_s3 = inlined_call_operand.hbm [shape: bf16[48,64], index: 3, kind: input, shape index: {}]   ;;  %s6658_s4 = inlined_call_operand.vmem [shape: f32[1,64], index: 4, kind: input, shape index: {}]   ;;  %s6659_s5 = inlined_call_operand.hbm [shape: f32[2,1,64], index: 5, kind: input, shape index: {}]   ;;  %s6660_s6 = inlined_call_operand.hbm [shape: f32[2,1,64], index: 6, kind: input, shape index: {}]   ;;  %s6661_s7 = inlined_call_operand.vmem [shape: bf16[2,64,192], index: 7, kind: input, shape index: {}]   ;;  %s6662_s8 = inlined_call_operand.vmem [shape: f32[2,1,192], index: 8, kind: input, shape index: {}]   ;;  %s6663_s9 = inlined_call_operand.vmem [shape: bf16[2,64,64], index: 9, kind: input, shape index: {}]   ;;  %s6664_s10 = inlined_call_operand.hbm [shape: f32[2,1,64], index: 10, kind: input, shape index: {}]   ;;  %s6665_s11 = inlined_call_operand.hbm [shape: f32[2,1,64], index: 11, kind: input, shape index: {}]   ;;  %s6666_s12 = inlined_call_operand.vmem [shape: f32[2,1,64], index: 12, kind: input, shape index: {}]   ;;  %s6667_s13 = inlined_call_operand.vmem [shape: bf16[2,64,128], index: 13, kind: input, shape index: {}]   ;;  %s6668_s14 = inlined_call_operand.vmem [shape: f32[2,1,128], index: 14, kind: input, shape index: {}]   ;;  %s6669_s15 = inlined_call_operand.vmem [shape: bf16[2,128,64], index: 15, kind: input, shape index: {}]   ;;  %s6670_s16 = inlined_call_operand.vmem [shape: f32[2,1,64], index: 16, kind: input, shape index: {}]   ;;  %s6671_s17 = inlined_call_operand.vmem [shape: f32[1,64], index: 17, kind: input, shape index: {}]   ;;  %s6672_s18 = inlined_call_operand.vmem [shape: f32[1,64], index: 18, kind: input, shape index: {}]   ;;  %s6673_s19 = inlined_call_operand.hbm [shape: f32[2,64,64], index: 19, kind: output, shape index: {}]  }
   0x1   :  { %6705 = sst [smem:[#allocation32_spill]] %s6654_s0 }
   0x2   :  { %6706 = sst [smem:[#allocation33_spill]] %s6655_s1 }
   0x3   :  { %6707 = sst [smem:[#allocation34_spill]] %s6656_s2 }
   0x4   :  { %6708 = sst [smem:[#allocation35_spill]] %s6657_s3 }
   0x5   :  { %6709 = sst [smem:[#allocation36_spill]] %s6658_s4 }
   0x6   :  { %6710 = sst [smem:[#allocation37_spill]] %s6659_s5 }
   0x7   :  { %6711 = sst [smem:[#allocation38_spill]] %s6660_s6 }
   0x8   :  { %6712 = sst [smem:[#allocation39_spill]] %s6661_s7 }
   0x9   :  { %6713 = sst [smem:[#allocation40_spill]] %s6662_s8 }
   0xa   :  { %6714 = sst [smem:[#allocation41_spill]] %s6663_s9 }
   0xb   :  { %6715 = sst [smem:[#allocation42_spill]] %s6664_s10 }
   0xc   :  { %6716 = sst [smem:[#allocation43_spill]] %s6665_s11 }
   0xd   :  { %6717 = sst [smem:[#allocation44_spill]] %s6666_s12 }
   0xe   :  { %6718 = sst [smem:[#allocation45_spill]] %s6667_s13 }
   0xf   :  { %6719 = sst [smem:[#allocation46_spill]] %s6668_s14 }
  0x10   :  { %6720 = sst [smem:[#allocation47_spill]] %s6669_s15 }
  0x11   :  { %6721 = sst [smem:[#allocation48_spill]] %s6670_s16 }
  0x12   :  { %6722 = sst [smem:[#allocation49_spill]] %s6671_s17 }
  0x13   :  { %6723 = sst [smem:[#allocation50_spill]] %s6672_s18 }
  0x14   :  { %6724 = sst [smem:[#allocation51_spill]] %s6673_s19 }
  0x15   :  { %24 = vsyncpa [#allocation3], 0 }
  0x16   :  { %26 = vsyncpa [#allocation3 + $0x1], 0 }
  0x17   :  { %27 = vsyncpa [#allocation6], 0 }
  0x18   :  { %28 = vsyncpa [#allocation4], 0 }
  0x19   :  { %30 = vsyncpa [#allocation4 + $0x1], 0  ;;  %s5171_s0 = smov 0   ;;  %s5173_s30 = smov 0  }
  0x1a   :  { %s5175_s20 = smov 0   ;;  %s5177_s21 = smov 0  }
  0x1b   :  { %s5179_s1 = smov 0   ;;  %s5181_s22 = smov 0  }
  0x1c   :  { %s5183_s2 = smov 0   ;;  %s5185_s23 = smov 0  }
  0x1d   :  { %s5187_s24 = smov 0   ;;  %s5189_s25 = smov 0  }
  0x1e   :  { %s5191_s3 = smov 0  }
  0x1f LB: > { %6725 = sst [smem:[#allocation16_spill]] %s5014_s30  ;;  %s5227_s26 = sadd.s32 4294967295, %s5050_s3   ;;  %s5050_s3 = sphi %s5191_s3, %s36_s3   ;;  %s5046_s25 = sphi %s5189_s25, %s6806_s25   ;;  %s5042_s24 = sphi %s5187_s24, %s6805_s24   ;;  %s5038_s23 = sphi %s5185_s23, %s6804_s23   ;;  %s5034_s2 = sphi %s5183_s2, %s6803_s2   ;;  %s5030_s22 = sphi %s5181_s22, %s6802_s22   ;;  %s5026_s1 = sphi %s5179_s1, %s6801_s1   ;;  %s5022_s21 = sphi %s5177_s21, %s6800_s21   ;;  %s5018_s20 = sphi %s5175_s20, %s6799_s20   ;;  %s5014_s30 = sphi %s5173_s30, %s6798_s30   ;;  %s5010_s0 = sphi %s5171_s0, %s6797_s0  }
  0x20   : > { %6726 = sst [smem:[#allocation17_spill]] %s5018_s20  ;;  %s3849_s27 = sadd.s32 4294967294, %s5050_s3  }
  0x21   : > { %6727 = sst [smem:[#allocation18_spill]] %s5022_s21  ;;  %s45_s28 = sadd.s32 1, %s5042_s24 }
  0x22   : > { %6728 = sst [smem:[#allocation19_spill]] %s5026_s1  ;;  %s48_s29 = sadd.s32 1, %s5046_s25 }
  0x23   : > { %6729 = sst [smem:[#allocation20_spill]] %s5030_s22  ;;  %p46_p0 = scmp.ge.s32.totalorder %s45_s28, 2 }
  0x24   : > { %6730 = sst [smem:[#allocation21_spill]] %s5038_s23  ;;  %s107_s19 = sadd.s32 1, %s5030_s22 }
  0x25   : > { %6731 = sst [smem:[#allocation22_spill]] %s5042_s24  ;;  %p114_p1 = scmp.ne.s32.totalorder %s5030_s22, %s5026_s1 }
  0x26   : > { %6732 = sst [smem:[#allocation23_spill]] %s5046_s25  ;;  %p115_p2 = scmp.eq.s32.totalorder %s5050_s3, 0 }
  0x27   : > { %6733 = sst [smem:[#allocation24_spill]] %s5050_s3  ;;  %s6808_s28 = smov (%p46_p0, %s45_s28), 0 }
  0x28   : > { %6734 = sst [smem:[#allocation25_spill]] %s6808_s28  ;;  %s6810_s29 = smov (!%p46_p0, %s48_s29), %s5046_s25 }
  0x29   : > { %p5244_p3 = por %p115_p2, %p114_p1  ;;  %p6682_p4 = scmp.ne.s32.totalorder %s5026_s1, %s5022_s21 }
  0x2a   : > { %p50_p5 = scmp.ge.s32.totalorder %s6810_s29, 2  ;;  %s172_s17 = ssub.s32 %s5042_s24, %s6808_s28 }
  0x2b   : > { %p173_p6 = scmp.eq.s32.totalorder %s172_s17, 0  ;;  %s175_s4 = sadd.s32 1, %s5018_s20 }
  0x2c   : > { %s6812_s29 = smov (%p50_p5, %s6810_s29), 0  ;;  %p182_p7 = scmp.ne.s32.totalorder %s5018_s20, %s5014_s30 }
  0x2d   : > { %6736 = sst [smem:[#allocation26_spill]] %s6812_s29  ;;  %s104_s15 = ssub.s32 %s5046_s25, %s6812_s29 }
  0x2e   : > { %s5256_s16 = scalar_select %p173_p6, %s5018_s20, %s175_s4  }
  0x2f   : > { %p105_p8 = scmp.eq.s32.totalorder %s104_s15, 0  ;;  %p5266_p10 = por %p182_p7, %p115_p2 }
  0x30   : > { %6737 = sst [smem:[#allocation27_spill]] %s5256_s16  ;;  %p540_p11 = scmp.eq.s32.totalorder %s5227_s26, 3 }
  0x31   : > { %s5272_s17 = scalar_select %p105_p8, %s5030_s22, %s107_s19  }
  0x32   : > { %p5277_p12 = por %p540_p11, %p114_p1  ;;  %p546_p13 = scmp.eq.s32.totalorder %s3849_s27, 3 }
  0x33   : > { %6739 = sst [smem:[#allocation28_spill]] %s5272_s17  ;;  %p4407_p2 = scmp.lt.s32.totalorder %s5050_s3, 4 }
  0x34   : > { %s6740_s4 = scalar_select %p5277_p12, 1, 0 }
  0x35   : > { %p5284_p0 = por %p546_p13, %p6682_p4  ;;  %s604_s29 = sand.u32 1, %s5050_s3  }
  0x36   : > { %6741 = sst [smem:[#allocation29_spill]] %s6740_s4  ;;  %s606_s28 = sand.u32 1, %s5030_s22  }
  0x37   : > { %s6742_s15 = scalar_select %p5284_p0, 1, 0 }
  0x38   : > { %s3853_s16 = sshll.u32 %s5046_s25, 4  ;;  %s607_s13 = scalar_lea.vmem [#allocation2], %s606_s28 }
  0x39   : > { %6743 = sst [smem:[#allocation30_spill]] %s6742_s15  ;;  %s614_s9 = sshll.u32 %s607_s13, 4  ;;  %s5297_s9 = int_to_ptr.vmem [resolvable:$true] %s614_s9 }
  0x3a   : > { %s6744_s17 = sld [smem:[#allocation34_spill]]  ;;  %p5301_p1 = pnand %p4407_p2, %p5244_p3 }
  0x3b   : > { %p5307_p5 = pnand %p4407_p2, %p5266_p10  ;;  %s5312_s12 = sand.u32 1, %s5018_s20  }
  0x3c   : > { %s5317_s28 = scalar_lea.sflag [#allocation3], %s604_s29  ;;  %p4744_p3 = pneg %p5301_p1 }
  0x3d   : > { %s6746_s13 = scalar_select %p5307_p5, 1, 0 }
  0x40   : > { %s5295_s8 = scalar_lea.hbm %s6744_s17, %s3853_s16  ;;  %s5315_s16 = sshll.u32 %s5042_s24, 4 }
  0x41   : > { %s4742_s19 = scalar_lea.hbm %s5295_s8, 16  ;;  %s4747_s25 = scalar_lea.hbm %s6744_s17, 32 }
  0x42   : > { %p4743_p6 = scmp.ne.s32.totalorder %s5295_s8, %s4742_s19  ;;  %p4748_p10 = scmp.lt.u32.totalorder %s5295_s8, %s6744_s17 }
  0x43   : > { %p4749_p11 = scmp.lt.u32.totalorder %s4747_s25, %s4742_s19  ;;  %p4751_p2 = scmp.lt.u32.totalorder %s4742_s19, %s5295_s8 }
  0x44   : > { %p4745_p7 = pnand %p4744_p3, %p4743_p6 }
  0x45   : > { %p4750_p13 = por %p4749_p11, %p4748_p10 }
  0x46   : > { %p4746_p8 = pneg %p4745_p7 }
  0x47   : > { %p4752_p9 = por %p4751_p2, %p4750_p13 }
  0x49   : > { %p4753_p4 = pnand %p4752_p9, %p4746_p8 }
  0x4b   : > { %4756 = shalt.err (!%p4753_p4)
}
  0x4c   : > { %s4757_s29 = scalar_lea.vmem %s5297_s9, 16  ;;  %s5052_s14 = smov [#allocation2]  }
  0x4d   : > { %p4758_p6 = scmp.ne.s32.totalorder %s5297_s9, %s4757_s29  ;;  %s4762_s18 = sshll.u32 %s5052_s14, 4  ;;  %s4763_s18 = int_to_ptr.vmem [resolvable:$false] %s4762_s18 }
  0x4e   : > { %s4764_s22 = scalar_lea.vmem %s4763_s18, 32  ;;  %p4765_p12 = scmp.lt.s32.totalorder %s5297_s9, %s4763_s18 }
  0x4f   : > { %p4760_p7 = pnand %p4758_p6, %p4744_p3  ;;  %p4766_p10 = scmp.lt.s32.totalorder %s4764_s22, %s4757_s29 }
  0x51   : > { %p4761_p0 = pneg %p4760_p7  ;;  %p4767_p11 = por %p4766_p10, %p4765_p12 }
  0x53   : > { %p4768_p13 = pnand %p4767_p11, %p4761_p0 }
  0x55   : > { %4771 = shalt.err (!%p4768_p13)
}
  0x56   : > { %4389 = dma.hbm_to_vmem [thread:$0]  (!%p5301_p1), %s5295_s8, 16, %s5297_s9, %s5317_s28  }
  0x57   : > { %s6747_s5 = sld [smem:[#allocation37_spill]]  ;;  %s624_s29 = scalar_lea.vmem [#allocation7], %s5312_s12 }
  0x58   : > { %s631_s14 = sshll.u32 %s624_s29, 4  ;;  %s6748_s6 = sld [smem:[#allocation38_spill]]  ;;  %s5352_s14 = int_to_ptr.vmem [resolvable:$true] %s631_s14 }
  0x59   : > { %p5364_p9 = pneg %p5307_p5 }
  0x5b   : > { %s6749_s8 = scalar_select %p5364_p9, 1, 0 }
  0x5d   : > { %s5349_s19 = scalar_lea.hbm %s6747_s5, %s5315_s16  ;;  %s4777_s15 = scalar_lea.hbm %s6747_s5, 32 }
  0x5e   : > { %s5358_s22 = scalar_lea.hbm %s6748_s6, %s5315_s16  ;;  %s4772_s17 = scalar_lea.hbm %s5349_s19, 16 }
  0x5f   : > { %p4773_p4 = scmp.ne.s32.totalorder %s5349_s19, %s4772_s17  ;;  %p4778_p1 = scmp.lt.u32.totalorder %s5349_s19, %s6747_s5 }
  0x60   : > { %p4779_p3 = scmp.lt.u32.totalorder %s4777_s15, %s4772_s17  ;;  %p4781_p2 = scmp.lt.u32.totalorder %s4772_s17, %s5349_s19 }
  0x61   : > { %p4775_p12 = pnand %p5364_p9, %p4773_p4 }
  0x62   : > { %p4780_p8 = por %p4779_p3, %p4778_p1 }
  0x63   : > { %p4776_p0 = pneg %p4775_p12 }
  0x64   : > { %p4782_p6 = por %p4781_p2, %p4780_p8 }
  0x66   : > { %p4783_p7 = pnand %p4782_p6, %p4776_p0 }
  0x68   : > { %4786 = shalt.err (!%p4783_p7)
}
  0x69   : > { %s4787_s27 = scalar_lea.vmem %s5352_s14, 16  ;;  %s5053_s18 = smov [#allocation7]  }
  0x6a   : > { %p4788_p10 = scmp.ne.s32.totalorder %s5352_s14, %s4787_s27  ;;  %s4792_s9 = sshll.u32 %s5053_s18, 4  ;;  %s4793_s9 = int_to_ptr.vmem [resolvable:$false] %s4792_s9 }
  0x6b   : > { %s4794_s24 = scalar_lea.vmem %s4793_s9, 32  ;;  %p4795_p4 = scmp.lt.s32.totalorder %s5352_s14, %s4793_s9 }
  0x6c   : > { %p4790_p11 = pnand %p4788_p10, %p5364_p9  ;;  %p4796_p12 = scmp.lt.s32.totalorder %s4794_s24, %s4787_s27 }
  0x6e   : > { %p4791_p13 = pneg %p4790_p11  ;;  %p4797_p1 = por %p4796_p12, %p4795_p4 }
  0x70   : > { %p4798_p3 = pnand %p4797_p1, %p4791_p13 }
  0x72   : > { %4801 = shalt.err (!%p4798_p3)
}
  0x73   : > { %4392 = dma.hbm_to_vmem [thread:$0]  (!%p5307_p5), %s5349_s19, 16, %s5352_s14, %s5317_s28  }
  0x74   : > { %s641_s17 = scalar_lea.vmem [#allocation8], %s5312_s12  ;;  %s6750_s10 = sld [smem:[#allocation42_spill]] }
  0x75   : > { %s648_s25 = sshll.u32 %s641_s17, 4  ;;  %s4802_s18 = scalar_lea.hbm %s5358_s22, 16  ;;  %s649_s25 = int_to_ptr.vmem [resolvable:$true] %s648_s25 }
  0x76   : > { %p4803_p0 = scmp.ne.s32.totalorder %s5358_s22, %s4802_s18  ;;  %s4807_s5 = scalar_lea.hbm %s6748_s6, 32 }
  0x77   : > { %p4808_p6 = scmp.lt.u32.totalorder %s5358_s22, %s6748_s6  ;;  %p4809_p7 = scmp.lt.u32.totalorder %s4807_s5, %s4802_s18 }
  0x78   : > { %p4805_p8 = pnand %p4803_p0, %p5364_p9  ;;  %p4811_p11 = scmp.lt.u32.totalorder %s4802_s18, %s5358_s22 }
  0x79   : > { %p4810_p10 = por %p4809_p7, %p4808_p6 }
  0x7a   : > { %s5393_s27 = scalar_lea.hbm %s6750_s10, %s5315_s16  ;;  %p4806_p2 = pneg %p4805_p8 }
  0x7b   : > { %p4812_p13 = por %p4811_p11, %p4810_p10 }
  0x7d   : > { %p4813_p4 = pnand %p4812_p13, %p4806_p2 }
  0x7f   : > { %4816 = shalt.err (!%p4813_p4)
}
  0x80   : > { %s4817_s19 = scalar_lea.vmem %s649_s25, 16  ;;  %s5054_s14 = smov [#allocation8]  }
  0x81   : > { %p4818_p12 = scmp.ne.s32.totalorder %s649_s25, %s4817_s19  ;;  %s4822_s17 = sshll.u32 %s5054_s14, 4  ;;  %s4823_s17 = int_to_ptr.vmem [resolvable:$false] %s4822_s17 }
  0x82   : > { %s4824_s15 = scalar_lea.vmem %s4823_s17, 32  ;;  %p4825_p0 = scmp.lt.s32.totalorder %s649_s25, %s4823_s17 }
  0x83   : > { %p4820_p1 = pnand %p4818_p12, %p5364_p9  ;;  %p4826_p8 = scmp.lt.s32.totalorder %s4824_s15, %s4817_s19 }
  0x85   : > { %p4821_p3 = pneg %p4820_p1  ;;  %p4827_p5 = por %p4826_p8, %p4825_p0 }
  0x87   : > { %p4828_p6 = pnand %p4827_p5, %p4821_p3 }
  0x89   : > { %4831 = shalt.err (!%p4828_p6)
}
  0x8a   : > { %p6751_p7 = scmp.ne.s32.totalorder %s6746_s13, 0  ;;  %s681_s5 = scalar_lea.vmem [#allocation9], %s5312_s12 }
  0x8b   : > { %s688_s20 = sshll.u32 %s681_s5, 4  ;;  %s4832_s4 = scalar_lea.hbm %s5393_s27, 16  ;;  %s689_s20 = int_to_ptr.vmem [resolvable:$true] %s688_s20 }
  0x8c   : > { %4395 = dma.hbm_to_vmem [thread:$0]  (!%p6751_p7), %s5358_s22, 16, %s649_s25, %s5317_s28  }
  0x8d   : > { %p4833_p2 = scmp.ne.s32.totalorder %s5393_s27, %s4832_s4  ;;  %s4837_s9 = scalar_lea.hbm %s6750_s10, 32 }
  0x8e   : > { %p4838_p11 = scmp.lt.u32.totalorder %s5393_s27, %s6750_s10  ;;  %p4839_p13 = scmp.lt.u32.totalorder %s4837_s9, %s4832_s4 }
  0x8f   : > { %p4835_p10 = pnand %p4833_p2, %p5364_p9  ;;  %p4841_p12 = scmp.lt.u32.totalorder %s4832_s4, %s5393_s27 }
  0x90   : > { %p4840_p4 = por %p4839_p13, %p4838_p11 }
  0x91   : > { %p4836_p5 = pneg %p4835_p10 }
  0x92   : > { %p4842_p1 = por %p4841_p12, %p4840_p4 }
  0x94   : > { %p4843_p3 = pnand %p4842_p1, %p4836_p5 }
  0x96   : > { %4846 = shalt.err (!%p4843_p3)
}
  0x97   : > { %s4847_s22 = scalar_lea.vmem %s689_s20, 16  ;;  %s5055_s25 = smov [#allocation9]  }
  0x98   : > { %p4848_p0 = scmp.ne.s32.totalorder %s689_s20, %s4847_s22  ;;  %s4852_s14 = sshll.u32 %s5055_s25, 4  ;;  %s4853_s14 = int_to_ptr.vmem [resolvable:$false] %s4852_s14 }
  0x99   : > { %s4854_s17 = scalar_lea.vmem %s4853_s14, 32  ;;  %p4855_p2 = scmp.lt.s32.totalorder %s689_s20, %s4853_s14 }
  0x9a   : > { %p4850_p8 = pnand %p4848_p0, %p5364_p9  ;;  %p4856_p10 = scmp.lt.s32.totalorder %s4854_s17, %s4847_s22 }
  0x9c   : > { %p4851_p6 = pneg %p4850_p8  ;;  %p4857_p7 = por %p4856_p10, %p4855_p2 }
  0x9e   : > { %p4858_p11 = pnand %p4857_p7, %p4851_p6 }
  0xa0   : > { %4861 = shalt.err (!%p4858_p11)
}
  0xa1   : > { %p6752_p13 = scmp.ne.s32.totalorder %s6746_s13, 0  ;;  %p6691_p5 = scmp.eq.s32.totalorder %s5227_s26, 0 }
  0xa2   : > { %p3850_p7 = scmp.ge.s32.totalorder %s5050_s3, 1  ;;  %p553_p4 = scmp.lt.s32.totalorder %s5050_s3, 5 }
  0xa3   : > { %4398 = dma.hbm_to_vmem [thread:$0]  (!%p6752_p13), %s5393_s27, 16, %s689_s20, %s5317_s28  }
  0xa4   : > { %p6753_p12 = scmp.ne.s32.totalorder %s5026_s1, %s5022_s21  ;;  %p6755_p3 = scmp.ne.s32.totalorder %s5014_s30, %s5010_s0 }
  0xa5   : > { %p5453_p8 = pnand %p3850_p7, %p553_p4  ;;  %s5056_s27 = smov [#allocation5]  }
  0xa6   : > { %p5440_p1 = por %p6691_p5, %p6753_p12  ;;  %p5449_p0 = por %p6755_p3, %p6691_p5 }
  0xa7   : > { %s6757_s4 = scalar_select %p5453_p8, 1, 0 }
  0xa8   : > { %s6754_s15 = scalar_select %p5440_p1, 1, 0 }
  0xa9   : > { %s6756_s5 = scalar_select %p5449_p0, 1, 0 }
  0xaa   : > { %s565_s20 = sshll.u32 %s5056_s27, 4  ;;  %p4382_p6 = pneg %p5453_p8  ;;  %s5457_s20 = int_to_ptr.vmem [resolvable:$true] %s565_s20 }
  0xab   : > { %s698_s0 = scalar_lea.vmem [#allocation10], %s5312_s12  ;;  %s6759_s11 = sld [smem:[#allocation43_spill]] }
  0xac   : > { %p5463_p2 = pnand %p4382_p6, %p6691_p5  ;;  %s705_s18 = sshll.u32 %s698_s0, 4  ;;  %s5474_s18 = int_to_ptr.vmem [resolvable:$true] %s705_s18 }
  0xad   : > { %s6760_s14 = sld [smem:[#allocation35_spill]] }
  0xae   : > { %p4864_p11 = pneg %p5463_p2 }
  0xb1   : > { %s5472_s19 = scalar_lea.hbm %s6759_s11, %s5315_s16 }
  0xb3   : > { %s4862_s17 = scalar_lea.hbm %s6760_s14, 384 }
  0xb4   : > { %p4863_p10 = scmp.ne.s32.totalorder %s6760_s14, %s4862_s17  ;;  %p4869_p12 = scmp.lt.u32.totalorder %s4862_s17, %s6760_s14 }
  0xb6   : > { %p4865_p7 = pnand %p4864_p11, %p4863_p10 }
  0xb8   : > { %p4866_p4 = pneg %p4865_p7 }
  0xba   : > { %p4871_p3 = pnand %p4869_p12, %p4866_p4 }
  0xbc   : > { %4874 = shalt.err (!%p4871_p3)
}
  0xbd   : > { %s4875_s16 = scalar_lea.vmem %s5457_s20, 384  ;;  %p4883_p1 = scmp.lt.s32.totalorder %s5457_s20, %s5457_s20 }
  0xbe   : > { %p4876_p6 = scmp.ne.s32.totalorder %s5457_s20, %s4875_s16  ;;  %p4884_p8 = scmp.lt.s32.totalorder %s4875_s16, %s4875_s16 }
  0xc0   : > { %p4878_p5 = pnand %p4876_p6, %p4864_p11  ;;  %p4885_p13 = por %p4884_p8, %p4883_p1 }
  0xc2   : > { %p4879_p0 = pneg %p4878_p5 }
  0xc4   : > { %p4886_p9 = pnand %p4885_p13, %p4879_p0 }
  0xc6   : > { %4889 = shalt.err (!%p4886_p9)
}
  0xc7   : > { %s5057_s6 = smov 64   ;;  %s5058_s9 = smov 4  }
  0xc8   : > { %4385 = dma.hbm_to_vmem [thread:$0]  (!%p5463_p2), %s6760_s14, 384, %s5457_s20, [#allocation6], %s5057_s6, %s5057_s6, %s5058_s9  }
  0xc9   : > { %s4890_s25 = scalar_lea.hbm %s5472_s19, 16  ;;  %p6761_p10 = scmp.ne.s32.totalorder %s6749_s8, 0 }
  0xca   : > { %p4891_p5 = scmp.ne.s32.totalorder %s5472_s19, %s4890_s25  ;;  %s4895_s12 = scalar_lea.hbm %s6759_s11, 32 }
  0xcb   : > { %p4896_p9 = scmp.lt.u32.totalorder %s5472_s19, %s6759_s11  ;;  %p4897_p0 = scmp.lt.u32.totalorder %s4895_s12, %s4890_s25 }
  0xcc   : > { %p4893_p1 = pnand %p4891_p5, %p6761_p10  ;;  %p4899_p11 = scmp.lt.u32.totalorder %s4890_s25, %s5472_s19 }
  0xcd   : > { %p4898_p8 = por %p4897_p0, %p4896_p9 }
  0xce   : > { %p4894_p13 = pneg %p4893_p1 }
  0xcf   : > { %p4900_p7 = por %p4899_p11, %p4898_p8 }
  0xd1   : > { %p4901_p4 = pnand %p4900_p7, %p4894_p13 }
  0xd3   : > { %4904 = shalt.err (!%p4901_p4)
}
  0xd4   : > { %s4905_s20 = scalar_lea.vmem %s5474_s18, 16  ;;  %s5059_s29 = smov [#allocation10]  }
  0xd5   : > { %p4906_p2 = scmp.ne.s32.totalorder %s5474_s18, %s4905_s20  ;;  %s4910_s6 = sshll.u32 %s5059_s29, 4  ;;  %s4911_s6 = int_to_ptr.vmem [resolvable:$false] %s4910_s6 }
  0xd6   : > { %s4912_s9 = scalar_lea.vmem %s4911_s6, 32  ;;  %p4913_p6 = scmp.lt.s32.totalorder %s5474_s18, %s4911_s6 }
  0xd7   : > { %p4908_p12 = pnand %p4906_p2, %p6761_p10  ;;  %p4914_p5 = scmp.lt.s32.totalorder %s4912_s9, %s4905_s20 }
  0xd9   : > { %p4909_p3 = pneg %p4908_p12  ;;  %p4915_p1 = por %p4914_p5, %p4913_p6 }
  0xdb   : > { %p4916_p9 = pnand %p4915_p1, %p4909_p3 }
  0xdd   : > { %4919 = shalt.err (!%p4916_p9)
}
  0xde   : > { %p6762_p13 = scmp.ne.s32.totalorder %s6746_s13, 0  ;;  %p6763_p0 = scmp.ne.s32.totalorder %s6757_s4, 0 }
  0xe0   : > { %4401 = dma.hbm_to_vmem [thread:$0]  (!%p6762_p13), %s5472_s19, 16, %s5474_s18, %s5317_s28  }
  0xe1   : > { %748 = sbr.rel (%p6763_p0) target bundleno = 4012 (0xfac), region = 96 }
  0xe8   : > { %s750_s8 = sand.u32 1, %s5227_s26   ;;  %s5523_s24 = sand.u32 1, %s5026_s1  }
  0xe9   : > { %s751_s22 = scalar_lea.sflag [#allocation3], %s750_s8  ;;  %p6764_p10 = scmp.ne.s32.totalorder %s6754_s15, 0 }
  0xeb   : > { %4993 = dma.done.wait (%p6764_p10), %s751_s22, 16  }
  0xec   : > { %4995 = vsyncadd (%p6764_p10), %s751_s22, 4294967280  ;;  %p6765_p8 = scmp.eq.s32.totalorder %s5227_s26, 0 }
  0xee   : > { %4997 = dma.done.wait (%p6765_p8), [#allocation6], 384   ;;  %p6766_p11 = pmov %p6765_p8 }
  0xef   : > { %s5535_s13 = sand.u32 1, %s5014_s30   ;;  %p6767_p7 = scmp.ne.s32.totalorder %s6756_s5, 0 }
  0xf0   : > { %4999 = vsyncadd (%p6766_p11), [#allocation6], 4294966912 }
  0xf1   : > { %5001 = dma.done.wait (%p6767_p7), %s751_s22, 64  }
  0xf2   : > { %5003 = vsyncadd (%p6767_p7), %s751_s22, 4294967232  ;;  %s3860_s15 = sshll.u32 %s5523_s24, 6  ;;  %p902_p4 = scmp.lt.s32.totalorder %s5038_s23, 1 }
  0xf3   : > { %p912_p2 = scmp.lt.s32.totalorder %s5034_s2, 1  ;;  %s6768_s17 = sld [smem:[#allocation32_spill]] }
  0xf4   : > { %s903_s26 = scalar_select %p902_p4, %s5038_s23, 1 }
  0xf5   : > { %s5547_s4 = scalar_select %p912_p2, %s5034_s2, 1 }
  0xf6   : > { %s3980_s5 = sshll.u32 %s903_s26, 6  ;;  %s6769_s16 = sld [smem:[#allocation33_spill]] }
  0xf7   : > { %s3982_s29 = sshll.u32 %s5547_s4, 6  ;;  %s3867_s6 = sshll.u32 %s5547_s4, 1 }
  0xf8   : > { %s6770_s7 = sld [smem:[#allocation39_spill]]  ;;  %s6771_s28 = sld [smem:[#allocation40_spill]] }
  0xf9   : > { %s5552_s27 = scalar_lea.vmem %s6768_s17, %s3980_s5  ;;  %s3983_s18 = sshll.u32 %s5547_s4, 5 }
  0xfa   : > { %s6773_s0 = sld [smem:[#allocation41_spill]]  ;;  %s6775_s9 = sld [smem:[#allocation45_spill]] }
  0xfb   : > { %s6776_s25 = sld [smem:[#allocation46_spill]]  ;;  %s6777_s3 = sld [smem:[#allocation47_spill]] }
  0xfc   : > { %s5557_s20 = scalar_lea.vmem %s6769_s16, %s3980_s5  ;;  %s6778_s17 = sld [smem:[#allocation48_spill]] }
  0xfd   : > { %s773_s5 = scalar_lea.vmem [#allocation8], %s5535_s13  ;;  %s789_s14 = scalar_lea.vmem [#allocation10], %s5535_s13 }
  0xfe   : > { %s5564_s22 = scalar_lea.vmem %s6770_s7, %s3982_s29  ;;  %s5569_s10 = scalar_lea.vmem %s6771_s28, %s3867_s6 }
  0xff   : > { %p3874_p12 = scmp.ne.s32.totalorder %s5034_s2, 0 }
 0x100   : > { %s5579_s16 = scalar_lea.vmem %s6773_s0, %s3983_s18  ;;  %s5584_s8 = scalar_lea.vmem %s6775_s9, %s3983_s18  ;;  %v4511_v0 = vld [vmem:[#allocation5] sm:$0xff] (!%p3874_p12)   ;;  %v4512_v1 = vld [vmem:[#allocation5 + $0x8] sm:$0xff] (!%p3874_p12)   ;;  %vm993_vm0 = vcmask (!%p3874_p12), 392192   ;;  %v4513_v5 = vld [vmem:[#allocation5 + $0x10] sm:$0xff] (!%p3874_p12)   ;;  %vm1087_vm1 = vcmask (!%p3874_p12), 523264  }
 0x101   : > { %6774 = sst [smem:[#allocation31_spill]] %s5579_s16  ;;  %s936_s28 = scalar_lea.vmem %s6776_s25, %s5547_s4  ;;  %4098 = vmatprep.subr.bf16.mxu0 (!%p3874_p12), %v4511_v0  ;;  %4320 = vmatprep.subr.bf16.mxu1 (!%p3874_p12), %v4511_v0  ;;  %v950_v2 = vld [vmem:[%s5552_s27] sm:$0xff] (!%p3874_p12)  ;;  %v951_v3 = vld [vmem:[%s5552_s27 + $0x8] sm:$0xff] (!%p3874_p12)  ;;  %v952_v9 = vld [vmem:[%s5552_s27 + $0x10] sm:$0xff] (!%p3874_p12) }
 0x102   : > { %s5593_s23 = scalar_lea.vmem %s6777_s3, %s3982_s29  ;;  %s944_s12 = scalar_lea.vmem %s6778_s17, %s5547_s4  ;;  %4099 = vmatpush3.bf16.msra.mxu0 (!%p3874_p12), %v4511_v0  ;;  %4323 = vmatpush3.bf16.msra.mxu1 (!%p3874_p12), %v4511_v0  ;;  %v954_v4 = vld [vmem:[%s5552_s27 + $0x20] sm:$0xff] (!%p3874_p12)  ;;  %v958_v6 = vpack.c.bf16 (!%p3874_p12), %v951_v3, %v950_v2  ;;  %v955_v7 = vld [vmem:[%s5552_s27 + $0x28] sm:$0xff] (!%p3874_p12)  ;;  %v953_v10 = vld [vmem:[%s5552_s27 + $0x18] sm:$0xff] (!%p3874_p12) }
 0x103   : > { %s781_s0 = scalar_lea.vmem [#allocation9], %s5535_s13  ;;  %s5602_s16 = scalar_lea.vmem [#allocation11], %s3860_s15  ;;  %4100 = vmatprep.subr.bf16.mxu0 (!%p3874_p12), %v4512_v1  ;;  %4321 = vmatprep.subr.bf16.mxu1 (!%p3874_p12), %v4512_v1  ;;  %v960_v8 = vpack.c.bf16 (!%p3874_p12), %v955_v7, %v954_v4  ;;  %v956_v11 = vld [vmem:[%s5552_s27 + $0x30] sm:$0xff] (!%p3874_p12)  ;;  %v957_v12 = vld [vmem:[%s5552_s27 + $0x38] sm:$0xff] (!%p3874_p12)  ;;  %v959_v13 = vpack.c.bf16 (!%p3874_p12), %v953_v10, %v952_v9  ;;  %v1071_v23 = vld [vmem:[%s5557_s20] sm:$0xff] (!%p3874_p12) }
 0x104   : > { %949 = sbr.rel (%p3874_p12) target bundleno = 489 (0x1e9), region = 124  ;;  %4104 = vmatprep.mubr.msk.bf16.mxu0 (!%p3874_p12), %vm993_vm0, %v958_v6  ;;  %v961_v14 = vpack.c.bf16 (!%p3874_p12), %v957_v12, %v956_v11  ;;  %s6779_s21 = sld [smem:[#allocation36_spill]] (!%p3874_p12)  ;;  %v1073_v17 = vld [vmem:[%s5557_s20 + $0x10] sm:$0xff] (!%p3874_p12)  ;;  %v1075_v25 = vld [vmem:[%s5557_s20 + $0x20] sm:$0xff] (!%p3874_p12)  ;;  %v1074_v29 = vld [vmem:[%s5557_s20 + $0x18] sm:$0xff] (!%p3874_p12) }
 0x105   : > { %4108 = vmatprep.mubr.msk.bf16.mxu1 (!%p3874_p12), %vm993_vm0, %v960_v8  ;;  %v1077_v19 = vld [vmem:[%s5557_s20 + $0x30] sm:$0xff] (!%p3874_p12)  ;;  %v1078_v31 = vld [vmem:[%s5557_s20 + $0x38] sm:$0xff] (!%p3874_p12)  ;;  %v1072_v37 = vld [vmem:[%s5557_s20 + $0x8] sm:$0xff] (!%p3874_p12) }
 0x106   : > { %4101 = vmatpush3.bf16.msra.mxu0 (!%p3874_p12), %v4512_v1  ;;  %4324 = vmatpush3.bf16.msra.mxu1 (!%p3874_p12), %v4512_v1  ;;  %v1076_v39 = vld [vmem:[%s5557_s20 + $0x28] sm:$0xff] (!%p3874_p12) }
 0x107   : > { %4102 = vmatprep.subr.bf16.mxu0 (!%p3874_p12), %v4513_v5  ;;  %4322 = vmatprep.subr.bf16.mxu1 (!%p3874_p12), %v4513_v5 }
 0x10a   : > { %4103 = vmatpush3.bf16.msra.mxu0 (!%p3874_p12), %v4513_v5  ;;  %4325 = vmatpush3.bf16.msra.mxu1 (!%p3874_p12), %v4513_v5  ;;  %v3875_v15 = vld [vmem:[%s6779_s21] ss:$0 sm:$0xff] (!%p3874_p12) }
 0x10d   : > { %4105 = vmatmul.mubr.msk.bf16.vlgmr.msra.gmra.mrb[0].mxu0 %vm993_vm0, %v959_v13  ;;  %4109 = vmatmul.mubr.msk.bf16.vlgmr.msra.gmra.mrb[0].mxu1 %vm993_vm0, %v961_v14 }
 0x1e0   : > { %v4106_v16 = vpop.f32.mrb[0].mxu0  ;;  %v4110_v18 = vpop.f32.mrb[0].mxu1 }
 0x1e1   : > { %v1049_v20 = vadd.f32 %v4106_v16, %v3875_v15  ;;  %v1065_v21 = vadd.f32 %v4110_v18, %v3875_v15  ;;  %v1040_v22 = vpop.f32.mrb[1].mxu0  ;;  %v1056_v24 = vpop.f32.mrb[1].mxu1 }
 0x1e2   : > { %v1041_v26 = vadd.f32 %v3875_v15, %v1040_v22  ;;  %v1057_v27 = vadd.f32 %v3875_v15, %v1056_v24  ;;  %v4107_v28 = vpop.f32.mrb[2].mxu0  ;;  %v4111_v30 = vpop.f32.mrb[2].mxu1 }
 0x1e3   : > { %v1081_v32 = vadd.f32 %v1073_v17, %v1049_v20  ;;  %v1085_v33 = vadd.f32 %v1077_v19, %v1065_v21  ;;  %v1052_v34 = vadd.f32 %v4107_v28, %v3875_v15  ;;  %v1068_v35 = vadd.f32 %v4111_v30, %v3875_v15  ;;  %v1043_v36 = vpop.f32.mrb[3].mxu0  ;;  %v1059_v38 = vpop.f32.mrb[3].mxu1 }
 0x1e4   : > { %v1079_v40 = vadd.f32 %v1071_v23, %v1041_v26  ;;  %v1083_v41 = vadd.f32 %v1075_v25, %v1057_v27  ;;  %v1044_v42 = vadd.f32 %v3875_v15, %v1043_v36  ;;  %v1060_v43 = vadd.f32 %v3875_v15, %v1059_v38 }
 0x1e5   : > { %1090 = vst.msk [vmem:[%s5602_s16 + $0x10] sm:$0xff] %vm1087_vm1, %v1081_v32  ;;  %1094 = vst.msk [vmem:[%s5602_s16 + $0x30] sm:$0xff] %vm1087_vm1, %v1085_v33  ;;  %v1082_v44 = vadd.f32 %v1074_v29, %v1052_v34  ;;  %v1086_v45 = vadd.f32 %v1078_v31, %v1068_v35 }
 0x1e6   : > { %1088 = vst.msk [vmem:[%s5602_s16] sm:$0xff] %vm1087_vm1, %v1079_v40  ;;  %1092 = vst.msk [vmem:[%s5602_s16 + $0x20] sm:$0xff] %vm1087_vm1, %v1083_v41  ;;  %v1080_v46 = vadd.f32 %v1072_v37, %v1044_v42  ;;  %v1084_v47 = vadd.f32 %v1076_v39, %v1060_v43 }
 0x1e7   : > { %1091 = vst.msk [vmem:[%s5602_s16 + $0x18] sm:$0xff] %vm1087_vm1, %v1082_v44  ;;  %1095 = vst.msk [vmem:[%s5602_s16 + $0x38] sm:$0xff] %vm1087_vm1, %v1086_v45 }
 0x1e8   : > { %1089 = vst.msk [vmem:[%s5602_s16 + $0x8] sm:$0xff] %vm1087_vm1, %v1080_v46  ;;  %1093 = vst.msk [vmem:[%s5602_s16 + $0x28] sm:$0xff] %vm1087_vm1, %v1084_v47 }
 0x1e9 PF: > { %vm1113_vm2 = vcmask 523264   ;;  %v4514_v40 = vld [vmem:[%s5564_s22 + $0x4] ss:$8 sps:$4 sm:$0xff]   ;;  %v4516_v41 = vld [vmem:[%s5564_s22] ss:$8 sps:$4 sm:$0xff]   ;;  %s6780_s1 = scalar_lea.vmem [#allocation7], %s5535_s13 }
 0x1ea   : > { %1323 = vmatprep.subr.bf16.mxu0 %v4514_v40  ;;  %v4517_v42 = vld [vmem:[%s5564_s22 + $0x14] ss:$8 sps:$4 sm:$0xff]   ;;  %v4519_v43 = vld [vmem:[%s5564_s22 + $0x10] ss:$8 sps:$4 sm:$0xff]   ;;  %v4520_v44 = vld [vmem:[%s5564_s22 + $0x24] ss:$8 sps:$4 sm:$0xff]  }
 0x1eb   : > { %1324 = vmatpush1.bf16.msra.mxu0 %v4516_v41  ;;  %v4522_v45 = vld [vmem:[%s5564_s22 + $0x20] ss:$8 sps:$4 sm:$0xff]   ;;  %v4523_v46 = vld [vmem:[%s5564_s22 + $0x34] ss:$8 sps:$4 sm:$0xff]   ;;  %v4525_v47 = vld [vmem:[%s5564_s22 + $0x30] ss:$8 sps:$4 sm:$0xff]  }
 0x1ec   : > { %v1098_v49 = vld [vmem:[%s5602_s16 + $0x10] sm:$0xff]  ;;  %1325 = vmatprep.subr.bf16.mxu0 %v4517_v42  ;;  %vm1420_vm3 = vcmask 130048   ;;  %s5061_s3 = smov 64   ;;  %s5063_s15 = smov 112  }
 0x1ed   : > { %v1096_v48 = vld [vmem:[%s5602_s16] sm:$0xff]  ;;  %v1120_v52 = vsel %vm1113_vm2, %v1098_v49, 0.0  ;;  %v1102_v56 = vld [vmem:[%s5602_s16 + $0x30] sm:$0xff]  ;;  %s5064_s27 = smov 32   ;;  %s5065_s20 = smov 96  }
 0x1ee   : > { %v1114_v51 = vsel %vm1113_vm2, %v1096_v48, 0.0  ;;  %v1099_v53 = vld [vmem:[%s5602_s16 + $0x18] sm:$0xff]  ;;  %v1100_v54 = vld [vmem:[%s5602_s16 + $0x20] sm:$0xff]  ;;  %1121 = vadd.xlane.f32.xlu1 %v1120_v52  ;;  %v1132_v62 = vsel %vm1113_vm2, %v1102_v56, 0.0  ;;  %s6781_s29 = scalar_lea.vmem [#allocation2], %s5523_s24  ;;  %s5066_s22 = smov 16  }
 0x1ef   : > { %v1097_v50 = vld [vmem:[%s5602_s16 + $0x8] sm:$0xff]  ;;  %1115 = vadd.xlane.f32.xlu0 %v1114_v51  ;;  %v1103_v57 = vld [vmem:[%s5602_s16 + $0x38] sm:$0xff]  ;;  %v1123_v59 = vsel %vm1113_vm2, %v1099_v53, 0.0  ;;  %v1126_v60 = vsel %vm1113_vm2, %v1100_v54, 0.0  ;;  %1326 = vmatpush1.bf16.msra.mxu0 %v4519_v43  ;;  %s5067_s18 = smov 80   ;;  %s6782_s9 = sld [smem:[#allocation31_spill]] }
 0x1f0   : > { %v1101_v55 = vld [vmem:[%s5602_s16 + $0x28] sm:$0xff]  ;;  %v1117_v58 = vsel %vm1113_vm2, %v1097_v50, 0.0  ;;  %v1135_v63 = vsel %vm1113_vm2, %v1103_v57, 0.0  ;;  %1327 = vmatprep.subr.bf16.mxu0 %v4520_v44  ;;  %s6783_s6 = sld [smem:[#allocation44_spill]]  ;;  %p3971_p3 = scmp.ge.s32.totalorder %s5034_s2, 1 }
 0x1f1   : > { %v1129_v61 = vsel %vm1113_vm2, %v1101_v55, 0.0 }
 0x1f2   : > { %1124 = vadd.xlane.f32.xlu1 %v1123_v59 }
 0x1f3   : > { %1118 = vadd.xlane.f32.xlu0 %v1117_v58  ;;  %1328 = vmatpush1.bf16.msra.mxu0 %v4522_v45 }
 0x1f4   : > { %1329 = vmatprep.subr.bf16.mxu0 %v4523_v46 }
 0x1f6   : > { %1130 = vadd.xlane.f32.xlu1 %v1129_v61  ;;  %s6784_s13 = scalar_lea.vmem %s6783_s6, %s5547_s4 }
 0x1f7   : > { %1127 = vadd.xlane.f32.xlu0 %v1126_v60  ;;  %1330 = vmatpush1.bf16.msra.mxu0 %v4525_v47 }
 0x1fa   : > { %1136 = vadd.xlane.f32.xlu1 %v1135_v63 }
 0x1fb   : > { %1133 = vadd.xlane.f32.xlu0 %v1132_v62 }
 0x27b   : > { %v1122_v1 = vpop.xlane.xlu1 %1121 }
 0x27c   : > { %v1116_v0 = vpop.xlane.xlu0 %1115  ;;  %v1141_v3 = vmul.f32 0.015625, %v1122_v1 }
 0x27d   : > { %v1139_v2 = vmul.f32 0.015625, %v1116_v0 }
 0x27e   : > { %v5662_v5 = vsub.f32 %v1098_v49, %v1141_v3 }
 0x27f   : > { %v5660_v4 = vsub.f32 %v1096_v48, %v1139_v2  ;;  %v1125_v7 = vpop.xlane.xlu1 %1124  ;;  %v5060_v48 = vmov 0  }
 0x280   : > { %v1119_v6 = vpop.xlane.xlu0 %1118  ;;  %v1142_v9 = vmul.f32 0.015625, %v1125_v7  ;;  %v1157_v11 = vmul.f32 %v5662_v5, %v5662_v5  ;;  %1355 = vmatprep.mubr.bf16.mxu0 %v5060_v48 }
 0x281   : > { %v1140_v8 = vmul.f32 0.015625, %v1119_v6  ;;  %v1155_v10 = vmul.f32 %v5660_v4, %v5660_v4 }
 0x282   : > { %v5670_v13 = vsub.f32 %v1099_v53, %v1142_v9  ;;  %v1169_v17 = vsel %vm1113_vm2, %v1157_v11, 0.0 }
 0x283   : > { %v5668_v12 = vsub.f32 %v1097_v50, %v1140_v8  ;;  %v1163_v14 = vsel %vm1113_vm2, %v1155_v10, 0.0  ;;  %v1131_v16 = vpop.xlane.xlu1 %1130  ;;  %v3884_v10 = vld [vmem:[%s6780_s1] ss:$0 sm:$0xff] }
 0x284   : > { %1164 = vadd.xlane.f32.xlu0 %v1163_v14  ;;  %v1128_v15 = vpop.xlane.xlu0 %1127  ;;  %v1144_v19 = vmul.f32 0.015625, %v1131_v16  ;;  %v1158_v21 = vmul.f32 %v5670_v13, %v5670_v13 }
 0x285   : > { %v1143_v18 = vmul.f32 0.015625, %v1128_v15  ;;  %v1156_v20 = vmul.f32 %v5668_v12, %v5668_v12 }
 0x286   : > { %v5680_v23 = vsub.f32 %v1101_v55, %v1144_v19  ;;  %v1172_v27 = vsel %vm1113_vm2, %v1158_v21, 0.0  ;;  %v3885_v19 = vld [vmem:[%s773_s5] ss:$0 sm:$0xff] }
 0x287   : > { %v5678_v22 = vsub.f32 %v1100_v54, %v1143_v18  ;;  %v1166_v24 = vsel %vm1113_vm2, %v1156_v20, 0.0  ;;  %v1137_v26 = vpop.xlane.xlu1 %1136 }
 0x288   : > { %1170 = vadd.xlane.f32.xlu0 %v1169_v17  ;;  %1167 = vadd.xlane.f32.xlu1 %v1166_v24  ;;  %v1134_v25 = vpop.xlane.xlu0 %1133  ;;  %v1146_v29 = vmul.f32 0.015625, %v1137_v26  ;;  %v1160_v31 = vmul.f32 %v5680_v23, %v5680_v23 }
 0x289   : > { %v1145_v28 = vmul.f32 0.015625, %v1134_v25  ;;  %v1159_v30 = vmul.f32 %v5678_v22, %v5678_v22 }
 0x28a   : > { %v5690_v33 = vsub.f32 %v1103_v57, %v1146_v29  ;;  %v1178_v35 = vsel %vm1113_vm2, %v1160_v31, 0.0 }
 0x28b   : > { %v5688_v32 = vsub.f32 %v1102_v56, %v1145_v28  ;;  %v1175_v34 = vsel %vm1113_vm2, %v1159_v30, 0.0 }
 0x28c   : > { %1173 = vadd.xlane.f32.xlu1 %v1172_v27  ;;  %1176 = vadd.xlane.f32.xlu0 %v1175_v34  ;;  %v1162_v37 = vmul.f32 %v5690_v33, %v5690_v33 }
 0x28d   : > { %v1161_v36 = vmul.f32 %v5688_v32, %v5688_v32 }
 0x28e   : > { %v1184_v39 = vsel %vm1113_vm2, %v1162_v37, 0.0 }
 0x28f   : > { %v1181_v38 = vsel %vm1113_vm2, %v1161_v36, 0.0 }
 0x290   : > { %1179 = vadd.xlane.f32.xlu1 %v1178_v35  ;;  %1182 = vadd.xlane.f32.xlu0 %v1181_v38 }
 0x294   : > { %1185 = vadd.xlane.f32.xlu1 %v1184_v39 }
 0x311   : > { %v1165_v49 = vpop.xlane.xlu0 %1164 }
 0x312   : > { %v1187_v50 = vmul.f32 0.015625, %v1165_v49 }
 0x314   : > { %v1195_v51 = vadd.f32 1e-06, %v1187_v50  ;;  %v1261_v50 = vlaneseq }
 0x315   : > { %v1168_v52 = vpop.xlane.xlu1 %1167  ;;  %v1171_v53 = vpop.xlane.xlu0 %1170 }
 0x316   : > { %4542 = vrsqrt.f32 %v1195_v51  ;;  %v1188_v54 = vmul.f32 0.015625, %v1168_v52  ;;  %v1189_v55 = vmul.f32 0.015625, %v1171_v53  ;;  %v1262_v51 = vshrl.u32 %v1261_v50, 7  ;;  %v1259_v53 = vld [vmem:[%s5569_s10] sm:$0x3]  ;;  %s5062_s10 = smov 48  }
 0x318   : > { %v1196_v56 = vadd.f32 1e-06, %v1188_v54  ;;  %v1197_v57 = vadd.f32 1e-06, %v1189_v55  ;;  %v1263_v52 = vsub.s32 0, %v1262_v51 }
 0x319   : > { %v1174_v58 = vpop.xlane.xlu1 %1173  ;;  %v1177_v59 = vpop.xlane.xlu0 %1176 }
 0x31a   : > { %4544 = vrsqrt.f32 %v1196_v56  ;;  %v1190_v60 = vmul.f32 0.015625, %v1174_v58  ;;  %v1191_v62 = vmul.f32 0.015625, %v1177_v59  ;;  %v1264_v54 = vrot.slane %v1259_v53, %v1263_v52 }
 0x31b   : > { %4546 = vrsqrt.f32 %v1197_v57 }
 0x31c   : > { %v1198_v61 = vadd.f32 1e-06, %v1190_v60  ;;  %v1199_v2 = vadd.f32 1e-06, %v1191_v62 }
 0x31d   : > { %v1180_v63 = vpop.xlane.xlu1 %1179  ;;  %v1183_v6 = vpop.xlane.xlu0 %1182 }
 0x31e   : > { %4548 = vrsqrt.f32 %v1198_v61  ;;  %v1192_v0 = vmul.f32 0.015625, %v1180_v63  ;;  %v1193_v14 = vmul.f32 0.015625, %v1183_v6 }
 0x320   : > { %v4543_v1 = vpop.eup %4542  ;;  %v1200_v3 = vadd.f32 1e-06, %v1192_v0  ;;  %v1201_v24 = vadd.f32 1e-06, %v1193_v14 }
 0x321   : > { %v1186_v7 = vpop.xlane.xlu1 %1185  ;;  %v1211_v8 = vmul.f32 %v4543_v1, %v5660_v4 }
 0x322   : > { %4550 = vrsqrt.f32 %v1200_v3  ;;  %v1194_v9 = vmul.f32 0.015625, %v1186_v7 }
 0x323   : > { %4552 = vrsqrt.f32 %v1199_v2  ;;  %v1225_v16 = vmul.f32 %v3884_v10, %v1211_v8 }
 0x324   : > { %v4545_v11 = vpop.eup %4544  ;;  %v1202_v18 = vadd.f32 1e-06, %v1194_v9 }
 0x325   : > { %v1212_v15 = vmul.f32 %v4545_v11, %v5668_v12  ;;  %v4547_v17 = vpop.eup %4546  ;;  %v1239_v25 = vadd.f32 %v3885_v19, %v1225_v16 }
 0x326   : > { %v1213_v4 = vmul.f32 %v4547_v17, %v5662_v5  ;;  %4554 = vrsqrt.f32 %v1202_v18 }
 0x327   : > { %v1226_v20 = vmul.f32 %v3884_v10, %v1212_v15  ;;  %4556 = vrsqrt.f32 %v1201_v24 }
 0x328   : > { %v4549_v21 = vpop.eup %4548  ;;  %v1227_v12 = vmul.f32 %v3884_v10, %v1213_v4 }
 0x329   : > { %v1240_v26 = vadd.f32 %v3885_v19, %v1226_v20  ;;  %v1214_v27 = vmul.f32 %v4549_v21, %v5670_v13 }
 0x32a   : > { %v1241_v36 = vadd.f32 %v3885_v19, %v1227_v12 }
 0x32b   : > { %v1247_v28 = vpack.c.bf16 %v1240_v26, %v1239_v25  ;;  %v1228_v29 = vmul.f32 %v3884_v10, %v1214_v27 }
 0x32c   : > { %v4551_v30 = vpop.eup %4550 }
 0x32d   : > { %3894 = vmatmul.mubr.msk.bf16.vlgmr.msra.gmra.mrb[0].mxu0 %vm1113_vm2, %v1247_v28  ;;  %v4553_v31 = vpop.eup %4552  ;;  %v1242_v34 = vadd.f32 %v3885_v19, %v1228_v29  ;;  %v1216_v35 = vmul.f32 %v4551_v30, %v5680_v23 }
 0x32e   : > { %1365 = vmatprep.mubr.bf16.mxu0 %v5060_v48  ;;  %v1215_v37 = vmul.f32 %v4553_v31, %v5678_v22 }
 0x32f   : > { %v1248_v5 = vpack.c.bf16 %v1242_v34, %v1241_v36  ;;  %v1230_v38 = vmul.f32 %v3884_v10, %v1216_v35 }
 0x330   : > { %v4555_v13 = vpop.eup %4554  ;;  %v1229_v39 = vmul.f32 %v3884_v10, %v1215_v37 }
 0x331   : > { %v4557_v40 = vpop.eup %4556  ;;  %v1244_v41 = vadd.f32 %v3885_v19, %v1230_v38  ;;  %v1218_v42 = vmul.f32 %v4555_v13, %v5690_v33  ;;  %v1267_v33 = vsub.s32 1, %v1262_v51 }
 0x332   : > { %v1243_v43 = vadd.f32 %v3885_v19, %v1229_v39  ;;  %v1217_v44 = vmul.f32 %v4557_v40, %v5688_v32 }
 0x333   : > { %v1232_v45 = vmul.f32 %v3884_v10, %v1218_v42  ;;  %v1268_v32 = vrot.slane %v1259_v53, %v1267_v33 }
 0x334   : > { %v1249_v23 = vpack.c.bf16 %v1244_v41, %v1243_v43  ;;  %v1231_v22 = vmul.f32 %v3884_v10, %v1217_v44 }
 0x335   : > { %3895 = vmatmul.mubr.msk.bf16.gmra.mrb[4].mxu0 %vm1113_vm2, %v1248_v5  ;;  %v1246_v46 = vadd.f32 %v3885_v19, %v1232_v45 }
 0x336   : > { %1375 = vmatprep.mubr.bf16.mxu0 %v5060_v48  ;;  %v1245_v47 = vadd.f32 %v3885_v19, %v1231_v22 }
 0x338   : > { %v1250_v49 = vpack.c.bf16 %v1246_v46, %v1245_v47 }
 0x33d   : > { %3896 = vmatmul.mubr.msk.bf16.gmra.mrb[8].mxu0 %vm1113_vm2, %v1249_v23 }
 0x33e   : > { %1385 = vmatprep.mubr.bf16.mxu0 %v5060_v48 }
 0x345   : > { %3897 = vmatmul.mubr.msk.bf16.gmra.mrb[12].mxu0 %vm1113_vm2, %v1250_v49 }
 0x400   : > { %v1357_v55 = vpop.f32.mrb[0].mxu0 }
 0x401   : > { %v1359_v56 = vpop.f32.mrb[1].mxu0  ;;  %v1358_v58 = vadd.f32 %v1357_v55, %v1264_v54 }
 0x402   : > { %v1361_v57 = vpop.f32.mrb[2].mxu0  ;;  %v1360_v61 = vadd.f32 %v1359_v56, %v1268_v32 }
 0x403   : > { %v1362_v59 = vadd.f32 %v1361_v57, %v1264_v54  ;;  %v1363_v60 = vpop.f32.mrb[3].mxu0 }
 0x404   : > { %v1364_v48 = vadd.f32 %v1363_v60, %v1268_v32 }
 0x405   : > { %v5729_v62 = vpack.c.bf16 %v1362_v59, %v1358_v58 }
 0x406   : > { %v5731_v63 = vpack.c.bf16 %v1364_v48, %v1360_v61 }
 0x407   : > { %1412 = vrot.lane.b32.xlu0 %v5729_v62, %s5061_s3  ;;  %4120 = vmatprep.mubr.msk.bf16.mxu1 %vm1420_vm3, %v5729_v62 }
 0x408   : > { %v1367_v0 = vpop.f32.mrb[4].mxu0  ;;  %4128 = vmatprep.subr.bf16.mxu0 %v5731_v63 }
 0x409   : > { %v1369_v1 = vpop.f32.mrb[5].mxu0  ;;  %4129 = vmatpush3.bf16.msra.mxu0 %v5731_v63  ;;  %v1368_v3 = vadd.f32 %v1367_v0, %v1264_v54  ;;  %v5831_v0 = vld [vmem:[%s6781_s29] ss:$0 sm:$0xff] }
 0x40a   : > { %v1371_v2 = vpop.f32.mrb[6].mxu0  ;;  %v1370_v8 = vadd.f32 %v1369_v1, %v1268_v32 }
 0x40b   : > { %v1372_v6 = vadd.f32 %v1371_v2, %v1264_v54  ;;  %1695 = vrot.lane.b32.xlu0 %v5729_v62, %s5062_s10  ;;  %v1373_v7 = vpop.f32.mrb[7].mxu0 }
 0x40c   : > { %v1374_v9 = vadd.f32 %v1373_v7, %v1268_v32 }
 0x40d   : > { %v5741_v10 = vpack.c.bf16 %v1372_v6, %v1368_v3 }
 0x40e   : > { %v5743_v11 = vpack.c.bf16 %v1374_v9, %v1370_v8 }
 0x40f   : > { %1414 = vrot.lane.b32.xlu1 %v5741_v10, %s5061_s3 }
 0x410   : > { %v1377_v14 = vpop.f32.mrb[8].mxu0  ;;  %4130 = vmatprep.subr.bf16.mxu0 %v5743_v11 }
 0x411   : > { %v1379_v15 = vpop.f32.mrb[9].mxu0  ;;  %4131 = vmatpush3.bf16.msra.mxu0 %v5743_v11  ;;  %v1378_v17 = vadd.f32 %v1377_v14, %v1264_v54 }
 0x412   : > { %v1381_v16 = vpop.f32.mrb[10].mxu0  ;;  %v1380_v20 = vadd.f32 %v1379_v15, %v1268_v32 }
 0x413   : > { %v1382_v18 = vadd.f32 %v1381_v16, %v1264_v54  ;;  %v1383_v19 = vpop.f32.mrb[11].mxu0 }
 0x414   : > { %v1384_v21 = vadd.f32 %v1383_v19, %v1268_v32 }
 0x415   : > { %v5749_v24 = vpack.c.bf16 %v1382_v18, %v1378_v17 }
 0x416   : > { %v5751_v25 = vpack.c.bf16 %v1384_v21, %v1380_v20 }
 0x417   : > { %1699 = vrot.lane.b32.xlu0 %v5749_v24, %s5062_s10  ;;  %1416 = vrot.lane.b32.xlu1 %v5749_v24, %s5061_s3 }
 0x418   : > { %v1387_v26 = vpop.f32.mrb[12].mxu0  ;;  %4132 = vmatprep.subr.bf16.mxu0 %v5751_v25 }
 0x419   : > { %v1389_v4 = vpop.f32.mrb[13].mxu0  ;;  %4133 = vmatpush3.bf16.msra.mxu0 %v5751_v25  ;;  %v1388_v28 = vadd.f32 %v1387_v26, %v1264_v54 }
 0x41a   : > { %v1391_v27 = vpop.f32.mrb[14].mxu0  ;;  %v1390_v12 = vadd.f32 %v1389_v4, %v1268_v32 }
 0x41b   : > { %v1392_v29 = vadd.f32 %v1391_v27, %v1264_v54  ;;  %1687 = vrot.lane.b32.xlu0 %v5729_v62, %s5063_s15  ;;  %v1393_v30 = vpop.f32.mrb[15].mxu0 }
 0x41c   : > { %v1394_v31 = vadd.f32 %v1393_v30, %v1268_v32 }
 0x41d   : > { %v5761_v34 = vpack.c.bf16 %v1392_v29, %v1388_v28 }
 0x41e   : > { %v5763_v35 = vpack.c.bf16 %v1394_v31, %v1390_v12 }
 0x41f   : > { %1691 = vrot.lane.b32.xlu0 %v5749_v24, %s5063_s15  ;;  %1418 = vrot.lane.b32.xlu1 %v5761_v34, %s5061_s3 }
 0x420   : > { %4134 = vmatprep.subr.bf16.mxu0 %v5763_v35 }
 0x421   : > { %4135 = vmatpush3.bf16.msra.mxu0 %v5763_v35 }
 0x423   : > { %2155 = vrot.lane.b32.xlu0 %v5729_v62, %s5064_s27  ;;  %1697 = vrot.lane.b32.xlu1 %v5741_v10, %s5062_s10 }
 0x427   : > { %2159 = vrot.lane.b32.xlu0 %v5749_v24, %s5064_s27  ;;  %1701 = vrot.lane.b32.xlu1 %v5761_v34, %s5062_s10 }
 0x42b   : > { %2147 = vrot.lane.b32.xlu0 %v5729_v62, %s5065_s20  ;;  %1689 = vrot.lane.b32.xlu1 %v5741_v10, %s5063_s15 }
 0x42f   : > { %2151 = vrot.lane.b32.xlu0 %v5749_v24, %s5065_s20  ;;  %1693 = vrot.lane.b32.xlu1 %v5761_v34, %s5063_s15 }
 0x433   : > { %2157 = vrot.lane.b32.xlu1 %v5741_v10, %s5064_s27 }
 0x437   : > { %2149 = vrot.lane.b32.xlu1 %v5741_v10, %s5065_s20 }
 0x43b   : > { %2161 = vrot.lane.b32.xlu1 %v5761_v34, %s5064_s27 }
 0x43f   : > { %2153 = vrot.lane.b32.xlu1 %v5761_v34, %s5065_s20 }
 0x479   : > { %v1413_v36 = vpop.permute.xlu0 %1412 }
 0x47a   : > { %4350 = vmatprep.subr.msk.bf16.mxu1 %vm1420_vm3, %v1413_v36  ;;  %v1434_v37 = vsel %vm1420_vm3, %v1413_v36, 0 }
 0x47b   : > { %4113 = vmatpush3.bf16.xpose.msra.mxu1 %v1434_v37 }
 0x47d   : > { %v1696_v42 = vpop.permute.xlu0 %1695 }
 0x47e   : > { %v1716_v43 = vsel %vm1420_vm3, %v1696_v42, 0 }
 0x481   : > { %v1415_v5 = vpop.permute.xlu1 %1414 }
 0x482   : > { %4351 = vmatprep.subr.msk.bf16.mxu1 %vm1420_vm3, %v1415_v5  ;;  %v1437_v38 = vsel %vm1420_vm3, %v1415_v5, 0 }
 0x483   : > { %4115 = vmatpush3.bf16.xpose.msra.mxu1 %v1437_v38 }
 0x489   : > { %v1417_v13 = vpop.permute.xlu1 %1416  ;;  %v1700_v23 = vpop.permute.xlu0 %1699 }
 0x48a   : > { %4352 = vmatprep.subr.msk.bf16.mxu1 %vm1420_vm3, %v1417_v13  ;;  %v1440_v39 = vsel %vm1420_vm3, %v1417_v13, 0  ;;  %v1722_v47 = vsel %vm1420_vm3, %v1700_v23, 0 }
 0x48b   : > { %4117 = vmatpush3.bf16.xpose.msra.mxu1 %v1440_v39 }
 0x48d   : > { %v1688_v45 = vpop.permute.xlu0 %1687 }
 0x491   : > { %v1419_v40 = vpop.permute.xlu1 %1418  ;;  %v1692_v49 = vpop.permute.xlu0 %1691 }
 0x492   : > { %4353 = vmatprep.subr.msk.bf16.mxu1 %vm1420_vm3, %v1419_v40  ;;  %v1443_v41 = vsel %vm1420_vm3, %v1419_v40, 0 }
 0x493   : > { %4119 = vmatpush3.bf16.xpose.msra.mxu1 %v1443_v41 }
 0x494   : > { %4354 = vmatprep.subr.msk.bf16.mxu1 %vm1420_vm3, %v1696_v42 }
 0x495   : > { %v1698_v44 = vpop.permute.xlu1 %1697  ;;  %v2156_v52 = vpop.permute.xlu0 %2155 }
 0x496   : > { %v1719_v22 = vsel %vm1420_vm3, %v1698_v44, 0  ;;  %v2176_v33 = vsel %vm1420_vm3, %v2156_v52, 0 }
 0x499   : > { %v1702_v46 = vpop.permute.xlu1 %1701  ;;  %v2160_v55 = vpop.permute.xlu0 %2159 }
 0x49a   : > { %4121 = vmatmul.mubr.msk.bf16.vlgmr.msra.gmra.mrb[0].mxu1 %vm1420_vm3, %v5741_v10  ;;  %v1725_v51 = vsel %vm1420_vm3, %v1702_v46, 0  ;;  %v2182_v58 = vsel %vm1420_vm3, %v2160_v55, 0 }
 0x49b   : > { %4124 = vmatprep.mubr.msk.bf16.mxu1 %vm1420_vm3, %v5749_v24  ;;  %4145 = vmatpush3.bf16.xpose.msra.mxu1 %v1716_v43 }
 0x49c   : > { %4355 = vmatprep.subr.msk.bf16.mxu1 %vm1420_vm3, %v1698_v44 }
 0x49d   : > { %v1690_v50 = vpop.permute.xlu1 %1689  ;;  %v2148_v32 = vpop.permute.xlu0 %2147 }
 0x4a1   : > { %v1694_v53 = vpop.permute.xlu1 %1693  ;;  %v2152_v61 = vpop.permute.xlu0 %2151 }
 0x4a2   : > { %4125 = vmatmul.mubr.msk.bf16.gmra.mrb[4].mxu1 %vm1420_vm3, %v5761_v34 }
 0x4a3   : > { %4147 = vmatpush3.bf16.xpose.msra.mxu1 %v1719_v22  ;;  %4152 = vmatprep.mubr.msk.bf16.mxu1 %vm1420_vm3, %v1688_v45 }
 0x4a4   : > { %4356 = vmatprep.subr.msk.bf16.mxu1 %vm1420_vm3, %v1700_v23 }
 0x4a5   : > { %v2158_v54 = vpop.permute.xlu1 %2157 }
 0x4a6   : > { %v2179_v56 = vsel %vm1420_vm3, %v2158_v54, 0 }
 0x4a9   : > { %v2150_v57 = vpop.permute.xlu1 %2149 }
 0x4ab   : > { %4149 = vmatpush3.bf16.xpose.msra.mxu1 %v1722_v47 }
 0x4ac   : > { %4357 = vmatprep.subr.msk.bf16.mxu1 %vm1420_vm3, %v1702_v46 }
 0x4ad   : > { %v2162_v59 = vpop.permute.xlu1 %2161 }
 0x4ae   : > { %v2185_v60 = vsel %vm1420_vm3, %v2162_v59, 0 }
 0x4b1   : > { %v2154_v48 = vpop.permute.xlu1 %2153 }
 0x4b3   : > { %4151 = vmatpush3.bf16.xpose.msra.mxu1 %v1725_v51 }
 0x4b4   : > { %4358 = vmatprep.subr.msk.bf16.mxu1 %vm1420_vm3, %v2156_v52 }
 0x4ba   : > { %4153 = vmatmul.mubr.msk.bf16.vlgmr.msra.gmra.mrb[8].mxu1 %vm1420_vm3, %v1690_v50 }
 0x4bb   : > { %4156 = vmatprep.mubr.msk.bf16.mxu1 %vm1420_vm3, %v1692_v49  ;;  %4197 = vmatpush3.bf16.xpose.msra.mxu1 %v2176_v33 }
 0x4bc   : > { %4359 = vmatprep.subr.msk.bf16.mxu1 %vm1420_vm3, %v2158_v54 }
 0x4c2   : > { %4157 = vmatmul.mubr.msk.bf16.gmra.mrb[12].mxu1 %vm1420_vm3, %v1694_v53 }
 0x4c3   : > { %4199 = vmatpush3.bf16.xpose.msra.mxu1 %v2179_v56  ;;  %4204 = vmatprep.mubr.msk.bf16.mxu1 %vm1420_vm3, %v2148_v32 }
 0x4c4   : > { %4360 = vmatprep.subr.msk.bf16.mxu1 %vm1420_vm3, %v2160_v55 }
 0x4cb   : > { %4201 = vmatpush3.bf16.xpose.msra.mxu1 %v2182_v58 }
 0x4cc   : > { %4361 = vmatprep.subr.msk.bf16.mxu1 %vm1420_vm3, %v2162_v59 }
 0x4d3   : > { %4203 = vmatpush3.bf16.xpose.msra.mxu1 %v2185_v60 }
 0x4da   : > { %4205 = vmatmul.mubr.msk.bf16.vlgmr.msra.gmra.mrb[16].mxu1 %vm1420_vm3, %v2150_v57 }
 0x4db   : > { %4208 = vmatprep.mubr.msk.bf16.mxu1 %vm1420_vm3, %v2152_v61 }
 0x4e2   : > { %4209 = vmatmul.mubr.msk.bf16.gmra.mrb[20].mxu1 %vm1420_vm3, %v2154_v48 }
 0x56d   : > { %v4122_v1 = vpop.f32.mrb[0].mxu1 }
 0x56e   : > { %v5834_v2 = vadd.f32 %v4122_v1, %v5831_v0  ;;  %v1479_v3 = vpop.f32.mrb[1].mxu1 }
 0x56f   : > { %v4123_v6 = vpop.f32.mrb[2].mxu1  ;;  %v5837_v7 = vadd.f32 %v5831_v0, %v1479_v3 }
 0x570   : > { %v1482_v8 = vpop.f32.mrb[3].mxu1  ;;  %v1516_v9 = vsel %vm1113_vm2, %v5834_v2, -inf  ;;  %v5847_v16 = vadd.f32 %v4123_v6, %v5831_v0 }
 0x571   : > { %v5842_v14 = vadd.f32 %v5831_v0, %v1482_v8  ;;  %1517 = vmax.xlane.f32.xlu0 %v1516_v9  ;;  %v1510_v17 = vsel %vm1113_vm2, %v5837_v7, -inf }
 0x572   : > { %v1519_v27 = vsel %vm1113_vm2, %v5847_v16, -inf }
 0x573   : > { %v1513_v15 = vsel %vm1113_vm2, %v5842_v14, -inf }
 0x574   : > { %1514 = vmax.xlane.f32.xlu1 %v1513_v15 }
 0x575   : > { %v4126_v18 = vpop.f32.mrb[4].mxu1  ;;  %1511 = vmax.xlane.f32.xlu0 %v1510_v17 }
 0x576   : > { %v1495_v19 = vpop.f32.mrb[5].mxu1  ;;  %v5865_v30 = vadd.f32 %v4126_v18, %v5831_v0 }
 0x577   : > { %v4127_v20 = vpop.f32.mrb[6].mxu1  ;;  %v5852_v21 = vadd.f32 %v5831_v0, %v1495_v19 }
 0x578   : > { %v5855_v26 = vadd.f32 %v4127_v20, %v5831_v0  ;;  %v1498_v4 = vpop.f32.mrb[7].mxu1  ;;  %v1528_v36 = vsel %vm1113_vm2, %v5865_v30, -inf }
 0x579   : > { %1520 = vmax.xlane.f32.xlu0 %v1519_v27  ;;  %v5860_v28 = vadd.f32 %v5831_v0, %v1498_v4  ;;  %v1522_v12 = vsel %vm1113_vm2, %v5852_v21, -inf }
 0x57a   : > { %v1531_v29 = vsel %vm1113_vm2, %v5855_v26, -inf }
 0x57b   : > { %1532 = vmax.xlane.f32.xlu1 %v1531_v29  ;;  %v1525_v31 = vsel %vm1113_vm2, %v5860_v28, -inf }
 0x57d   : > { %1523 = vmax.xlane.f32.xlu0 %v1522_v12 }
 0x57f   : > { %1526 = vmax.xlane.f32.xlu1 %v1525_v31 }
 0x581   : > { %1529 = vmax.xlane.f32.xlu0 %v1528_v36 }
 0x58d   : > { %v4154_v37 = vpop.f32.mrb[8].mxu1 }
 0x58e   : > { %v1761_v5 = vpop.f32.mrb[9].mxu1  ;;  %v5880_v41 = vadd.f32 %v4154_v37, %v5831_v0 }
 0x58f   : > { %v5874_v38 = vadd.f32 %v5831_v0, %v1761_v5  ;;  %v4155_v13 = vpop.f32.mrb[10].mxu1 }
 0x590   : > { %v5877_v39 = vadd.f32 %v4155_v13, %v5831_v0  ;;  %v1764_v40 = vpop.f32.mrb[11].mxu1  ;;  %v1798_v45 = vsel %vm1113_vm2, %v5880_v41, -inf }
 0x591   : > { %v1792_v42 = vsel %vm1113_vm2, %v5874_v38, -inf  ;;  %v5885_v43 = vadd.f32 %v5831_v0, %v1764_v40 }
 0x592   : > { %1793 = vmax.xlane.f32.xlu0 %v1792_v42  ;;  %v1801_v44 = vsel %vm1113_vm2, %v5877_v39, -inf }
 0x593   : > { %1802 = vmax.xlane.f32.xlu1 %v1801_v44  ;;  %v1795_v46 = vsel %vm1113_vm2, %v5885_v43, -inf }
 0x595   : > { %v4158_v23 = vpop.f32.mrb[12].mxu1 }
 0x596   : > { %1799 = vmax.xlane.f32.xlu0 %v1798_v45  ;;  %v1777_v22 = vpop.f32.mrb[13].mxu1  ;;  %v5900_v52 = vadd.f32 %v4158_v23, %v5831_v0 }
 0x597   : > { %v5894_v47 = vadd.f32 %v5831_v0, %v1777_v22  ;;  %1796 = vmax.xlane.f32.xlu1 %v1795_v46  ;;  %v4159_v49 = vpop.f32.mrb[14].mxu1 }
 0x598   : > { %v5897_v50 = vadd.f32 %v4159_v49, %v5831_v0  ;;  %v1780_v51 = vpop.f32.mrb[15].mxu1  ;;  %v1810_v55 = vsel %vm1113_vm2, %v5900_v52, -inf }
 0x599   : > { %v1804_v53 = vsel %vm1113_vm2, %v5894_v47, -inf  ;;  %v5905_v33 = vadd.f32 %v5831_v0, %v1780_v51 }
 0x59a   : > { %1805 = vmax.xlane.f32.xlu0 %v1804_v53  ;;  %v1813_v54 = vsel %vm1113_vm2, %v5897_v50, -inf }
 0x59b   : > { %1814 = vmax.xlane.f32.xlu1 %v1813_v54  ;;  %v1807_v32 = vsel %vm1113_vm2, %v5905_v33, -inf }
 0x59e   : > { %1811 = vmax.xlane.f32.xlu0 %v1810_v55 }
 0x59f   : > { %1808 = vmax.xlane.f32.xlu1 %v1807_v32 }
 0x5ad   : > { %v5913_v56 = vpop.f32.mrb[16].mxu1 }
 0x5ae   : > { %v5915_v57 = vpop.f32.mrb[17].mxu1 }
 0x5af   : > { %v5917_v58 = vpop.f32.mrb[18].mxu1 }
 0x5b0   : > { %v5919_v59 = vpop.f32.mrb[19].mxu1 }
 0x5b5   : > { %v5921_v60 = vpop.f32.mrb[20].mxu1 }
 0x5b6   : > { %v5923_v61 = vpop.f32.mrb[21].mxu1 }
 0x5b7   : > { %v5925_v48 = vpop.f32.mrb[22].mxu1 }
 0x5b8   : > { %v5927_v1 = vpop.f32.mrb[23].mxu1 }
 0x5fe   : > { %v1518_v3 = vpop.xlane.xlu0 %1517 }
 0x5ff   : > { %v1536_v6 = vsub.f32 %v5834_v2, %v1518_v3 }
 0x601   : > { %v1546_v8 = vmul.f32 1.442695, %v1536_v6  ;;  %v1515_v9 = vpop.xlane.xlu1 %1514 }
 0x602   : > { %v1512_v15 = vpop.xlane.xlu0 %1511  ;;  %v1535_v18 = vsub.f32 %v5842_v14, %v1515_v9 }
 0x603   : > { %4558 = vpow2.f32 %v1546_v8  ;;  %v1534_v17 = vsub.f32 %v5837_v7, %v1512_v15 }
 0x604   : > { %v1544_v29 = vmul.f32 1.442695, %v1535_v18 }
 0x605   : > { %v1542_v19 = vmul.f32 1.442695, %v1534_v17 }
 0x606   : > { %v1521_v20 = vpop.xlane.xlu0 %1520 }
 0x607   : > { %4560 = vpow2.f32 %v1542_v19  ;;  %v1537_v4 = vsub.f32 %v5847_v16, %v1521_v20 }
 0x608   : > { %v1533_v27 = vpop.xlane.xlu1 %1532 }
 0x609   : > { %v1548_v12 = vmul.f32 1.442695, %v1537_v4  ;;  %v1541_v31 = vsub.f32 %v5855_v26, %v1533_v27 }
 0x60a   : > { %v1524_v36 = vpop.xlane.xlu0 %1523 }
 0x60b   : > { %4562 = vpow2.f32 %v1548_v12  ;;  %v1538_v2 = vsub.f32 %v5852_v21, %v1524_v36  ;;  %v1556_v7 = vmul.f32 1.442695, %v1541_v31 }
 0x60c   : > { %v1527_v37 = vpop.xlane.xlu1 %1526  ;;  %4564 = vpow2.f32 %v1544_v29 }
 0x60d   : > { %v5935_v5 = vpop.eup %4558  ;;  %v1539_v14 = vsub.f32 %v5860_v28, %v1527_v37  ;;  %v1550_v42 = vmul.f32 1.442695, %v1538_v2  ;;  %4566 = vpow2.f32 %v1556_v7 }
 0x60e   : > { %v1530_v13 = vpop.xlane.xlu0 %1529  ;;  %v1564_v16 = vsel %vm1113_vm2, %v5935_v5, 0.0 }
 0x60f   : > { %v1540_v40 = vsub.f32 %v5865_v30, %v1530_v13  ;;  %1565 = vadd.xlane.f32.xlu0 %v1564_v16  ;;  %v1552_v44 = vmul.f32 1.442695, %v1539_v14 }
 0x611   : > { %v5941_v26 = vpop.eup %4560  ;;  %v1554_v21 = vmul.f32 1.442695, %v1540_v40 }
 0x612   : > { %v1558_v23 = vsel %vm1113_vm2, %v5941_v26, 0.0 }
 0x613   : > { %4568 = vpow2.f32 %v1554_v21  ;;  %1559 = vadd.xlane.f32.xlu0 %v1558_v23 }
 0x614   : > { %4570 = vpow2.f32 %v1550_v42 }
 0x615   : > { %v5945_v28 = vpop.eup %4562  ;;  %4572 = vpow2.f32 %v1552_v44 }
 0x616   : > { %v1567_v45 = vsel %vm1113_vm2, %v5945_v28, 0.0  ;;  %v5949_v30 = vpop.eup %4564 }
 0x617   : > { %1568 = vadd.xlane.f32.xlu1 %v1567_v45  ;;  %v1561_v22 = vsel %vm1113_vm2, %v5949_v30, 0.0  ;;  %v5953_v46 = vpop.eup %4566 }
 0x618   : > { %v1579_v53 = vsel %vm1113_vm2, %v5953_v46, 0.0 }
 0x61b   : > { %1562 = vadd.xlane.f32.xlu1 %v1561_v22 }
 0x61d   : > { %v5955_v49 = vpop.eup %4568 }
 0x61e   : > { %v5957_v51 = vpop.eup %4570  ;;  %v1576_v54 = vsel %vm1113_vm2, %v5955_v49, 0.0 }
 0x61f   : > { %v5963_v55 = vpop.eup %4572  ;;  %1580 = vadd.xlane.f32.xlu1 %v1579_v53  ;;  %1577 = vadd.xlane.f32.xlu0 %v1576_v54  ;;  %v1794_v32 = vpop.xlane.xlu0 %1793  ;;  %v1570_v15 = vsel %vm1113_vm2, %v5957_v51, 0.0 }
 0x620   : > { %v1803_v3 = vpop.xlane.xlu1 %1802  ;;  %v1816_v8 = vsub.f32 %v5874_v38, %v1794_v32  ;;  %v1573_v9 = vsel %vm1113_vm2, %v5963_v55, 0.0 }
 0x621   : > { %v1819_v6 = vsub.f32 %v5877_v39, %v1803_v3 }
 0x622   : > { %v1824_v27 = vmul.f32 1.442695, %v1816_v8  ;;  %v6023_v8 = vadd.f32 %v5831_v0, %v5915_v57 }
 0x623   : > { %v1830_v17 = vmul.f32 1.442695, %v1819_v6  ;;  %1574 = vadd.xlane.f32.xlu1 %v1573_v9  ;;  %1571 = vadd.xlane.f32.xlu0 %v1570_v15  ;;  %v1800_v18 = vpop.xlane.xlu0 %1799  ;;  %v6036_v9 = vadd.f32 %v5917_v58, %v5831_v0  ;;  %v6051_v58 = vadd.f32 %v5921_v60, %v5831_v0 }
 0x624   : > { %v1818_v19 = vsub.f32 %v5880_v41, %v1800_v18  ;;  %v1797_v20 = vpop.xlane.xlu1 %1796 }
 0x625   : > { %4574 = vpow2.f32 %v1830_v17  ;;  %v1817_v4 = vsub.f32 %v5885_v43, %v1797_v20  ;;  %v2261_v15 = vsel %vm1113_vm2, %v6036_v9, -inf }
 0x626   : > { %v1828_v39 = vmul.f32 1.442695, %v1818_v19 }
 0x627   : > { %v1826_v29 = vmul.f32 1.442695, %v1817_v4  ;;  %v1806_v38 = vpop.xlane.xlu0 %1805 }
 0x628   : > { %4576 = vpow2.f32 %v1828_v39  ;;  %v1820_v12 = vsub.f32 %v5894_v47, %v1806_v38  ;;  %v1815_v23 = vpop.xlane.xlu1 %1814 }
 0x629   : > { %4578 = vpow2.f32 %v1826_v29  ;;  %v1823_v45 = vsub.f32 %v5897_v50, %v1815_v23 }
 0x62a   : > { %4580 = vpow2.f32 %v1824_v27  ;;  %v1832_v2 = vmul.f32 1.442695, %v1820_v12  ;;  %v6061_v12 = vadd.f32 %v5831_v0, %v5919_v59 }
 0x62b   : > { %v1812_v31 = vpop.xlane.xlu0 %1811  ;;  %v1838_v53 = vmul.f32 1.442695, %v1823_v45 }
 0x62c   : > { %v1822_v36 = vsub.f32 %v5900_v52, %v1812_v31  ;;  %v1809_v22 = vpop.xlane.xlu1 %1808 }
 0x62d   : > { %v1821_v54 = vsub.f32 %v5905_v33, %v1809_v22 }
 0x62e   : > { %v1836_v37 = vmul.f32 1.442695, %v1822_v36 }
 0x62f   : > { %v5975_v7 = vpop.eup %4574  ;;  %v1834_v32 = vmul.f32 1.442695, %v1821_v54 }
 0x630   : > { %4582 = vpow2.f32 %v1836_v37  ;;  %v1849_v41 = vsel %vm1113_vm2, %v5975_v7, 0.0 }
 0x631   : > { %1850 = vadd.xlane.f32.xlu1 %v1849_v41  ;;  %4584 = vpow2.f32 %v1832_v2 }
 0x632   : > { %v5979_v43 = vpop.eup %4576  ;;  %4586 = vpow2.f32 %v1838_v53 }
 0x633   : > { %v5981_v14 = vpop.eup %4578  ;;  %v1846_v47 = vsel %vm1113_vm2, %v5979_v43, 0.0  ;;  %4588 = vpow2.f32 %v1834_v32 }
 0x634   : > { %v5985_v13 = vpop.eup %4580  ;;  %1847 = vadd.xlane.f32.xlu0 %v1846_v47  ;;  %v1843_v52 = vsel %vm1113_vm2, %v5981_v14, 0.0  ;;  %v6069_v47 = vadd.f32 %v5831_v0, %v5927_v1 }
 0x635   : > { %1844 = vadd.xlane.f32.xlu1 %v1843_v52  ;;  %v1840_v16 = vsel %vm1113_vm2, %v5985_v13, 0.0  ;;  %v2255_v52 = vsel %vm1113_vm2, %v6061_v12, -inf }
 0x636   : > { %v2267_v1 = vsel %vm1113_vm2, %v6069_v47, -inf }
 0x638   : > { %1841 = vadd.xlane.f32.xlu0 %v1840_v16 }
 0x63a   : > { %v5991_v40 = vpop.eup %4582 }
 0x63b   : > { %v1858_v42 = vsel %vm1113_vm2, %v5991_v40, 0.0  ;;  %v5995_v44 = vpop.eup %4584 }
 0x63c   : > { %1859 = vadd.xlane.f32.xlu0 %v1858_v42  ;;  %v1852_v21 = vsel %vm1113_vm2, %v5995_v44, 0.0  ;;  %v6013_v50 = vpop.eup %4586 }
 0x63d   : > { %v1861_v3 = vsel %vm1113_vm2, %v6013_v50, 0.0  ;;  %v6017_v6 = vpop.eup %4588 }
 0x63e   : > { %v1855_v33 = vsel %vm1113_vm2, %v6017_v6, 0.0 }
 0x640   : > { %1853 = vadd.xlane.f32.xlu0 %v1852_v21 }
 0x646   : > { %1890 = vrot.lane.b32.xlu1 %v5743_v11, %s5063_s15 }
 0x64a   : > { %1892 = vrot.lane.b32.xlu1 %v5751_v25, %s5063_s15 }
 0x656   : > { %1888 = vrot.lane.b32.xlu0 %v5731_v63, %s5063_s15 }
 0x65a   : > { %2536 = vrot.lane.b32.xlu0 %v5729_v62, %s5066_s22 }
 0x65e   : > { %2540 = vrot.lane.b32.xlu0 %v5749_v24, %s5066_s22 }
 0x662   : > { %2528 = vrot.lane.b32.xlu0 %v5729_v62, %s5067_s18  ;;  %v6029_v62 = vadd.f32 %v5913_v56, %v5831_v0  ;;  %v6043_v56 = vadd.f32 %v5831_v0, %v5923_v61  ;;  %v2270_v61 = vsel %vm1113_vm2, %v6051_v58, -inf }
 0x664   : > { %v2258_v57 = vsel %vm1113_vm2, %v6029_v62, -inf  ;;  %v2264_v17 = vsel %vm1113_vm2, %v6043_v56, -inf }
 0x666   : > { %2532 = vrot.lane.b32.xlu0 %v5749_v24, %s5067_s18  ;;  %v2252_v24 = vsel %vm1113_vm2, %v6023_v8, -inf }
 0x66e   : > { %1862 = vadd.xlane.f32.xlu1 %v1861_v3 }
 0x672   : > { %1856 = vadd.xlane.f32.xlu1 %v1855_v33 }
 0x683   : > { %1894 = vrot.lane.b32.xlu1 %v5763_v35, %s5063_s15 }
 0x685   : > { %2253 = vmax.xlane.f32.xlu0 %v2252_v24 }
 0x687   : > { %2538 = vrot.lane.b32.xlu1 %v5741_v10, %s5066_s22 }
 0x689   : > { %2259 = vmax.xlane.f32.xlu0 %v2258_v57 }
 0x68b   : > { %2542 = vrot.lane.b32.xlu1 %v5761_v34, %s5066_s22 }
 0x68d   : > { %2262 = vmax.xlane.f32.xlu0 %v2261_v15 }
 0x68f   : > { %2530 = vrot.lane.b32.xlu1 %v5741_v10, %s5067_s18 }
 0x691   : > { %2265 = vmax.xlane.f32.xlu0 %v2264_v17 }
 0x693   : > { %2534 = vrot.lane.b32.xlu1 %v5761_v34, %s5067_s18 }
 0x695   : > { %2271 = vmax.xlane.f32.xlu0 %v2270_v61 }
 0x69c   : > { %v1566_v18 = vpop.xlane.xlu0 %1565 }
 0x6a0   : > { %v1560_v19 = vpop.xlane.xlu0 %1559 }
 0x6a4   : > { %v1569_v20 = vpop.xlane.xlu1 %1568 }
 0x6a5   : > { %4590 = vrcp.f32 %v1569_v20 }
 0x6a6   : > { %4592 = vrcp.f32 %v1560_v19 }
 0x6a7   : > { %4594 = vrcp.f32 %v1566_v18 }
 0x6a8   : > { %v1563_v10 = vpop.xlane.xlu1 %1562 }
 0x6a9   : > { %4596 = vrcp.f32 %v1563_v10 }
 0x6ac   : > { %v1581_v60 = vpop.xlane.xlu1 %1580  ;;  %v1578_v4 = vpop.xlane.xlu0 %1577 }
 0x6ad   : > { %4598 = vrcp.f32 %v1581_v60 }
 0x6ae   : > { %4600 = vrcp.f32 %v1578_v4 }
 0x6af   : > { %v4591_v27 = vpop.eup %4590 }
 0x6b0   : > { %v1575_v39 = vpop.xlane.xlu1 %1574  ;;  %v1572_v29 = vpop.xlane.xlu0 %1571  ;;  %v1593_v36 = vmul.f32 %v4591_v27, %v5945_v28 }
 0x6b1   : > { %v4593_v34 = vpop.eup %4592  ;;  %4602 = vrcp.f32 %v1575_v39 }
 0x6b2   : > { %v4595_v38 = vpop.eup %4594  ;;  %4604 = vrcp.f32 %v1572_v29  ;;  %v1590_v2 = vmul.f32 %v4593_v34, %v5941_v26  ;;  %v6077_v26 = vadd.f32 %v5925_v48, %v5831_v0 }
 0x6b3   : > { %v4597_v31 = vpop.eup %4596  ;;  %v1592_v41 = vmul.f32 %v4595_v38, %v5935_v5 }
 0x6b4   : > { %v1591_v37 = vmul.f32 %v4597_v31, %v5949_v30  ;;  %v2273_v54 = vsel %vm1113_vm2, %v6077_v26, -inf }
 0x6b5   : > { %v1599_v59 = vpack.c.bf16 %v1593_v36, %v1592_v41 }
 0x6b6   : > { %v1598_v16 = vpack.c.bf16 %v1591_v37, %v1590_v2 }
 0x6b7   : > { %2256 = vmax.xlane.f32.xlu1 %v2255_v52  ;;  %v4599_v42 = vpop.eup %4598 }
 0x6b8   : > { %4136 = vmatprep.mubr.msk.bf16.mxu0 %vm1113_vm2, %v1598_v16  ;;  %v4601_v28 = vpop.eup %4600  ;;  %v1597_v45 = vmul.f32 %v4599_v42, %v5953_v46 }
 0x6b9   : > { %4137 = vmatmul.mubr.msk.bf16.vlgmr.msra.gmra.mrb[16].mxu0 %vm1113_vm2, %v1599_v59  ;;  %v1596_v23 = vmul.f32 %v4601_v28, %v5955_v49 }
 0x6bb   : > { %v4603_v5 = vpop.eup %4602  ;;  %2268 = vmax.xlane.f32.xlu1 %v2267_v1  ;;  %v1601_v32 = vpack.c.bf16 %v1597_v45, %v1596_v23 }
 0x6bc   : > { %v4605_v30 = vpop.eup %4604  ;;  %v1595_v21 = vmul.f32 %v4603_v5, %v5963_v55 }
 0x6bd   : > { %v1594_v22 = vmul.f32 %v4605_v30, %v5957_v51 }
 0x6be   : > { %v1851_v53 = vpop.xlane.xlu1 %1850 }
 0x6bf   : > { %2274 = vmax.xlane.f32.xlu1 %v2273_v54  ;;  %v1600_v48 = vpack.c.bf16 %v1595_v21, %v1594_v22 }
 0x6c1   : > { %4140 = vmatprep.mubr.msk.bf16.mxu0 %vm1113_vm2, %v1600_v48  ;;  %v1848_v3 = vpop.xlane.xlu0 %1847 }
 0x6c2   : > { %4141 = vmatmul.mubr.msk.bf16.gmra.mrb[20].mxu0 %vm1113_vm2, %v1601_v32  ;;  %v1845_v33 = vpop.xlane.xlu1 %1844 }
 0x6c3   : > { %4606 = vrcp.f32 %v1845_v33 }
 0x6c5   : > { %v1842_v55 = vpop.xlane.xlu0 %1841 }
 0x6c6   : > { %4608 = vrcp.f32 %v1842_v55  ;;  %v1891_v57 = vpop.permute.xlu1 %1890 }
 0x6c7   : > { %4610 = vrcp.f32 %v1848_v3 }
 0x6c8   : > { %4612 = vrcp.f32 %v1851_v53 }
 0x6c9   : > { %v1860_v49 = vpop.xlane.xlu0 %1859 }
 0x6ca   : > { %v1893_v10 = vpop.permute.xlu1 %1892 }
 0x6cd   : > { %v1854_v46 = vpop.xlane.xlu0 %1853  ;;  %v4607_v24 = vpop.eup %4606 }
 0x6ce   : > { %v1873_v61 = vmul.f32 %v4607_v24, %v5981_v14 }
 0x6d0   : > { %v4609_v51 = vpop.eup %4608 }
 0x6d1   : > { %v1889_v15 = vpop.permute.xlu0 %1888  ;;  %v1872_v17 = vmul.f32 %v4609_v51, %v5985_v13  ;;  %v4611_v4 = vpop.eup %4610 }
 0x6d2   : > { %4160 = vmatprep.subr.bf16.mxu0 %v1889_v15  ;;  %v4613_v39 = vpop.eup %4612  ;;  %v1874_v29 = vmul.f32 %v4611_v4, %v5979_v43  ;;  %v4527_v4 = vld [vmem:[%s6782_s9] sm:$0xff]  }
 0x6d3   : > { %4161 = vmatpush3.bf16.msra.mxu0 %v1889_v15  ;;  %v1880_v18 = vpack.c.bf16 %v1873_v61, %v1872_v17  ;;  %v1875_v38 = vmul.f32 %v4613_v39, %v5975_v7 }
 0x6d4   : > { %4162 = vmatprep.subr.bf16.mxu0 %v1891_v57 }
 0x6d5   : > { %4168 = vmatprep.mubr.msk.bf16.mxu0 %vm1113_vm2, %v1880_v18  ;;  %v2537_v19 = vpop.permute.xlu0 %2536  ;;  %v1881_v31 = vpack.c.bf16 %v1875_v38, %v1874_v29 }
 0x6d6   : > { %v2557_v20 = vsel %vm1420_vm3, %v2537_v19, 0  ;;  %4362 = vmatprep.subr.msk.bf16.mxu1 %vm1420_vm3, %v2537_v19 }
 0x6d7   : > { %4163 = vmatpush3.bf16.msra.mxu0 %v1891_v57  ;;  %4239 = vmatpush3.bf16.xpose.msra.mxu1 %v2557_v20 }
 0x6d8   : > { %4164 = vmatprep.subr.bf16.mxu0 %v1893_v10 }
 0x6d9   : > { %v2541_v60 = vpop.permute.xlu0 %2540 }
 0x6da   : > { %v2563_v30 = vsel %vm1420_vm3, %v2541_v60, 0 }
 0x6db   : > { %4165 = vmatpush3.bf16.msra.mxu0 %v1893_v10 }
 0x6dd   : > { %v2529_v13 = vpop.permute.xlu0 %2528 }
 0x6de   : > { %4246 = vmatprep.mubr.msk.bf16.mxu1 %vm1420_vm3, %v2529_v13 }
 0x6e1   : > { %v2533_v1 = vpop.permute.xlu0 %2532 }
 0x6fb   : > { %v1863_v14 = vpop.xlane.xlu1 %1862 }
 0x6fc   : > { %4614 = vrcp.f32 %v1863_v14  ;;  %v4526_v14 = vld [vmem:[%s6782_s9 + $0x8] sm:$0xff]  }
 0x6fd   : > { %4616 = vrcp.f32 %v1854_v46 }
 0x6fe   : > { %4618 = vrcp.f32 %v1860_v49 }
 0x6ff   : > { %v1857_v27 = vpop.xlane.xlu1 %1856 }
 0x700   : > { %4620 = vrcp.f32 %v1857_v27 }
 0x703   : > { %v1895_v34 = vpop.permute.xlu1 %1894 }
 0x704   : > { %4166 = vmatprep.subr.bf16.mxu0 %v1895_v34 }
 0x705   : > { %4167 = vmatpush3.bf16.msra.mxu0 %v1895_v34 }
 0x706   : > { %v4615_v36 = vpop.eup %4614  ;;  %4176 = vmatprep.subr.bf16.mxu0 %v4526_v14 }
 0x707   : > { %v2539_v2 = vpop.permute.xlu1 %2538  ;;  %v4617_v37 = vpop.eup %4616  ;;  %v1879_v43 = vmul.f32 %v4615_v36, %v6013_v50 }
 0x708   : > { %v2560_v41 = vsel %vm1420_vm3, %v2539_v2, 0  ;;  %4169 = vmatmul.mubr.msk.bf16.vlgmr.msra.gmra.mrb[24].mxu0 %vm1113_vm2, %v1881_v31  ;;  %4363 = vmatprep.subr.msk.bf16.mxu1 %vm1420_vm3, %v2539_v2  ;;  %v4619_v52 = vpop.eup %4618  ;;  %v1876_v7 = vmul.f32 %v4617_v37, %v5995_v44 }
 0x709   : > { %4241 = vmatpush3.bf16.xpose.msra.mxu1 %v2560_v41  ;;  %v1878_v42 = vmul.f32 %v4619_v52, %v5991_v40  ;;  %4177 = vmatpush3.bf16.msra.mxu0 %v4526_v14 }
 0x70a   : > { %v4621_v16 = vpop.eup %4620  ;;  %4364 = vmatprep.subr.msk.bf16.mxu1 %vm1420_vm3, %v2541_v60  ;;  %4186 = vmatprep.subr.bf16.mxu0 %v4527_v4 }
 0x70b   : > { %v1877_v59 = vmul.f32 %v4621_v16, %v6017_v6  ;;  %v1883_v5 = vpack.c.bf16 %v1879_v43, %v1878_v42  ;;  %v2543_v21 = vpop.permute.xlu1 %2542 }
 0x70c   : > { %v2566_v40 = vsel %vm1420_vm3, %v2543_v21, 0 }
 0x70d   : > { %v1882_v28 = vpack.c.bf16 %v1877_v59, %v1876_v7 }
 0x70f   : > { %4172 = vmatprep.mubr.msk.bf16.mxu0 %vm1113_vm2, %v1882_v28  ;;  %v2531_v3 = vpop.permute.xlu1 %2530 }
 0x710   : > { %4173 = vmatmul.mubr.msk.bf16.gmra.mrb[28].mxu0 %vm1113_vm2, %v1883_v5 }
 0x711   : > { %4243 = vmatpush3.bf16.xpose.msra.mxu1 %v2563_v30 }
 0x712   : > { %4365 = vmatprep.subr.msk.bf16.mxu1 %vm1420_vm3, %v2543_v21  ;;  %v2254_v50 = vpop.xlane.xlu0 %2253 }
 0x713   : > { %v2276_v44 = vsub.f32 %v6023_v8, %v2254_v50  ;;  %v2535_v51 = vpop.permute.xlu1 %2534 }
 0x715   : > { %v2284_v45 = vmul.f32 1.442695, %v2276_v44 }
 0x716   : > { %v2260_v23 = vpop.xlane.xlu0 %2259 }
 0x717   : > { %v2278_v6 = vsub.f32 %v6029_v62, %v2260_v23 }
 0x719   : > { %v2288_v22 = vmul.f32 1.442695, %v2278_v6  ;;  %4245 = vmatpush3.bf16.xpose.msra.mxu1 %v2566_v40 }
 0x71a   : > { %v2263_v53 = vpop.xlane.xlu0 %2262 }
 0x71b   : > { %4622 = vpow2.f32 %v2288_v22  ;;  %v2279_v54 = vsub.f32 %v6036_v9, %v2263_v53 }
 0x71c   : > { %4624 = vpow2.f32 %v2284_v45 }
 0x71d   : > { %v2290_v48 = vmul.f32 1.442695, %v2279_v54 }
 0x71e   : > { %v2266_v32 = vpop.xlane.xlu0 %2265 }
 0x71f   : > { %4626 = vpow2.f32 %v2290_v48  ;;  %v2280_v8 = vsub.f32 %v6043_v56, %v2266_v32 }
 0x720   : > { %4247 = vmatmul.mubr.msk.bf16.vlgmr.msra.gmra.mrb[24].mxu1 %vm1420_vm3, %v2531_v3 }
 0x721   : > { %4250 = vmatprep.mubr.msk.bf16.mxu1 %vm1420_vm3, %v2533_v1  ;;  %v2292_v49 = vmul.f32 1.442695, %v2280_v8 }
 0x722   : > { %v2272_v62 = vpop.xlane.xlu0 %2271 }
 0x723   : > { %v2282_v33 = vsub.f32 %v6051_v58, %v2272_v62 }
 0x725   : > { %v6117_v55 = vpop.eup %4622  ;;  %v2296_v46 = vmul.f32 1.442695, %v2282_v33 }
 0x726   : > { %v2306_v9 = vsel %vm1113_vm2, %v6117_v55, 0.0  ;;  %v6121_v24 = vpop.eup %4624 }
 0x727   : > { %4628 = vpow2.f32 %v2296_v46  ;;  %2307 = vadd.xlane.f32.xlu0 %v2306_v9  ;;  %v2300_v58 = vsel %vm1113_vm2, %v6121_v24, 0.0 }
 0x728   : > { %4251 = vmatmul.mubr.msk.bf16.gmra.mrb[28].mxu1 %vm1420_vm3, %v2535_v51  ;;  %4630 = vpow2.f32 %v2292_v49 }
 0x729   : > { %v6124_v56 = vpop.eup %4626 }
 0x72a   : > { %v2309_v57 = vsel %vm1113_vm2, %v6124_v56, 0.0 }
 0x72b   : > { %2301 = vadd.xlane.f32.xlu0 %v2300_v58  ;;  %2310 = vadd.xlane.f32.xlu1 %v2309_v57 }
 0x731   : > { %v6130_v15 = vpop.eup %4628 }
 0x732   : > { %v2318_v17 = vsel %vm1113_vm2, %v6130_v15, 0.0  ;;  %v6134_v61 = vpop.eup %4630 }
 0x733   : > { %2319 = vadd.xlane.f32.xlu0 %v2318_v17  ;;  %v2312_v18 = vsel %vm1113_vm2, %v6134_v61, 0.0 }
 0x737   : > { %2313 = vadd.xlane.f32.xlu0 %v2312_v18 }
 0x744   : > { %v2257_v19 = vpop.xlane.xlu1 %2256 }
 0x745   : > { %v2277_v20 = vsub.f32 %v6061_v12, %v2257_v19 }
 0x747   : > { %v2286_v10 = vmul.f32 1.442695, %v2277_v20 }
 0x748   : > { %v2269_v12 = vpop.xlane.xlu1 %2268 }
 0x749   : > { %4632 = vpow2.f32 %v2286_v10  ;;  %v2281_v29 = vsub.f32 %v6069_v47, %v2269_v12 }
 0x74b   : > { %v2294_v38 = vmul.f32 1.442695, %v2281_v29 }
 0x74c   : > { %v2275_v27 = vpop.xlane.xlu1 %2274 }
 0x74d   : > { %2344 = vrot.lane.b32.xlu0 %v5731_v63, %s5065_s20  ;;  %v2283_v39 = vsub.f32 %v6077_v26, %v2275_v27 }
 0x74f   : > { %v2298_v34 = vmul.f32 1.442695, %v2283_v39 }
 0x751   : > { %4634 = vpow2.f32 %v2298_v34 }
 0x752   : > { %4636 = vpow2.f32 %v2294_v38 }
 0x753   : > { %v6141_v60 = vpop.eup %4632 }
 0x754   : > { %v2303_v13 = vsel %vm1113_vm2, %v6141_v60, 0.0 }
 0x755   : > { %2304 = vadd.xlane.f32.xlu1 %v2303_v13 }
 0x75b   : > { %v6153_v31 = vpop.eup %4634 }
 0x75c   : > { %v2321_v37 = vsel %vm1113_vm2, %v6153_v31, 0.0  ;;  %v6157_v41 = vpop.eup %4636 }
 0x75d   : > { %v2315_v47 = vsel %vm1113_vm2, %v6157_v41, 0.0 }
 0x766   : > { %2346 = vrot.lane.b32.xlu1 %v5743_v11, %s5065_s20 }
 0x76a   : > { %2348 = vrot.lane.b32.xlu1 %v5751_v25, %s5065_s20 }
 0x78c   : > { %v4138_v36 = vpop.f32.mrb[16].mxu0 }
 0x78d   : > { %v1652_v2 = vpop.f32.mrb[17].mxu0 }
 0x78e   : > { %v4139_v52 = vpop.f32.mrb[18].mxu0  ;;  %2322 = vadd.xlane.f32.xlu1 %v2321_v37 }
 0x78f   : > { %v1684_v16 = vpack.c.bf16 %v4139_v52, %v4138_v36  ;;  %v1655_v43 = vpop.f32.mrb[19].mxu0 }
 0x790   : > { %v1683_v26 = vpack.c.bf16 %v1655_v43, %v1652_v2 }
 0x792   : > { %2316 = vadd.xlane.f32.xlu1 %v2315_v47 }
 0x795   : > { %v4142_v7 = vpop.f32.mrb[20].mxu0 }
 0x796   : > { %v1668_v59 = vpop.f32.mrb[21].mxu0 }
 0x797   : > { %v4143_v42 = vpop.f32.mrb[22].mxu0 }
 0x798   : > { %v1686_v28 = vpack.c.bf16 %v4143_v42, %v4142_v7  ;;  %v1671_v1 = vpop.f32.mrb[23].mxu0 }
 0x799   : > { %v1685_v5 = vpack.c.bf16 %v1671_v1, %v1668_v59 }
 0x7a3   : > { %2350 = vrot.lane.b32.xlu1 %v5763_v35, %s5065_s20 }
 0x7b4   : > { %v6163_v30 = vpop.xlane.xlu0 %2307 }
 0x7b8   : > { %v2302_v21 = vpop.xlane.xlu0 %2301  ;;  %v6169_v54 = vpop.xlane.xlu1 %2310 }
 0x7c0   : > { %v6165_v50 = vpop.xlane.xlu0 %2319 }
 0x7c4   : > { %v6167_v6 = vpop.xlane.xlu0 %2313 }
 0x7c8   : > { %v2345_v48 = vpop.permute.xlu0 %2344 }
 0x7db   : > { %v4170_v44 = vpop.f32.mrb[24].mxu0 }
 0x7dc   : > { %v1946_v23 = vpop.f32.mrb[25].mxu0 }
 0x7dd   : > { %v4171_v40 = vpop.f32.mrb[26].mxu0 }
 0x7de   : > { %v1978_v45 = vpack.c.bf16 %v4171_v40, %v4170_v44  ;;  %v1949_v22 = vpop.f32.mrb[27].mxu0 }
 0x7df   : > { %v1977_v53 = vpack.c.bf16 %v1949_v22, %v1946_v23 }
 0x7e1   : > { %4178 = vmatprep.mubr.msk.bf16.mxu0 %vm1420_vm3, %v1977_v53 }
 0x7e2   : > { %4179 = vmatmul.mubr.msk.bf16.vlgmr.msra.gmra.mrb[32].mxu0 %vm1420_vm3, %v1978_v45  ;;  %v2305_v8 = vpop.xlane.xlu1 %2304 }
 0x7e3   : > { %4187 = vmatpush3.bf16.msra.mxu0 %v4527_v4  ;;  %v4174_v32 = vpop.f32.mrb[28].mxu0  ;;  %4638 = vrcp.f32 %v2305_v8 }
 0x7e4   : > { %4212 = vmatprep.subr.bf16.mxu0 %v2345_v48  ;;  %v1962_v3 = vpop.f32.mrb[29].mxu0  ;;  %4640 = vrcp.f32 %v2302_v21 }
 0x7e5   : > { %v4175_v62 = vpop.f32.mrb[30].mxu0  ;;  %4642 = vrcp.f32 %v6169_v54 }
 0x7e6   : > { %v1980_v33 = vpack.c.bf16 %v4175_v62, %v4174_v32  ;;  %v1965_v49 = vpop.f32.mrb[31].mxu0  ;;  %v2347_v9 = vpop.permute.xlu1 %2346  ;;  %4644 = vrcp.f32 %v6163_v30  ;;  %v4528_v32 = vld [vmem:[%s6782_s9 + $0x10] sm:$0xff]  }
 0x7e7   : > { %v1979_v46 = vpack.c.bf16 %v1965_v49, %v1962_v3 }
 0x7e9   : > { %4182 = vmatprep.mubr.msk.bf16.mxu0 %vm1420_vm3, %v1979_v46 }
 0x7ea   : > { %4183 = vmatmul.mubr.msk.bf16.gmra.mrb[36].mxu0 %vm1420_vm3, %v1980_v33  ;;  %v2349_v13 = vpop.permute.xlu1 %2348 }
 0x7eb   : > { %4188 = vmatprep.mubr.msk.bf16.mxu0 %vm1420_vm3, %v1683_v26 }
 0x7ed   : > { %v4639_v51 = vpop.eup %4638 }
 0x7ee   : > { %v4641_v57 = vpop.eup %4640  ;;  %v2333_v20 = vmul.f32 %v4639_v51, %v6141_v60 }
 0x7ef   : > { %v2332_v27 = vmul.f32 %v4641_v57, %v6121_v24 }
 0x7f1   : > { %v2340_v60 = vpack.c.bf16 %v2333_v20, %v2332_v27 }
 0x7f2   : > { %4189 = vmatmul.mubr.msk.bf16.vlgmr.msra.gmra.mrb[32].mxu0 %vm1420_vm3, %v1684_v16 }
 0x7f3   : > { %4213 = vmatpush3.bf16.msra.mxu0 %v2345_v48  ;;  %4192 = vmatprep.mubr.msk.bf16.mxu0 %vm1420_vm3, %v1685_v5  ;;  %v4248_v58 = vpop.f32.mrb[24].mxu1 }
 0x7f4   : > { %4214 = vmatprep.subr.bf16.mxu0 %v2347_v9  ;;  %v2602_v17 = vpop.f32.mrb[25].mxu1  ;;  %v6183_v14 = vadd.f32 %v4248_v58, %v5831_v0 }
 0x7f5   : > { %v6179_v18 = vadd.f32 %v5831_v0, %v2602_v17  ;;  %v4249_v19 = vpop.f32.mrb[26].mxu1 }
 0x7f6   : > { %v2605_v10 = vpop.f32.mrb[27].mxu1  ;;  %v6195_v29 = vadd.f32 %v4249_v19, %v5831_v0  ;;  %v2639_v38 = vsel %vm1113_vm2, %v6183_v14, -inf }
 0x7f7   : > { %4215 = vmatpush3.bf16.msra.mxu0 %v2347_v9  ;;  %v6186_v4 = vadd.f32 %v5831_v0, %v2605_v10  ;;  %v2633_v12 = vsel %vm1113_vm2, %v6179_v18, -inf }
 0x7f8   : > { %4216 = vmatprep.subr.bf16.mxu0 %v2349_v13  ;;  %2634 = vmax.xlane.f32.xlu0 %v2633_v12  ;;  %v2642_v16 = vsel %vm1113_vm2, %v6195_v29, -inf }
 0x7f9   : > { %v2636_v39 = vsel %vm1113_vm2, %v6186_v4, -inf }
 0x7fa   : > { %4193 = vmatmul.mubr.msk.bf16.gmra.mrb[36].mxu0 %vm1420_vm3, %v1686_v28  ;;  %2637 = vmax.xlane.f32.xlu1 %v2636_v39 }
 0x7fb   : > { %4217 = vmatpush3.bf16.msra.mxu0 %v2349_v13  ;;  %4220 = vmatprep.mubr.msk.bf16.mxu0 %vm1113_vm2, %v2340_v60  ;;  %v4252_v34 = vpop.f32.mrb[28].mxu1 }
 0x7fc   : > { %v2618_v24 = vpop.f32.mrb[29].mxu1  ;;  %2640 = vmax.xlane.f32.xlu0 %v2639_v38  ;;  %v2627_v47 = vadd.f32 %v4252_v34, %v5831_v0 }
 0x7fd   : > { %v4253_v36 = vpop.f32.mrb[30].mxu1  ;;  %v6201_v37 = vadd.f32 %v5831_v0, %v2618_v24 }
 0x7fe   : > { %v2621_v2 = vpop.f32.mrb[31].mxu1  ;;  %v6209_v43 = vadd.f32 %v4253_v36, %v5831_v0  ;;  %v2651_v42 = vsel %vm1113_vm2, %v2627_v47, -inf }
 0x7ff   : > { %v6204_v52 = vadd.f32 %v5831_v0, %v2621_v2  ;;  %v2645_v7 = vsel %vm1113_vm2, %v6201_v37, -inf  ;;  %v4643_v0 = vpop.eup %4642 }
 0x800   : > { %2643 = vmax.xlane.f32.xlu0 %v2642_v16  ;;  %v2654_v59 = vsel %vm1113_vm2, %v6209_v43, -inf  ;;  %v4645_v5 = vpop.eup %4644  ;;  %v2335_v21 = vmul.f32 %v4643_v0, %v6124_v56 }
 0x801   : > { %v2648_v26 = vsel %vm1113_vm2, %v6204_v52, -inf  ;;  %v2334_v23 = vmul.f32 %v4645_v5, %v6117_v55 }
 0x802   : > { %2649 = vmax.xlane.f32.xlu1 %v2648_v26 }
 0x803   : > { %v2341_v40 = vpack.c.bf16 %v2335_v21, %v2334_v23 }
 0x804   : > { %2646 = vmax.xlane.f32.xlu0 %v2645_v7 }
 0x806   : > { %2655 = vmax.xlane.f32.xlu1 %v2654_v59 }
 0x808   : > { %2652 = vmax.xlane.f32.xlu0 %v2651_v42 }
 0x81b   : > { %v2323_v28 = vpop.xlane.xlu1 %2322 }
 0x81c   : > { %4646 = vrcp.f32 %v2323_v28 }
 0x81d   : > { %4648 = vrcp.f32 %v6167_v6 }
 0x81e   : > { %4650 = vrcp.f32 %v6165_v50 }
 0x81f   : > { %v2317_v1 = vpop.xlane.xlu1 %2316 }
 0x820   : > { %4652 = vrcp.f32 %v2317_v1 }
 0x823   : > { %v2351_v44 = vpop.permute.xlu1 %2350 }
 0x824   : > { %4218 = vmatprep.subr.bf16.mxu0 %v2351_v44 }
 0x825   : > { %4219 = vmatpush3.bf16.msra.mxu0 %v2351_v44 }
 0x826   : > { %v4647_v30 = vpop.eup %4646  ;;  %4228 = vmatprep.subr.bf16.mxu0 %v4528_v32 }
 0x827   : > { %v4649_v45 = vpop.eup %4648  ;;  %v2339_v50 = vmul.f32 %v4647_v30, %v6153_v31 }
 0x828   : > { %4221 = vmatmul.mubr.msk.bf16.vlgmr.msra.gmra.mrb[40].mxu0 %vm1113_vm2, %v2341_v40  ;;  %v4651_v6 = vpop.eup %4650  ;;  %v2336_v53 = vmul.f32 %v4649_v45, %v6134_v61 }
 0x829   : > { %v2338_v56 = vmul.f32 %v4651_v6, %v6130_v15  ;;  %4229 = vmatpush3.bf16.msra.mxu0 %v4528_v32 }
 0x82a   : > { %v4653_v22 = vpop.eup %4652 }
 0x82b   : > { %v2337_v54 = vmul.f32 %v4653_v22, %v6157_v41  ;;  %v2343_v55 = vpack.c.bf16 %v2339_v50, %v2338_v56 }
 0x82d   : > { %v2342_v48 = vpack.c.bf16 %v2337_v54, %v2336_v53 }
 0x82f   : > { %4224 = vmatprep.mubr.msk.bf16.mxu0 %vm1113_vm2, %v2342_v48 }
 0x830   : > { %4225 = vmatmul.mubr.msk.bf16.gmra.mrb[44].mxu0 %vm1113_vm2, %v2343_v55 }
 0x885   : > { %v2635_v3 = vpop.xlane.xlu0 %2634 }
 0x886   : > { %v2657_v8 = vsub.f32 %v6179_v18, %v2635_v3 }
 0x887   : > { %v2638_v62 = vpop.xlane.xlu1 %2637 }
 0x888   : > { %v2665_v33 = vmul.f32 1.442695, %v2657_v8  ;;  %v2658_v41 = vsub.f32 %v6186_v4, %v2638_v62 }
 0x889   : > { %v2641_v31 = vpop.xlane.xlu0 %2640 }
 0x88a   : > { %v2659_v61 = vsub.f32 %v6183_v14, %v2641_v31  ;;  %v2667_v9 = vmul.f32 1.442695, %v2658_v41 }
 0x88c   : > { %v2669_v15 = vmul.f32 1.442695, %v2659_v61 }
 0x88d   : > { %v2644_v49 = vpop.xlane.xlu0 %2643 }
 0x88e   : > { %4654 = vpow2.f32 %v2669_v15  ;;  %v2660_v46 = vsub.f32 %v6195_v29, %v2644_v49  ;;  %v4529_v15 = vld [vmem:[%s6782_s9 + $0x18] sm:$0xff]  }
 0x88f   : > { %4656 = vpow2.f32 %v2665_v33  ;;  %v2650_v36 = vpop.xlane.xlu1 %2649 }
 0x890   : > { %v2671_v51 = vmul.f32 1.442695, %v2660_v46  ;;  %v2662_v16 = vsub.f32 %v6204_v52, %v2650_v36 }
 0x891   : > { %v2647_v58 = vpop.xlane.xlu0 %2646 }
 0x892   : > { %4658 = vpow2.f32 %v2671_v51  ;;  %v2661_v57 = vsub.f32 %v6201_v37, %v2647_v58 }
 0x893   : > { %4660 = vpow2.f32 %v2667_v9  ;;  %v2656_v2 = vpop.xlane.xlu1 %2655 }
 0x894   : > { %v2673_v20 = vmul.f32 1.442695, %v2661_v57  ;;  %v2664_v37 = vsub.f32 %v6209_v43, %v2656_v2 }
 0x895   : > { %v2653_v17 = vpop.xlane.xlu0 %2652 }
 0x896   : > { %v2663_v18 = vsub.f32 %v2627_v47, %v2653_v17  ;;  %v2679_v26 = vmul.f32 1.442695, %v2664_v37  ;;  %v2675_v47 = vmul.f32 1.442695, %v2662_v16 }
 0x898   : > { %v6238_v19 = vpop.eup %4654  ;;  %v2677_v10 = vmul.f32 1.442695, %v2663_v18 }
 0x899   : > { %v2687_v13 = vsel %vm1113_vm2, %v6238_v19, 0.0  ;;  %v6242_v14 = vpop.eup %4656 }
 0x89a   : > { %4662 = vpow2.f32 %v2677_v10  ;;  %2688 = vadd.xlane.f32.xlu0 %v2687_v13  ;;  %v2681_v12 = vsel %vm1113_vm2, %v6242_v14, 0.0 }
 0x89b   : > { %4664 = vpow2.f32 %v2673_v20 }
 0x89c   : > { %v6244_v4 = vpop.eup %4658  ;;  %4666 = vpow2.f32 %v2679_v26  ;;  %v3950_v26 = vld [vmem:[%s781_s0] ss:$0 sm:$0xff] }
 0x89d   : > { %v2690_v27 = vsel %vm1113_vm2, %v6244_v4, 0.0  ;;  %v4661_v39 = vpop.eup %4660  ;;  %4668 = vpow2.f32 %v2675_v47 }
 0x89e   : > { %2682 = vadd.xlane.f32.xlu0 %v2681_v12  ;;  %2691 = vadd.xlane.f32.xlu1 %v2690_v27  ;;  %v2684_v60 = vsel %vm1113_vm2, %v4661_v39, 0.0 }
 0x8a2   : > { %2685 = vadd.xlane.f32.xlu1 %v2684_v60 }
 0x8a4   : > { %v6251_v29 = vpop.eup %4662 }
 0x8a5   : > { %v2699_v34 = vsel %vm1113_vm2, %v6251_v29, 0.0  ;;  %v6255_v38 = vpop.eup %4664 }
 0x8a6   : > { %2700 = vadd.xlane.f32.xlu0 %v2699_v34  ;;  %v2693_v24 = vsel %vm1113_vm2, %v6255_v38, 0.0  ;;  %v6267_v7 = vpop.eup %4666 }
 0x8a7   : > { %v6271_v59 = vpop.eup %4668 }
 0x8aa   : > { %2694 = vadd.xlane.f32.xlu0 %v2693_v24 }
 0x8b3   : > { %2727 = vrot.lane.b32.xlu1 %v5743_v11, %s5067_s18  ;;  %v2702_v11 = vsel %vm1113_vm2, %v6267_v7, 0.0 }
 0x8b7   : > { %2729 = vrot.lane.b32.xlu1 %v5751_v25, %s5067_s18 }
 0x8c0   : > { %2725 = vrot.lane.b32.xlu0 %v5731_v63, %s5067_s18  ;;  %v2696_v63 = vsel %vm1113_vm2, %v6271_v59, 0.0 }
 0x8db   : > { %2703 = vadd.xlane.f32.xlu1 %v2702_v11 }
 0x8df   : > { %2697 = vadd.xlane.f32.xlu1 %v2696_v63 }
 0x8f0   : > { %2731 = vrot.lane.b32.xlu1 %v5763_v35, %s5067_s18 }
 0x8fb   : > { %v4222_v25 = vpop.f32.mrb[40].mxu0 }
 0x8fc   : > { %v2402_v52 = vpop.f32.mrb[41].mxu0 }
 0x8fd   : > { %v4223_v43 = vpop.f32.mrb[42].mxu0 }
 0x8fe   : > { %v2434_v42 = vpack.c.bf16 %v4223_v43, %v4222_v25  ;;  %v2405_v28 = vpop.f32.mrb[43].mxu0 }
 0x8ff   : > { %v2433_v0 = vpack.c.bf16 %v2405_v28, %v2402_v52 }
 0x901   : > { %4230 = vmatprep.mubr.msk.bf16.mxu0 %vm1420_vm3, %v2433_v0 }
 0x902   : > { %4231 = vmatmul.mubr.msk.bf16.vlgmr.msra.gmra.mrb[32].mxu0 %vm1420_vm3, %v2434_v42  ;;  %v4720_v42 = vld [vmem:[%s5602_s16 + $0x8] sm:$0xff] }
 0x903   : > { %v4226_v1 = vpop.f32.mrb[44].mxu0 }
 0x904   : > { %v2418_v5 = vpop.f32.mrb[45].mxu0 }
 0x905   : > { %v4227_v21 = vpop.f32.mrb[46].mxu0 }
 0x906   : > { %v2436_v44 = vpack.c.bf16 %v4227_v21, %v4226_v1  ;;  %v2421_v23 = vpop.f32.mrb[47].mxu0  ;;  %v4721_v1 = vld [vmem:[%s5602_s16 + $0x18] sm:$0xff] }
 0x907   : > { %v2435_v40 = vpack.c.bf16 %v2421_v23, %v2418_v5 }
 0x909   : > { %4234 = vmatprep.mubr.msk.bf16.mxu0 %vm1420_vm3, %v2435_v40 }
 0x90a   : > { %4235 = vmatmul.mubr.msk.bf16.gmra.mrb[36].mxu0 %vm1420_vm3, %v2436_v44 }
 0x927   : > { %v2689_v35 = vpop.xlane.xlu0 %2688 }
 0x92b   : > { %v2692_v30 = vpop.xlane.xlu1 %2691  ;;  %v2683_v45 = vpop.xlane.xlu0 %2682 }
 0x92c   : > { %4670 = vrcp.f32 %v2683_v45  ;;  %v4722_v45 = vld [vmem:[%s5602_s16 + $0x20] sm:$0xff] }
 0x92f   : > { %v2686_v6 = vpop.xlane.xlu1 %2685 }
 0x930   : > { %4672 = vrcp.f32 %v2686_v6 }
 0x931   : > { %4674 = vrcp.f32 %v2692_v30 }
 0x932   : > { %4676 = vrcp.f32 %v2689_v35 }
 0x933   : > { %v2701_v22 = vpop.xlane.xlu0 %2700  ;;  %v2728_v56 = vpop.permute.xlu1 %2727 }
 0x936   : > { %v4671_v53 = vpop.eup %4670 }
 0x937   : > { %v2695_v50 = vpop.xlane.xlu0 %2694  ;;  %v2713_v55 = vmul.f32 %v4671_v53, %v6242_v14  ;;  %v2730_v8 = vpop.permute.xlu1 %2729 }
 0x93a   : > { %v4673_v54 = vpop.eup %4672 }
 0x93b   : > { %v2726_v48 = vpop.permute.xlu0 %2725  ;;  %v2714_v32 = vmul.f32 %v4673_v54, %v4661_v39  ;;  %v4675_v31 = vpop.eup %4674  ;;  %v4723_v54 = vld [vmem:[%s5602_s16 + $0x38] sm:$0xff] }
 0x93c   : > { %4254 = vmatprep.subr.bf16.mxu0 %v2726_v48  ;;  %v4677_v33 = vpop.eup %4676  ;;  %v2716_v41 = vmul.f32 %v4675_v31, %v6244_v4 }
 0x93d   : > { %4255 = vmatpush3.bf16.msra.mxu0 %v2726_v48  ;;  %v2721_v3 = vpack.c.bf16 %v2714_v32, %v2713_v55  ;;  %v2715_v46 = vmul.f32 %v4677_v33, %v6238_v19  ;;  %v4724_v48 = vld [vmem:[%s5602_s16 + $0x28] sm:$0xff]  ;;  %v4725_v32 = vld [vmem:[%s5602_s16 + $0x30] sm:$0xff] }
 0x93e   : > { %4256 = vmatprep.subr.bf16.mxu0 %v2728_v56 }
 0x93f   : > { %4262 = vmatprep.mubr.msk.bf16.mxu0 %vm1113_vm2, %v2721_v3  ;;  %v2722_v9 = vpack.c.bf16 %v2716_v41, %v2715_v46 }
 0x941   : > { %4257 = vmatpush3.bf16.msra.mxu0 %v2728_v56 }
 0x942   : > { %4258 = vmatprep.subr.bf16.mxu0 %v2730_v8 }
 0x945   : > { %4259 = vmatpush3.bf16.msra.mxu0 %v2730_v8 }
 0x968   : > { %v2704_v62 = vpop.xlane.xlu1 %2703 }
 0x969   : > { %4678 = vrcp.f32 %v2704_v62 }
 0x96a   : > { %4680 = vrcp.f32 %v2695_v50 }
 0x96b   : > { %4682 = vrcp.f32 %v2701_v22 }
 0x96c   : > { %v2698_v61 = vpop.xlane.xlu1 %2697 }
 0x96d   : > { %4684 = vrcp.f32 %v2698_v61 }
 0x970   : > { %v2732_v49 = vpop.permute.xlu1 %2731 }
 0x971   : > { %4260 = vmatprep.subr.bf16.mxu0 %v2732_v49 }
 0x972   : > { %4261 = vmatpush3.bf16.msra.mxu0 %v2732_v49 }
 0x973   : > { %4270 = vmatprep.subr.bf16.mxu0 %v4529_v15  ;;  %v4679_v51 = vpop.eup %4678 }
 0x974   : > { %v4681_v58 = vpop.eup %4680  ;;  %v2720_v18 = vmul.f32 %v4679_v51, %v6267_v7  ;;  %v4718_v7 = vld [vmem:[%s5602_s16 + $0x10] sm:$0xff] }
 0x975   : > { %4263 = vmatmul.mubr.msk.bf16.vlgmr.msra.gmra.mrb[48].mxu0 %vm1113_vm2, %v2722_v9  ;;  %v4683_v57 = vpop.eup %4682  ;;  %v2717_v20 = vmul.f32 %v4681_v58, %v6255_v38 }
 0x976   : > { %4271 = vmatpush3.bf16.msra.mxu0 %v4529_v15  ;;  %v2719_v13 = vmul.f32 %v4683_v57, %v6251_v29 }
 0x977   : > { %v4685_v17 = vpop.eup %4684 }
 0x978   : > { %v2718_v10 = vmul.f32 %v4685_v17, %v6271_v59  ;;  %v2724_v14 = vpack.c.bf16 %v2720_v18, %v2719_v13  ;;  %v4719_v59 = vld [vmem:[%s5602_s16] sm:$0xff] }
 0x97a   : > { %v2723_v19 = vpack.c.bf16 %v2718_v10, %v2717_v20 }
 0x97c   : > { %4266 = vmatprep.mubr.msk.bf16.mxu0 %vm1113_vm2, %v2723_v19 }
 0x97d   : > { %4267 = vmatmul.mubr.msk.bf16.gmra.mrb[52].mxu0 %vm1113_vm2, %v2724_v14 }
 0xa48   : > { %v4264_v4 = vpop.f32.mrb[48].mxu0 }
 0xa49   : > { %v2783_v12 = vpop.f32.mrb[49].mxu0 }
 0xa4a   : > { %v4265_v27 = vpop.f32.mrb[50].mxu0 }
 0xa4b   : > { %v2815_v39 = vpack.c.bf16 %v4265_v27, %v4264_v4  ;;  %v2786_v60 = vpop.f32.mrb[51].mxu0 }
 0xa4c   : > { %v2814_v34 = vpack.c.bf16 %v2786_v60, %v2783_v12 }
 0xa4e   : > { %4272 = vmatprep.mubr.msk.bf16.mxu0 %vm1420_vm3, %v2814_v34 }
 0xa4f   : > { %4273 = vmatmul.mubr.msk.bf16.vlgmr.msra.gmra.mrb[32].mxu0 %vm1420_vm3, %v2815_v39 }
 0xa50   : > { %v4268_v29 = vpop.f32.mrb[52].mxu0 }
 0xa51   : > { %v2799_v38 = vpop.f32.mrb[53].mxu0 }
 0xa52   : > { %v4269_v24 = vpop.f32.mrb[54].mxu0 }
 0xa53   : > { %v2817_v36 = vpack.c.bf16 %v4269_v24, %v4268_v29  ;;  %v2802_v2 = vpop.f32.mrb[55].mxu0 }
 0xa54   : > { %v2816_v37 = vpack.c.bf16 %v2802_v2, %v2799_v38 }
 0xa56   : > { %4276 = vmatprep.mubr.msk.bf16.mxu0 %vm1420_vm3, %v2816_v37 }
 0xa57   : > { %4277 = vmatmul.mubr.msk.bf16.gmra.mrb[36].mxu0 %vm1420_vm3, %v2817_v36 }
 0xb22   : > { %v4274_v16 = vpop.f32.mrb[32].mxu0 }
 0xb23   : > { %v2870_v47 = vpop.f32.mrb[33].mxu0  ;;  %v2911_v11 = vadd.f32 %v4718_v7, %v4274_v16 }
 0xb24   : > { %v2909_v63 = vadd.f32 %v4719_v59, %v2870_v47  ;;  %v4275_v25 = vpop.f32.mrb[34].mxu0 }
 0xb25   : > { %v2873_v52 = vpop.f32.mrb[35].mxu0  ;;  %v6304_v0 = vadd.f32 %v3950_v26, %v2911_v11  ;;  %v2912_v5 = vadd.f32 %v4721_v1, %v4275_v25 }
 0xb26   : > { %v6301_v43 = vadd.f32 %v3950_v26, %v2909_v63  ;;  %v2910_v28 = vadd.f32 %v4720_v42, %v2873_v52 }
 0xb27   : > { %v6313_v30 = vadd.f32 %v3950_v26, %v2912_v5  ;;  %v2940_v50 = vsel %vm1113_vm2, %v6304_v0, 0.0 }
 0xb28   : > { %v6307_v21 = vadd.f32 %v3950_v26, %v2910_v28  ;;  %v2934_v44 = vsel %vm1113_vm2, %v6301_v43, 0.0 }
 0xb29   : > { %2935 = vadd.xlane.f32.xlu0 %v2934_v44  ;;  %v2943_v31 = vsel %vm1113_vm2, %v6313_v30, 0.0 }
 0xb2a   : > { %v4278_v23 = vpop.f32.mrb[36].mxu0  ;;  %v2937_v40 = vsel %vm1113_vm2, %v6307_v21, 0.0 }
 0xb2b   : > { %2938 = vadd.xlane.f32.xlu1 %v2937_v40  ;;  %v2886_v35 = vpop.f32.mrb[37].mxu0  ;;  %v2915_v3 = vadd.f32 %v4725_v32, %v4278_v23 }
 0xb2c   : > { %v2913_v6 = vadd.f32 %v4722_v45, %v2886_v35  ;;  %v4279_v22 = vpop.f32.mrb[38].mxu0  ;;  %v4530_v45 = vld [vmem:[%s5584_s8] sm:$0xff]  }
 0xb2d   : > { %2941 = vadd.xlane.f32.xlu0 %v2940_v50  ;;  %v2889_v53 = vpop.f32.mrb[39].mxu0  ;;  %v2916_v56 = vadd.f32 %v4723_v54, %v4279_v22  ;;  %v6331_v41 = vadd.f32 %v3950_v26, %v2915_v3  ;;  %4280 = vmatprep.subr.bf16.mxu1 %v4530_v45  ;;  %v4532_v22 = vld [vmem:[%s5584_s8 + $0x10] sm:$0xff]   ;;  %v4533_v50 = vld [vmem:[%s5584_s8 + $0x18] sm:$0xff]  }
 0xb2e   : > { %v2914_v55 = vadd.f32 %v4724_v48, %v2889_v53  ;;  %v6321_v8 = vadd.f32 %v3950_v26, %v2913_v6  ;;  %4281 = vmatpush3.bf16.msra.mxu1 %v4530_v45  ;;  %v4531_v6 = vld [vmem:[%s5584_s8 + $0x8] sm:$0xff]  }
 0xb2f   : > { %v6327_v61 = vadd.f32 %v3950_v26, %v2916_v56  ;;  %v2952_v46 = vsel %vm1113_vm2, %v6331_v41, 0.0  ;;  %4282 = vmatprep.subr.bf16.mxu1 %v4531_v6 }
 0xb30   : > { %v6323_v62 = vadd.f32 %v3950_v26, %v2914_v55  ;;  %v2946_v15 = vsel %vm1113_vm2, %v6321_v8, 0.0 }
 0xb31   : > { %2944 = vadd.xlane.f32.xlu0 %v2943_v31  ;;  %v2955_v49 = vsel %vm1113_vm2, %v6327_v61, 0.0 }
 0xb32   : > { %v2949_v33 = vsel %vm1113_vm2, %v6323_v62, 0.0  ;;  %4283 = vmatpush3.bf16.msra.mxu1 %v4531_v6 }
 0xb33   : > { %2950 = vadd.xlane.f32.xlu1 %v2949_v33  ;;  %4284 = vmatprep.subr.bf16.mxu1 %v4532_v22 }
 0xb35   : > { %2947 = vadd.xlane.f32.xlu0 %v2946_v15 }
 0xb36   : > { %4285 = vmatpush3.bf16.msra.mxu1 %v4532_v22 }
 0xb37   : > { %2956 = vadd.xlane.f32.xlu1 %v2955_v49  ;;  %4286 = vmatprep.subr.bf16.mxu1 %v4533_v50 }
 0xb39   : > { %2953 = vadd.xlane.f32.xlu0 %v2952_v46 }
 0xb3a   : > { %4287 = vmatpush3.bf16.msra.mxu1 %v4533_v50 }
 0xbb6   : > { %v2936_v9 = vpop.xlane.xlu0 %2935 }
 0xbb7   : > { %v2958_v51 = vmul.f32 0.015625, %v2936_v9 }
 0xbb8   : > { %v2939_v58 = vpop.xlane.xlu1 %2938 }
 0xbb9   : > { %v6340_v57 = vsub.f32 %v6301_v43, %v2958_v51  ;;  %v2959_v17 = vmul.f32 0.015625, %v2939_v58 }
 0xbba   : > { %v2942_v18 = vpop.xlane.xlu0 %2941 }
 0xbbb   : > { %v6343_v20 = vsub.f32 %v6307_v21, %v2959_v17  ;;  %v2960_v10 = vmul.f32 0.015625, %v2942_v18  ;;  %v2974_v13 = vmul.f32 %v6340_v57, %v6340_v57 }
 0xbbd   : > { %v6348_v19 = vsub.f32 %v6304_v0, %v2960_v10  ;;  %v2982_v14 = vsel %vm1113_vm2, %v2974_v13, 0.0  ;;  %v2975_v4 = vmul.f32 %v6343_v20, %v6343_v20  ;;  %v3951_v10 = vld [vmem:[%s789_s14] ss:$0 sm:$0xff] }
 0xbbe   : > { %v2945_v12 = vpop.xlane.xlu0 %2944  ;;  %2983 = vadd.xlane.f32.xlu0 %v2982_v14 }
 0xbbf   : > { %v2961_v27 = vmul.f32 0.015625, %v2945_v12  ;;  %v2985_v39 = vsel %vm1113_vm2, %v2975_v4, 0.0  ;;  %v2976_v60 = vmul.f32 %v6348_v19, %v6348_v19 }
 0xbc0   : > { %2986 = vadd.xlane.f32.xlu1 %v2985_v39  ;;  %v2951_v34 = vpop.xlane.xlu1 %2950 }
 0xbc1   : > { %v6357_v29 = vsub.f32 %v6313_v30, %v2961_v27  ;;  %v2963_v38 = vmul.f32 0.015625, %v2951_v34  ;;  %v2988_v24 = vsel %vm1113_vm2, %v2976_v60, 0.0 }
 0xbc2   : > { %2989 = vadd.xlane.f32.xlu0 %v2988_v24  ;;  %v2948_v36 = vpop.xlane.xlu0 %2947 }
 0xbc3   : > { %v6361_v2 = vsub.f32 %v6323_v62, %v2963_v38  ;;  %v2962_v37 = vmul.f32 0.015625, %v2948_v36  ;;  %v2977_v16 = vmul.f32 %v6357_v29, %v6357_v29 }
 0xbc4   : > { %v2957_v26 = vpop.xlane.xlu1 %2956 }
 0xbc5   : > { %v6366_v47 = vsub.f32 %v6321_v8, %v2962_v37  ;;  %v2965_v7 = vmul.f32 0.015625, %v2957_v26  ;;  %v2991_v11 = vsel %vm1113_vm2, %v2977_v16, 0.0  ;;  %v2979_v59 = vmul.f32 %v6361_v2, %v6361_v2  ;;  %v3952_v37 = vld [vmem:[%s6784_s13] ss:$0 sm:$0xff] }
 0xbc6   : > { %v2954_v63 = vpop.xlane.xlu0 %2953  ;;  %2992 = vadd.xlane.f32.xlu1 %v2991_v11 }
 0xbc7   : > { %v6372_v25 = vsub.f32 %v6327_v61, %v2965_v7  ;;  %v2964_v52 = vmul.f32 0.015625, %v2954_v63  ;;  %v2978_v42 = vmul.f32 %v6366_v47, %v6366_v47  ;;  %v2997_v5 = vsel %vm1113_vm2, %v2979_v59, 0.0 }
 0xbc9   : > { %v6377_v28 = vsub.f32 %v6331_v41, %v2964_v52  ;;  %v2994_v1 = vsel %vm1113_vm2, %v2978_v42, 0.0  ;;  %v2981_v44 = vmul.f32 %v6372_v25, %v6372_v25 }
 0xbca   : > { %2995 = vadd.xlane.f32.xlu0 %v2994_v1  ;;  %2998 = vadd.xlane.f32.xlu1 %v2997_v5 }
 0xbcb   : > { %v2980_v23 = vmul.f32 %v6377_v28, %v6377_v28  ;;  %v3003_v35 = vsel %vm1113_vm2, %v2981_v44, 0.0 }
 0xbcd   : > { %v3000_v40 = vsel %vm1113_vm2, %v2980_v23, 0.0 }
 0xbce   : > { %3001 = vadd.xlane.f32.xlu0 %v3000_v40  ;;  %3004 = vadd.xlane.f32.xlu1 %v3003_v35 }
 0xc4b   : > { %v2984_v53 = vpop.xlane.xlu0 %2983 }
 0xc4c   : > { %v3006_v54 = vmul.f32 0.015625, %v2984_v53 }
 0xc4d   : > { %v2987_v56 = vpop.xlane.xlu1 %2986 }
 0xc4e   : > { %v3014_v48 = vadd.f32 1e-06, %v3006_v54  ;;  %v3007_v55 = vmul.f32 0.015625, %v2987_v56 }
 0xc4f   : > { %v2990_v32 = vpop.xlane.xlu0 %2989 }
 0xc50   : > { %4686 = vrsqrt.f32 %v3014_v48  ;;  %v3015_v3 = vadd.f32 1e-06, %v3007_v55  ;;  %v3008_v31 = vmul.f32 0.015625, %v2990_v32 }
 0xc52   : > { %4688 = vrsqrt.f32 %v3015_v3  ;;  %v3016_v33 = vadd.f32 1e-06, %v3008_v31 }
 0xc53   : > { %v2993_v15 = vpop.xlane.xlu1 %2992 }
 0xc54   : > { %4690 = vrsqrt.f32 %v3016_v33  ;;  %v3009_v49 = vmul.f32 0.015625, %v2993_v15  ;;  %v4536_v33 = vld [vmem:[%s5593_s23 + $0x10] sm:$0xff]   ;;  %v4537_v15 = vld [vmem:[%s5593_s23 + $0x18] sm:$0xff]  }
 0xc56   : > { %v3017_v46 = vadd.f32 1e-06, %v3009_v49  ;;  %v4538_v49 = vld [vmem:[%s5593_s23 + $0x20] sm:$0xff]  }
 0xc57   : > { %v2996_v9 = vpop.xlane.xlu0 %2995  ;;  %v2999_v51 = vpop.xlane.xlu1 %2998 }
 0xc58   : > { %4692 = vrsqrt.f32 %v3017_v46  ;;  %v3010_v58 = vmul.f32 0.015625, %v2996_v9  ;;  %v3011_v17 = vmul.f32 0.015625, %v2999_v51  ;;  %v4539_v46 = vld [vmem:[%s5593_s23 + $0x28] sm:$0xff]   ;;  %v4540_v9 = vld [vmem:[%s5593_s23 + $0x30] sm:$0xff]   ;;  %v4541_v51 = vld [vmem:[%s5593_s23 + $0x38] sm:$0xff]  }
 0xc5a   : > { %v4687_v18 = vpop.eup %4686  ;;  %v3018_v13 = vadd.f32 1e-06, %v3010_v58  ;;  %v3019_v14 = vadd.f32 1e-06, %v3011_v17  ;;  %v3953_v58 = vld [vmem:[%s936_s28] ss:$0 sm:$0xff] }
 0xc5b   : > { %v3030_v4 = vmul.f32 %v4687_v18, %v6340_v57  ;;  %v3002_v12 = vpop.xlane.xlu0 %3001  ;;  %v3005_v27 = vpop.xlane.xlu1 %3004 }
 0xc5c   : > { %v4689_v39 = vpop.eup %4688  ;;  %4694 = vrsqrt.f32 %v3018_v13  ;;  %v3012_v60 = vmul.f32 0.015625, %v3002_v12  ;;  %v3013_v34 = vmul.f32 0.015625, %v3005_v27 }
 0xc5d   : > { %v3031_v38 = vmul.f32 %v4689_v39, %v6343_v20  ;;  %4696 = vrsqrt.f32 %v3019_v14  ;;  %v3044_v24 = vmul.f32 %v3951_v10, %v3030_v4 }
 0xc5e   : > { %v4691_v36 = vpop.eup %4690  ;;  %v3020_v16 = vadd.f32 1e-06, %v3012_v60  ;;  %v3021_v26 = vadd.f32 1e-06, %v3013_v34 }
 0xc5f   : > { %v3032_v57 = vmul.f32 %v4691_v36, %v6348_v19  ;;  %v3045_v7 = vmul.f32 %v3951_v10, %v3031_v38  ;;  %v3058_v11 = vadd.f32 %v3952_v37, %v3044_v24 }
 0xc60   : > { %4698 = vrsqrt.f32 %v3020_v16 }
 0xc61   : > { %4700 = vrsqrt.f32 %v3021_v26  ;;  %v3059_v59 = vadd.f32 %v3952_v37, %v3045_v7  ;;  %v3046_v52 = vmul.f32 %v3951_v10, %v3032_v57 }
 0xc62   : > { %v4693_v63 = vpop.eup %4692 }
 0xc63   : > { %v3033_v20 = vmul.f32 %v4693_v63, %v6357_v29  ;;  %v3066_v42 = vpack.c.bf16 %v3059_v59, %v3058_v11  ;;  %v3060_v23 = vadd.f32 %v3952_v37, %v3046_v52 }
 0xc65   : > { %v3047_v1 = vmul.f32 %v3951_v10, %v3033_v20  ;;  %4288 = vmatprep.mubr.msk.bf16.mxu1 %vm1113_vm2, %v3066_v42 }
 0xc66   : > { %v4695_v5 = vpop.eup %4694 }
 0xc67   : > { %v4697_v44 = vpop.eup %4696  ;;  %v3061_v40 = vadd.f32 %v3952_v37, %v3047_v1  ;;  %v3034_v35 = vmul.f32 %v4695_v5, %v6366_v47 }
 0xc68   : > { %v3035_v19 = vmul.f32 %v4697_v44, %v6361_v2 }
 0xc69   : > { %v3067_v45 = vpack.c.bf16 %v3061_v40, %v3060_v23  ;;  %v3048_v6 = vmul.f32 %v3951_v10, %v3034_v35 }
 0xc6a   : > { %v4699_v22 = vpop.eup %4698  ;;  %v3049_v50 = vmul.f32 %v3951_v10, %v3035_v19 }
 0xc6b   : > { %v4701_v53 = vpop.eup %4700  ;;  %v3036_v29 = vmul.f32 %v4699_v22, %v6377_v28  ;;  %4289 = vmatmul.mubr.msk.bf16.vlgmr.msra.gmra.mrb[32].mxu1 %vm1113_vm2, %v3067_v45  ;;  %v3062_v54 = vadd.f32 %v3952_v37, %v3048_v6  ;;  %v4534_v28 = vld [vmem:[%s5593_s23] sm:$0xff]  }
 0xc6c   : > { %v3037_v56 = vmul.f32 %v4701_v53, %v6372_v25  ;;  %v3063_v48 = vadd.f32 %v3952_v37, %v3049_v50  ;;  %4296 = vmatprep.subr.bf16.mxu1 %v4534_v28  ;;  %v4535_v25 = vld [vmem:[%s5593_s23 + $0x8] sm:$0xff]  }
 0xc6d   : > { %v3050_v55 = vmul.f32 %v3951_v10, %v3036_v29  ;;  %4297 = vmatpush3.bf16.msra.mxu1 %v4534_v28 }
 0xc6e   : > { %v3068_v47 = vpack.c.bf16 %v3063_v48, %v3062_v54  ;;  %v3051_v2 = vmul.f32 %v3951_v10, %v3037_v56  ;;  %4298 = vmatprep.subr.bf16.mxu1 %v4535_v25 }
 0xc6f   : > { %v3064_v32 = vadd.f32 %v3952_v37, %v3050_v55 }
 0xc70   : > { %4292 = vmatprep.mubr.msk.bf16.mxu1 %vm1113_vm2, %v3068_v47  ;;  %v3065_v3 = vadd.f32 %v3952_v37, %v3051_v2 }
 0xc71   : > { %4299 = vmatpush3.bf16.msra.mxu1 %v4535_v25 }
 0xc72   : > { %v3069_v31 = vpack.c.bf16 %v3065_v3, %v3064_v32  ;;  %4300 = vmatprep.subr.bf16.mxu1 %v4536_v33 }
 0xc74   : > { %4293 = vmatmul.mubr.msk.bf16.gmra.mrb[36].mxu1 %vm1113_vm2, %v3069_v31 }
 0xc75   : > { %4301 = vmatpush3.bf16.msra.mxu1 %v4536_v33 }
 0xc76   : > { %4302 = vmatprep.subr.bf16.mxu1 %v4537_v15 }
 0xc79   : > { %4303 = vmatpush3.bf16.msra.mxu1 %v4537_v15 }
 0xc7a   : > { %4304 = vmatprep.subr.bf16.mxu1 %v4538_v49 }
 0xc7d   : > { %4305 = vmatpush3.bf16.msra.mxu1 %v4538_v49 }
 0xc7e   : > { %4306 = vmatprep.subr.bf16.mxu1 %v4539_v46 }
 0xc81   : > { %4307 = vmatpush3.bf16.msra.mxu1 %v4539_v46 }
 0xc82   : > { %4308 = vmatprep.subr.bf16.mxu1 %v4540_v9 }
 0xc85   : > { %4309 = vmatpush3.bf16.msra.mxu1 %v4540_v9 }
 0xc86   : > { %4310 = vmatprep.subr.bf16.mxu1 %v4541_v51 }
 0xc89   : > { %4311 = vmatpush3.bf16.msra.mxu1 %v4541_v51 }
 0xd3e   : > { %v4290_v17 = vpop.f32.mrb[32].mxu1 }
 0xd3f   : > { %v6423_v18 = vadd.f32 %v4290_v17, %v3953_v58  ;;  %v3155_v10 = vpop.f32.mrb[33].mxu1 }
 0xd40   : > { %v6425_v13 = vadd.f32 %v3953_v58, %v3155_v10  ;;  %v4291_v14 = vpop.f32.mrb[34].mxu1 }
 0xd41   : > { %v3196_v4 = vmul.f32 0.044715, %v6423_v18  ;;  %v6428_v12 = vadd.f32 %v4291_v14, %v3953_v58  ;;  %v3158_v27 = vpop.f32.mrb[35].mxu1 }
 0xd42   : > { %v3194_v39 = vmul.f32 0.044715, %v6425_v13  ;;  %v6431_v60 = vadd.f32 %v3953_v58, %v3158_v27 }
 0xd43   : > { %v3204_v34 = vmul.f32 %v3196_v4, %v6423_v18  ;;  %v3197_v38 = vmul.f32 0.044715, %v6428_v12 }
 0xd44   : > { %v3202_v24 = vmul.f32 %v3194_v39, %v6425_v13  ;;  %v3195_v36 = vmul.f32 0.044715, %v6431_v60 }
 0xd45   : > { %v3212_v37 = vmul.f32 %v3204_v34, %v6423_v18  ;;  %v3205_v16 = vmul.f32 %v3197_v38, %v6428_v12  ;;  %v3188_v34 = vmul.f32 0.5, %v6423_v18  ;;  %v3189_v38 = vmul.f32 0.5, %v6428_v12 }
 0xd46   : > { %v3210_v26 = vmul.f32 %v3202_v24, %v6425_v13  ;;  %v3203_v57 = vmul.f32 %v3195_v36, %v6431_v60  ;;  %v3186_v36 = vmul.f32 0.5, %v6425_v13 }
 0xd47   : > { %v3220_v7 = vadd.f32 %v3212_v37, %v6423_v18  ;;  %v3213_v11 = vmul.f32 %v3205_v16, %v6428_v12  ;;  %v4294_v59 = vpop.f32.mrb[36].mxu1  ;;  %v3187_v37 = vmul.f32 0.5, %v6431_v60 }
 0xd48   : > { %v3211_v63 = vmul.f32 %v3203_v57, %v6431_v60  ;;  %v6444_v52 = vadd.f32 %v4294_v59, %v3953_v58  ;;  %v3171_v20 = vpop.f32.mrb[37].mxu1  ;;  %v3218_v42 = vadd.f32 %v3210_v26, %v6425_v13 }
 0xd49   : > { %v3228_v1 = vmul.f32 0.7978846, %v3220_v7  ;;  %v3221_v5 = vadd.f32 %v3213_v11, %v6428_v12  ;;  %v6448_v44 = vadd.f32 %v3953_v58, %v3171_v20  ;;  %v4295_v23 = vpop.f32.mrb[38].mxu1 }
 0xd4a   : > { %v3200_v40 = vmul.f32 0.044715, %v6444_v52  ;;  %v3183_v35 = vadd.f32 %v4295_v23, %v3953_v58  ;;  %v3174_v19 = vpop.f32.mrb[39].mxu1  ;;  %v3219_v45 = vadd.f32 %v3211_v63, %v6431_v60  ;;  %v3226_v6 = vmul.f32 0.7978846, %v3218_v42 }
 0xd4b   : > { %4702 = vtanh.f32 %v3228_v1  ;;  %v3229_v22 = vmul.f32 0.7978846, %v3221_v5  ;;  %v3198_v50 = vmul.f32 0.044715, %v6448_v44  ;;  %v3175_v53 = vadd.f32 %v3953_v58, %v3174_v19 }
 0xd4c   : > { %v3208_v29 = vmul.f32 %v3200_v40, %v6444_v52  ;;  %v3201_v54 = vmul.f32 0.044715, %v3183_v35  ;;  %v3227_v56 = vmul.f32 0.7978846, %v3219_v45  ;;  %4704 = vtanh.f32 %v3226_v6 }
 0xd4d   : > { %4706 = vtanh.f32 %v3229_v22  ;;  %v3206_v48 = vmul.f32 %v3198_v50, %v6448_v44  ;;  %v3199_v55 = vmul.f32 0.044715, %v3175_v53  ;;  %v3192_v13 = vmul.f32 0.5, %v6444_v52 }
 0xd4e   : > { %v3216_v47 = vmul.f32 %v3208_v29, %v6444_v52  ;;  %v3209_v2 = vmul.f32 %v3201_v54, %v3183_v35  ;;  %4708 = vtanh.f32 %v3227_v56  ;;  %v3193_v23 = vmul.f32 0.5, %v3183_v35 }
 0xd4f   : > { %v3214_v32 = vmul.f32 %v3206_v48, %v6448_v44  ;;  %v3207_v3 = vmul.f32 %v3199_v55, %v3175_v53  ;;  %v3190_v40 = vmul.f32 0.5, %v6448_v44  ;;  %v3191_v19 = vmul.f32 0.5, %v3175_v53  ;;  %v3962_v48 = vld [vmem:[%s944_s12] ss:$0 sm:$0xff] }
 0xd50   : > { %v3217_v31 = vmul.f32 %v3209_v2, %v3183_v35  ;;  %v3224_v28 = vadd.f32 %v3216_v47, %v6444_v52 }
 0xd51   : > { %v3215_v25 = vmul.f32 %v3207_v3, %v3175_v53  ;;  %v3222_v33 = vadd.f32 %v3214_v32, %v6448_v44 }
 0xd52   : > { %v3225_v15 = vadd.f32 %v3217_v31, %v3183_v35  ;;  %v3232_v49 = vmul.f32 0.7978846, %v3224_v28 }
 0xd53   : > { %v3223_v46 = vadd.f32 %v3215_v25, %v3175_v53  ;;  %v3230_v9 = vmul.f32 0.7978846, %v3222_v33 }
 0xd54   : > { %v3233_v51 = vmul.f32 0.7978846, %v3225_v15  ;;  %4710 = vtanh.f32 %v3232_v49 }
 0xd55   : > { %v4703_v58 = vpop.eup %4702  ;;  %v3231_v17 = vmul.f32 0.7978846, %v3223_v46  ;;  %4712 = vtanh.f32 %v3230_v9 }
 0xd56   : > { %v4705_v10 = vpop.eup %4704  ;;  %v3244_v14 = vadd.f32 1.0, %v4703_v58  ;;  %4714 = vtanh.f32 %v3233_v51 }
 0xd57   : > { %v4707_v4 = vpop.eup %4706  ;;  %v3242_v27 = vadd.f32 1.0, %v4705_v10  ;;  %4716 = vtanh.f32 %v3231_v17 }
 0xd58   : > { %v4709_v39 = vpop.eup %4708  ;;  %v3245_v24 = vadd.f32 1.0, %v4707_v4  ;;  %v3252_v26 = vmul.f32 %v3244_v14, %v3188_v34 }
 0xd59   : > { %v3243_v16 = vadd.f32 1.0, %v4709_v39  ;;  %v3250_v7 = vmul.f32 %v3242_v27, %v3186_v36 }
 0xd5a   : > { %v3253_v57 = vmul.f32 %v3245_v24, %v3189_v38 }
 0xd5b   : > { %v3251_v11 = vmul.f32 %v3243_v16, %v3187_v37 }
 0xd5c   : > { %v3259_v59 = vpack.c.bf16 %v3253_v57, %v3252_v26 }
 0xd5d   : > { %v3258_v63 = vpack.c.bf16 %v3251_v11, %v3250_v7 }
 0xd5e   : > { %v4711_v20 = vpop.eup %4710 }
 0xd5f   : > { %v4713_v42 = vpop.eup %4712  ;;  %4312 = vmatprep.mubr.bf16.mxu1 %v3258_v63  ;;  %v3248_v1 = vadd.f32 1.0, %v4711_v20 }
 0xd60   : > { %v4715_v5 = vpop.eup %4714  ;;  %4313 = vmatmul.mubr.bf16.vlgmr.msra.gmra.mrb[40].mxu1 %v3259_v59  ;;  %v3246_v18 = vadd.f32 1.0, %v4713_v42 }
 0xd61   : > { %v4717_v12 = vpop.eup %4716  ;;  %v3249_v60 = vadd.f32 1.0, %v4715_v5  ;;  %v3256_v6 = vmul.f32 %v3248_v1, %v3192_v13 }
 0xd62   : > { %v3247_v45 = vadd.f32 1.0, %v4717_v12  ;;  %v3254_v50 = vmul.f32 %v3246_v18, %v3190_v40 }
 0xd63   : > { %v3257_v22 = vmul.f32 %v3249_v60, %v3193_v23 }
 0xd64   : > { %v3255_v29 = vmul.f32 %v3247_v45, %v3191_v19 }
 0xd65   : > { %v3261_v54 = vpack.c.bf16 %v3257_v22, %v3256_v6 }
 0xd66   : > { %v3260_v56 = vpack.c.bf16 %v3255_v29, %v3254_v50 }
 0xd68   : > { %4316 = vmatprep.mubr.bf16.mxu1 %v3260_v56 }
 0xd69   : > { %4317 = vmatmul.mubr.bf16.gmra.mrb[44].mxu1 %v3261_v54 }
 0xe33   : > { %v4314_v52 = vpop.f32.mrb[40].mxu1 }
 0xe34   : > { %v3376_v35 = vadd.f32 %v4314_v52, %v3962_v48  ;;  %v3367_v55 = vpop.f32.mrb[41].mxu1 }
 0xe35   : > { %v3368_v47 = vadd.f32 %v3962_v48, %v3367_v55  ;;  %v4315_v44 = vpop.f32.mrb[42].mxu1 }
 0xe36   : > { %v3400_v53 = vadd.f32 %v3376_v35, %v6304_v0  ;;  %v3379_v2 = vadd.f32 %v4315_v44, %v3962_v48  ;;  %v3370_v32 = vpop.f32.mrb[43].mxu1 }
 0xe37   : > { %v3398_v3 = vadd.f32 %v3368_v47, %v6301_v43  ;;  %v3371_v31 = vadd.f32 %v3962_v48, %v3370_v32 }
 0xe38   : > { %v3401_v28 = vadd.f32 %v3379_v2, %v6313_v30  ;;  %3412 = vst.msk [vmem:[%s5602_s16 + $0x10] sm:$0xff] (!%p3971_p3), %vm1113_vm2, %v3400_v53 }
 0xe39   : > { %v3399_v25 = vadd.f32 %v3371_v31, %v6307_v21  ;;  %3410 = vst.msk [vmem:[%s5602_s16] sm:$0xff] (!%p3971_p3), %vm1113_vm2, %v3398_v3 }
 0xe3a   : > { %3413 = vst.msk [vmem:[%s5602_s16 + $0x18] sm:$0xff] (!%p3971_p3), %vm1113_vm2, %v3401_v28 }
 0xe3b   : > { %3411 = vst.msk [vmem:[%s5602_s16 + $0x8] sm:$0xff] (!%p3971_p3), %vm1113_vm2, %v3399_v25 }
 0xe3c   : > { %v4318_v33 = vpop.f32.mrb[44].mxu1  ;;  %3409 = sbr.rel (%p3971_p3) target bundleno = 3653 (0xe45), region = 128 }
 0xe3d   : > { %v3392_v15 = vadd.f32 %v4318_v33, %v3962_v48  ;;  %v3383_v49 = vpop.f32.mrb[45].mxu1 }
 0xe3e   : > { %v3384_v46 = vadd.f32 %v3962_v48, %v3383_v49  ;;  %v4319_v9 = vpop.f32.mrb[46].mxu1 }
 0xe3f   : > { %v6475_v51 = vadd.f32 %v3392_v15, %v6331_v41  ;;  %v3395_v58 = vadd.f32 %v4319_v9, %v3962_v48  ;;  %v3386_v17 = vpop.f32.mrb[47].mxu1 }
 0xe40   : > { %v3402_v0 = vadd.f32 %v3384_v46, %v6321_v8  ;;  %v3387_v10 = vadd.f32 %v3962_v48, %v3386_v17 }
 0xe41   : > { %v6479_v43 = vadd.f32 %v3395_v58, %v6327_v61  ;;  %3416 = vst.msk [vmem:[%s5602_s16 + $0x30] sm:$0xff] (!%p3971_p3), %vm1113_vm2, %v6475_v51 }
 0xe42   : > { %v3403_v30 = vadd.f32 %v3387_v10, %v6323_v62  ;;  %3414 = vst.msk [vmem:[%s5602_s16 + $0x20] sm:$0xff] (!%p3971_p3), %vm1113_vm2, %v3402_v0 }
 0xe43   : > { %3417 = vst.msk [vmem:[%s5602_s16 + $0x38] sm:$0xff] %vm1113_vm2, %v6479_v43 }
 0xe44   : > { %3415 = vst.msk [vmem:[%s5602_s16 + $0x28] sm:$0xff] %vm1113_vm2, %v3403_v30 }
 0xe45 PF: > { %p3972_p6 = scmp.ne.s32.totalorder %s5034_s2, 1 }
 0xe46   : > { %v3424_v21 = vsel (!%p3972_p6), %vm1113_vm2, %v3398_v3, 0.0  ;;  %v3430_v8 = vsel (!%p3972_p6), %vm1113_vm2, %v3400_v53, 0.0  ;;  %v3427_v62 = vsel (!%p3972_p6), %vm1113_vm2, %v3399_v25, 0.0  ;;  %v3433_v61 = vsel (!%p3972_p6), %vm1113_vm2, %v3401_v28, 0.0  ;;  %s6787_s17 = sld [smem:[#allocation49_spill]] (!%p3972_p6)  ;;  %s6788_s0 = sld [smem:[#allocation50_spill]] (!%p3972_p6) }
 0xe47   : > { %3421 = sbr.rel (%p3972_p6) target bundleno = 3984 (0xf90), region = 132  ;;  %3425 = vadd.xlane.f32.xlu0 (!%p3972_p6), %v3424_v21  ;;  %3431 = vadd.xlane.f32.xlu1 (!%p3972_p6), %v3430_v8  ;;  %v3436_v41 = vsel (!%p3972_p6), %vm1113_vm2, %v3402_v0, 0.0  ;;  %v3439_v14 = vsel (!%p3972_p6), %vm1113_vm2, %v3403_v30, 0.0  ;;  %v3442_v4 = vsel (!%p3972_p6), %vm1113_vm2, %v6475_v51, 0.0  ;;  %v3445_v27 = vsel (!%p3972_p6), %vm1113_vm2, %v6479_v43, 0.0 }
 0xe4b   : > { %3428 = vadd.xlane.f32.xlu0 (!%p3972_p6), %v3427_v62  ;;  %3434 = vadd.xlane.f32.xlu1 (!%p3972_p6), %v3433_v61 }
 0xe4f   : > { %3437 = vadd.xlane.f32.xlu0 %v3436_v41  ;;  %3440 = vadd.xlane.f32.xlu1 %v3439_v14  ;;  %v3973_v41 = vld [vmem:[%s6787_s17] ss:$0 sm:$0xff] }
 0xe53   : > { %3443 = vadd.xlane.f32.xlu0 %v3442_v4  ;;  %3446 = vadd.xlane.f32.xlu1 %v3445_v27 }
 0xed4   : > { %v3426_v39 = vpop.xlane.xlu0 %3425  ;;  %v3432_v34 = vpop.xlane.xlu1 %3431 }
 0xed5   : > { %v3448_v38 = vmul.f32 0.015625, %v3426_v39  ;;  %v3450_v24 = vmul.f32 0.015625, %v3432_v34  ;;  %v3974_v34 = vld [vmem:[%s6788_s0] ss:$0 sm:$0xff] }
 0xed7   : > { %v6512_v36 = vsub.f32 %v3398_v3, %v3448_v38  ;;  %v6514_v37 = vsub.f32 %v3400_v53, %v3450_v24 }
 0xed8   : > { %v3429_v16 = vpop.xlane.xlu0 %3428  ;;  %v3435_v26 = vpop.xlane.xlu1 %3434 }
 0xed9   : > { %v3449_v57 = vmul.f32 0.015625, %v3429_v16  ;;  %v3451_v7 = vmul.f32 0.015625, %v3435_v26  ;;  %v3464_v11 = vmul.f32 %v6512_v36, %v6512_v36  ;;  %v3466_v59 = vmul.f32 %v6514_v37, %v6514_v37 }
 0xedb   : > { %v6520_v63 = vsub.f32 %v3399_v25, %v3449_v57  ;;  %v6522_v20 = vsub.f32 %v3401_v28, %v3451_v7  ;;  %v3472_v42 = vsel %vm1113_vm2, %v3464_v11, 0.0  ;;  %v3478_v18 = vsel %vm1113_vm2, %v3466_v59, 0.0 }
 0xedc   : > { %3473 = vadd.xlane.f32.xlu0 %v3472_v42  ;;  %v3438_v1 = vpop.xlane.xlu0 %3437  ;;  %v3441_v5 = vpop.xlane.xlu1 %3440 }
 0xedd   : > { %v3452_v12 = vmul.f32 0.015625, %v3438_v1  ;;  %v3453_v13 = vmul.f32 0.015625, %v3441_v5  ;;  %v3465_v23 = vmul.f32 %v6520_v63, %v6520_v63  ;;  %v3467_v60 = vmul.f32 %v6522_v20, %v6522_v20 }
 0xedf   : > { %v6530_v40 = vsub.f32 %v3402_v0, %v3452_v12  ;;  %v6532_v19 = vsub.f32 %v3403_v30, %v3453_v13  ;;  %v3475_v45 = vsel %vm1113_vm2, %v3465_v23, 0.0  ;;  %v3481_v50 = vsel %vm1113_vm2, %v3467_v60, 0.0 }
 0xee0   : > { %3479 = vadd.xlane.f32.xlu0 %v3478_v18  ;;  %3476 = vadd.xlane.f32.xlu1 %v3475_v45  ;;  %v3444_v6 = vpop.xlane.xlu0 %3443  ;;  %v3447_v22 = vpop.xlane.xlu1 %3446 }
 0xee1   : > { %v3454_v29 = vmul.f32 0.015625, %v3444_v6  ;;  %v3455_v54 = vmul.f32 0.015625, %v3447_v22  ;;  %v3468_v56 = vmul.f32 %v6530_v40, %v6530_v40  ;;  %v3469_v48 = vmul.f32 %v6532_v19, %v6532_v19 }
 0xee3   : > { %v6541_v52 = vsub.f32 %v6475_v51, %v3454_v29  ;;  %v6544_v35 = vsub.f32 %v6479_v43, %v3455_v54  ;;  %v3484_v55 = vsel %vm1113_vm2, %v3468_v56, 0.0  ;;  %v3487_v47 = vsel %vm1113_vm2, %v3469_v48, 0.0 }
 0xee4   : > { %3482 = vadd.xlane.f32.xlu1 %v3481_v50  ;;  %3485 = vadd.xlane.f32.xlu0 %v3484_v55 }
 0xee5   : > { %v3470_v44 = vmul.f32 %v6541_v52, %v6541_v52  ;;  %v3471_v53 = vmul.f32 %v6544_v35, %v6544_v35 }
 0xee7   : > { %v3490_v2 = vsel %vm1113_vm2, %v3470_v44, 0.0  ;;  %v3493_v32 = vsel %vm1113_vm2, %v3471_v53, 0.0 }
 0xee8   : > { %3488 = vadd.xlane.f32.xlu1 %v3487_v47  ;;  %3491 = vadd.xlane.f32.xlu0 %v3490_v2 }
 0xeec   : > { %3494 = vadd.xlane.f32.xlu1 %v3493_v32 }
 0xf69   : > { %v3474_v3 = vpop.xlane.xlu0 %3473 }
 0xf6a   : > { %v3496_v31 = vmul.f32 0.015625, %v3474_v3 }
 0xf6c   : > { %v3504_v28 = vadd.f32 1e-06, %v3496_v31 }
 0xf6d   : > { %v3477_v25 = vpop.xlane.xlu1 %3476  ;;  %v3480_v33 = vpop.xlane.xlu0 %3479 }
 0xf6e   : > { %4726 = vrsqrt.f32 %v3504_v28  ;;  %v3497_v15 = vmul.f32 0.015625, %v3477_v25  ;;  %v3498_v49 = vmul.f32 0.015625, %v3480_v33 }
 0xf70   : > { %v3505_v46 = vadd.f32 1e-06, %v3497_v15  ;;  %v3506_v9 = vadd.f32 1e-06, %v3498_v49 }
 0xf71   : > { %v3483_v51 = vpop.xlane.xlu1 %3482  ;;  %v3486_v58 = vpop.xlane.xlu0 %3485 }
 0xf72   : > { %4728 = vrsqrt.f32 %v3505_v46  ;;  %v3499_v17 = vmul.f32 0.015625, %v3483_v51  ;;  %v3500_v0 = vmul.f32 0.015625, %v3486_v58 }
 0xf73   : > { %4730 = vrsqrt.f32 %v3506_v9 }
 0xf74   : > { %v3507_v10 = vadd.f32 1e-06, %v3499_v17  ;;  %v3508_v43 = vadd.f32 1e-06, %v3500_v0 }
 0xf75   : > { %v3489_v30 = vpop.xlane.xlu1 %3488  ;;  %v3492_v21 = vpop.xlane.xlu0 %3491 }
 0xf76   : > { %4732 = vrsqrt.f32 %v3507_v10  ;;  %v3501_v8 = vmul.f32 0.015625, %v3489_v30  ;;  %v3502_v62 = vmul.f32 0.015625, %v3492_v21 }
 0xf77   : > { %4734 = vrsqrt.f32 %v3508_v43 }
 0xf78   : > { %v4727_v61 = vpop.eup %4726  ;;  %v3509_v14 = vadd.f32 1e-06, %v3501_v8  ;;  %v3510_v4 = vadd.f32 1e-06, %v3502_v62 }
 0xf79   : > { %v3520_v27 = vmul.f32 %v4727_v61, %v6512_v36  ;;  %v3495_v39 = vpop.xlane.xlu1 %3494 }
 0xf7a   : > { %4736 = vrsqrt.f32 %v3509_v14  ;;  %v3503_v38 = vmul.f32 0.015625, %v3495_v39 }
 0xf7b   : > { %v3534_v24 = vmul.f32 %v3973_v41, %v3520_v27  ;;  %4738 = vrsqrt.f32 %v3510_v4 }
 0xf7c   : > { %v4729_v16 = vpop.eup %4728  ;;  %v3511_v26 = vadd.f32 1e-06, %v3503_v38 }
 0xf7d   : > { %v4731_v57 = vpop.eup %4730  ;;  %v3548_v7 = vadd.f32 %v3974_v34, %v3534_v24  ;;  %v3521_v11 = vmul.f32 %v4729_v16, %v6520_v63 }
 0xf7e   : > { %v3522_v59 = vmul.f32 %v4731_v57, %v6514_v37  ;;  %4740 = vrsqrt.f32 %v3511_v26 }
 0xf7f   : > { %3556 = vst.msk [vmem:[%s5602_s16] sm:$0xff] %vm1113_vm2, %v3548_v7  ;;  %v3535_v36 = vmul.f32 %v3973_v41, %v3521_v11 }
 0xf80   : > { %v4733_v42 = vpop.eup %4732  ;;  %v3536_v1 = vmul.f32 %v3973_v41, %v3522_v59 }
 0xf81   : > { %v4735_v5 = vpop.eup %4734  ;;  %v3549_v18 = vadd.f32 %v3974_v34, %v3535_v36  ;;  %v3523_v12 = vmul.f32 %v4733_v42, %v6522_v20 }
 0xf82   : > { %v3550_v13 = vadd.f32 %v3974_v34, %v3536_v1  ;;  %v3524_v23 = vmul.f32 %v4735_v5, %v6530_v40 }
 0xf83   : > { %3557 = vst.msk [vmem:[%s5602_s16 + $0x8] sm:$0xff] %vm1113_vm2, %v3549_v18  ;;  %v3537_v63 = vmul.f32 %v3973_v41, %v3523_v12 }
 0xf84   : > { %v4737_v60 = vpop.eup %4736  ;;  %3558 = vst.msk [vmem:[%s5602_s16 + $0x10] sm:$0xff] %vm1113_vm2, %v3550_v13  ;;  %v3538_v37 = vmul.f32 %v3973_v41, %v3524_v23 }
 0xf85   : > { %v4739_v45 = vpop.eup %4738  ;;  %v3551_v6 = vadd.f32 %v3974_v34, %v3537_v63  ;;  %v3525_v22 = vmul.f32 %v4737_v60, %v6532_v19 }
 0xf86   : > { %v3552_v50 = vadd.f32 %v3974_v34, %v3538_v37  ;;  %v3526_v20 = vmul.f32 %v4739_v45, %v6541_v52 }
 0xf87   : > { %3559 = vst.msk [vmem:[%s5602_s16 + $0x18] sm:$0xff] %vm1113_vm2, %v3551_v6  ;;  %v3539_v40 = vmul.f32 %v3973_v41, %v3525_v22 }
 0xf88   : > { %v4741_v29 = vpop.eup %4740  ;;  %3560 = vst.msk [vmem:[%s5602_s16 + $0x20] sm:$0xff] %vm1113_vm2, %v3552_v50  ;;  %v3540_v54 = vmul.f32 %v3973_v41, %v3526_v20 }
 0xf89   : > { %v3553_v56 = vadd.f32 %v3974_v34, %v3539_v40  ;;  %v3527_v48 = vmul.f32 %v4741_v29, %v6544_v35 }
 0xf8a   : > { %v3554_v55 = vadd.f32 %v3974_v34, %v3540_v54 }
 0xf8b   : > { %3561 = vst.msk [vmem:[%s5602_s16 + $0x28] sm:$0xff] %vm1113_vm2, %v3553_v56  ;;  %v3541_v47 = vmul.f32 %v3973_v41, %v3527_v48 }
 0xf8c   : > { %3562 = vst.msk [vmem:[%s5602_s16 + $0x30] sm:$0xff] %vm1113_vm2, %v3554_v55 }
 0xf8d   : > { %v3555_v19 = vadd.f32 %v3974_v34, %v3541_v47 }
 0xf8f   : > { %3563 = vst.msk [vmem:[%s5602_s16 + $0x38] sm:$0xff] %vm1113_vm2, %v3555_v19 }
 0xf90 PF: > { %s6789_s7 = sld [smem:[#allocation21_spill]]  ;;  %s6790_s30 = sld [smem:[#allocation29_spill]] }
 0xf91   : > { %s6791_s10 = sld [smem:[#allocation51_spill]]  ;;  %s3578_s27 = sshll.u32 %s5602_s16, 4  ;;  %s6591_s27 = int_to_ptr.vmem [resolvable:$true] %s3578_s27 }
 0xf92   : > { %s3565_s20 = scalar_lea.sflag [#allocation4], %s5523_s24  ;;  %s4920_s29 = scalar_lea.vmem %s6591_s27, 1024 }
 0xf93   : > { %p4921_p5 = scmp.ne.s32.totalorder %s6591_s27, %s4920_s29  ;;  %s5068_s22 = smov [#allocation11]  }
 0xf94   : > { %s4924_s18 = sshll.u32 %s5068_s22, 4  ;;  %s4925_s18 = int_to_ptr.vmem [resolvable:$false] %s4924_s18 }
 0xf95   : > { %s4926_s9 = scalar_lea.vmem %s4925_s18, 2048  ;;  %p4927_p0 = scmp.lt.s32.totalorder %s6591_s27, %s4925_s18 }
 0xf96   : > { %s3986_s21 = sshll.u32 %s6789_s7, 10  ;;  %p6792_p1 = scmp.ne.s32.totalorder %s6790_s30, 0 }
 0xf97   : > { %s6588_s15 = scalar_lea.hbm %s6791_s10, %s3986_s21  ;;  %p4928_p10 = scmp.lt.s32.totalorder %s4926_s9, %s4920_s29 }
 0xf98   : > { %p4922_p9 = pnand %p4921_p5, %p6792_p1 }
 0xf99   : > { %p4929_p8 = por %p4928_p10, %p4927_p0 }
 0xf9a   : > { %p4923_p13 = pneg %p4922_p9 }
 0xf9c   : > { %p4930_p11 = pnand %p4929_p8, %p4923_p13 }
 0xf9e   : > { %4933 = shalt.err (!%p4930_p11)
}
 0xf9f   : > { %s4934_s16 = scalar_lea.hbm %s6588_s15, 1024  ;;  %s4938_s6 = scalar_lea.hbm %s6791_s10, 2048 }
 0xfa0   : > { %p4935_p7 = scmp.ne.s32.totalorder %s6588_s15, %s4934_s16  ;;  %p4939_p12 = scmp.lt.u32.totalorder %s6588_s15, %s6791_s10 }
 0xfa1   : > { %p4940_p3 = scmp.lt.u32.totalorder %s4938_s6, %s4934_s16  ;;  %p4942_p5 = scmp.lt.u32.totalorder %s4934_s16, %s6588_s15 }
 0xfa2   : > { %p4936_p4 = pnand %p4935_p7, %p6792_p1 }
 0xfa3   : > { %p4941_p6 = por %p4940_p3, %p4939_p12 }
 0xfa4   : > { %p4937_p2 = pneg %p4936_p4 }
 0xfa5   : > { %p4943_p9 = por %p4942_p5, %p4941_p6 }
 0xfa7   : > { %p4944_p13 = pnand %p4943_p9, %p4937_p2 }
 0xfa9   : > { %4947 = shalt.err (!%p4944_p13)
}
 0xfaa   : > { %s5069_s26 = smov 128   ;;  %s5070_s11 = smov 8  }
 0xfab   : > { %4380 = dma.vmem_to_hbm [thread:$0]  (%p6792_p1), %s6591_s27, 1024, %s6588_s15, %s3565_s20, %s5069_s26, %s5069_s26, %s5070_s11  }
 0xfac PF: > { %s6793_s23 = sld [smem:[#allocation24_spill]]  ;;  %s6794_s28 = sld [smem:[#allocation18_spill]] }
 0xfad   : > { %s6795_s19 = sld [smem:[#allocation30_spill]] }
 0xfb2   : > { %p4409_p0 = scmp.ge.s32.totalorder %s6793_s23, 2  ;;  %s3593_s2 = sand.u32 1, %s6794_s28  }
 0xfb3   : > { %p6796_p10 = scmp.ne.s32.totalorder %s6795_s19, 0  ;;  %s3594_s4 = scalar_lea.sflag [#allocation4], %s3593_s2 }
 0xfb5   : > { %p4403_p8 = pnand %p4409_p0, %p6796_p10 }
 0xfb7   : > { %5005 = dma.done.wait (!%p4403_p8), %s3594_s4, 1024  }
 0xfb8   : > { %5007 = vsyncadd (!%p4403_p8), %s3594_s4, 4294966272  ;;  %s36_s3 = sadd.s32 1, %s6793_s23   ;;  %s6797_s0 = sld [smem:[#allocation16_spill]] }
 0xfb9   : > { %p33_p11 = scmp.ge.s32.totalorder %s36_s3, 6   ;;  %s6798_s30 = sld [smem:[#allocation17_spill]] }
 0xfba   : > { %s6799_s20 = sld [smem:[#allocation27_spill]]  ;;  %s6800_s21 = sld [smem:[#allocation19_spill]] }
 0xfbb   : > { %s6801_s1 = sld [smem:[#allocation20_spill]]  ;;  %s6802_s22 = sld [smem:[#allocation28_spill]] }
 0xfbc   : > { %s6803_s2 = sld [smem:[#allocation22_spill]]  ;;  %s6804_s23 = sld [smem:[#allocation23_spill]] }
 0xfbd   : > { %s6805_s24 = sld [smem:[#allocation25_spill]]  ;;  %s6806_s25 = sld [smem:[#allocation26_spill]] }
 0xfbe   :  { %35 = sbr.rel (!%p33_p11) target bundleno = 31 (0x1f), region = 231 }
 0xfc5   :  { %3599 = vsyncpa [#allocation3], 1 }
 0xfc6   :  { %3601 = vsyncpa [#allocation3 + $0x1], 1 }
 0xfc7   :  { %3602 = vsyncpa [#allocation6], 1 }
 0xfc8   :  { %3603 = vsyncpa [#allocation4], 1 }
 0xfc9   :  { %3605 = vsyncpa [#allocation4 + $0x1], 1 }

</bundles_post_ra>
